<compile_context>
chip_gen: v7x
topology: tpu7x:2x2x1
jax: 0.10.0
libtpu: 0.0.40
codegen_flags: <defaults>
</compile_context>

<pallas_src>
import jax
import jax.numpy as jnp
from jax.experimental import pallas as pl
from jax.experimental.pallas import tpu as pltpu

# ----------------------- LSTNET config (small synthetic) -----------------------
B     = 2            # batch
P     = 32           # window
M     = 4            # m = num_nodes * input_dim
HID_R = 32           # hidRNN
HID_C = 16           # hidCNN
HID_S = 4            # hidSkip
CK    = 6            # CNN_kernel
SKIP  = 8            # skip
HW    = 8            # highway_window
T     = P - CK + 1           # conv output length (27)
PT    = (P - CK) // SKIP     # pt (3)
T0    = T - PT * SKIP        # start of the skip slice along conv time (3)
B_PAD = 8                    # batch padded to a sublane multiple


def lstnet_kernel(xh_ref, xp_ref, wc_ref, bc_ref,
                  wih1_ref, bih1_ref, whh1_ref, bhh1_ref,
                  wih2_ref, bih2_ref, whh2_ref, bhh2_ref,
                  w1_ref, b1_ref, wh_ref, bh_ref,
                  out_ref,
                  c_ref, g1_ref, gs_ref):
    # ---- conv1 (im2col matmul) + ReLU; dropout == identity (eval) ---------------
    c_ref[...] = jnp.maximum(
        jnp.dot(xp_ref[...], wc_ref[...], preferred_element_type=jnp.float32)
        + bc_ref[...], 0.0)                                   # (T*B_PAD, HID_C)

    # ---- hoisted input-gate projections (single big matmuls, off the
    #      sequential critical path); columns ordered [r | z | n] ----------------
    g1_ref[...] = (jnp.dot(c_ref[...], wih1_ref[...],
                           preferred_element_type=jnp.float32)
                   + bih1_ref[...])                           # (T*B_PAD, 3*HID_R)
    gs_ref[...] = (jnp.dot(c_ref[T0 * B_PAD:T * B_PAD, :], wih2_ref[...],
                           preferred_element_type=jnp.float32)
                   + bih2_ref[...])                           # (PT*SKIP*B_PAD, 3*HID_S)

    # ---- GRU1: T sequential steps, fully unrolled, packed recurrent weights,
    #      hidden state carried in vregs ------------------------------------------
    whh1 = whh1_ref[...]                                      # (HID_R, 3*HID_R)
    bhh1 = jnp.broadcast_to(bhh1_ref[...], (B_PAD, 3 * HID_R))
    h1 = jnp.zeros((B_PAD, HID_R), jnp.float32)
    for t in range(T):
        gx = g1_ref[t * B_PAD:(t + 1) * B_PAD, :]             # (B_PAD, 3*HID_R)
        gh = jnp.dot(h1, whh1, preferred_element_type=jnp.float32) + bhh1
        r = jax.nn.sigmoid(gx[:, :HID_R] + gh[:, :HID_R])
        z = jax.nn.sigmoid(gx[:, HID_R:2 * HID_R] + gh[:, HID_R:2 * HID_R])
        n = jnp.tanh(gx[:, 2 * HID_R:] + r * gh[:, 2 * HID_R:])
        h1 = (1.0 - z) * n + z * h1

    # ---- GRUskip: PT steps over (skip-phase q, batch b) rows --------------------
    whh2 = whh2_ref[...]                                      # (HID_S, 3*HID_S)
    bhh2 = jnp.broadcast_to(bhh2_ref[...], (SKIP * B_PAD, 3 * HID_S))
    hs = jnp.zeros((SKIP * B_PAD, HID_S), jnp.float32)
    for p in range(PT):
        gx = gs_ref[p * SKIP * B_PAD:(p + 1) * SKIP * B_PAD, :]
        gh = jnp.dot(hs, whh2, preferred_element_type=jnp.float32) + bhh2
        r = jax.nn.sigmoid(gx[:, :HID_S] + gh[:, :HID_S])
        z = jax.nn.sigmoid(gx[:, HID_S:2 * HID_S] + gh[:, HID_S:2 * HID_S])
        n = jnp.tanh(gx[:, 2 * HID_S:] + r * gh[:, 2 * HID_S:])
        hs = (1.0 - z) * n + z * hs

    # ---- linear1 on concat(r, s): relayout hs to (B_PAD, SKIP*HID_S) by lane
    #      concat and do ONE dot against W1.T --------------------------------------
    r_cat = jnp.concatenate(
        [h1] + [hs[q * B_PAD:(q + 1) * B_PAD, :] for q in range(SKIP)], axis=1)
    res = jnp.dot(r_cat, w1_ref[...], preferred_element_type=jnp.float32) + b1_ref[...]

    # ---- highway (autoregressive) component, fully vectorized --------------------
    z_hw = jnp.sum(xh_ref[...] * wh_ref[...], axis=1) + bh_ref[...]   # (B_PAD, M)

    # ---- output_fun == 'sigmoid' --------------------------------------------------
    out_ref[...] = jax.nn.sigmoid(res + z_hw)


def init_params(key):
    ks = jax.random.split(key, 14)

    def u(k, shape, scale=0.1):
        return jax.random.uniform(k, shape, jnp.float32, -scale, scale)

    return dict(
        conv_w=u(ks[0], (HID_C, 1, CK, M)),        # nn.Conv2d(1, hidC, (Ck, m))
        conv_b=u(ks[1], (HID_C,)),
        w_ih1=u(ks[2], (3 * HID_R, HID_C)),        # nn.GRU(hidC, hidR)
        w_hh1=u(ks[3], (3 * HID_R, HID_R)),
        b_ih1=u(ks[4], (3 * HID_R,)),
        b_hh1=u(ks[5], (3 * HID_R,)),
        w_ih2=u(ks[6], (3 * HID_S, HID_C)),        # nn.GRU(hidC, hidS)
        w_hh2=u(ks[7], (3 * HID_S, HID_S)),
        b_ih2=u(ks[8], (3 * HID_S,)),
        b_hh2=u(ks[9], (3 * HID_S,)),
        W1=u(ks[10], (M, HID_R + SKIP * HID_S)),   # nn.Linear(hidR+skip*hidS, m)
        b1=u(ks[11], (M,)),
        Wh=u(ks[12], (1, HW)),                     # nn.Linear(hw, 1) highway
        bh=u(ks[13], (1,)),
    )


@jax.jit
def lstnet_forward(x, params):
    # --- glue (layout plumbing only): batch pad, im2col, parameter packing ---
    xpad = jnp.zeros((B_PAD, P, M), jnp.float32).at[:B].set(x)
    idx = jnp.arange(T)[:, None] + jnp.arange(CK)[None, :]               # (T, CK)
    xp = xpad[:, idx, :]                                                 # (B_PAD, T, CK, M)
    xp = jnp.transpose(xp, (1, 0, 2, 3)).reshape(T * B_PAD, CK * M)      # time-major patches
    xh = xpad[:, P - HW:, :]                                             # (B_PAD, HW, M) highway slab

    wc = params['conv_w'].reshape(HID_C, CK * M).T                       # (CK*M, HID_C)
    bc = params['conv_b'].reshape(1, HID_C)
    # GRU weights packed: columns [r | z | n]
    wih1 = params['w_ih1'].T                                             # (HID_C, 3*HID_R)
    whh1 = params['w_hh1'].T                                             # (HID_R, 3*HID_R)
    bih1 = params['b_ih1'].reshape(1, 3 * HID_R)
    bhh1 = params['b_hh1'].reshape(1, 3 * HID_R)
    wih2 = params['w_ih2'].T                                             # (HID_C, 3*HID_S)
    whh2 = params['w_hh2'].T                                             # (HID_S, 3*HID_S)
    bih2 = params['b_ih2'].reshape(1, 3 * HID_S)
    bhh2 = params['b_hh2'].reshape(1, 3 * HID_S)
    w1 = params['W1'].T                                                  # (HID_R+SKIP*HID_S, M)
    b1 = params['b1'].reshape(1, M)
    wh = params['Wh'].reshape(1, HW, 1)
    bh = params['bh'].reshape(1, 1)

    out = pl.pallas_call(
        lstnet_kernel,
        out_shape=jax.ShapeDtypeStruct((B_PAD, M), jnp.float32),
        in_specs=[pl.BlockSpec(memory_space=pltpu.MemorySpace.VMEM)] * 16,
        out_specs=pl.BlockSpec(memory_space=pltpu.MemorySpace.VMEM),
        scratch_shapes=[
            pltpu.VMEM((T * B_PAD, HID_C), jnp.float32),            # conv feature sequence
            pltpu.VMEM((T * B_PAD, 3 * HID_R), jnp.float32),        # hoisted GRU1 x-gates
            pltpu.VMEM((PT * SKIP * B_PAD, 3 * HID_S), jnp.float32) # hoisted GRUskip x-gates
        ],
    )(xh, xp, wc, bc, wih1, bih1, whh1, bhh1,
      wih2, bih2, whh2, bhh2, w1, b1, wh, bh)
    return out[:B]                                                        # (B, M)


if __name__ == "__main__":
    key = jax.random.PRNGKey(0)
    pkey, xkey = jax.random.split(key)
    params = init_params(pkey)
    x = jax.random.normal(xkey, (B, P, M), jnp.float32)   # (batch, window, m)
    y = lstnet_forward(x, params)
    jax.block_until_ready(y)
    assert y.shape == (B, M) and bool(jnp.all(jnp.isfinite(y)))
    print("KERNEL_OK")
</pallas_src>

<mosaic_0001>
module attributes {stable_mosaic.version = 11 : i64} {
  func.func @lstnet_kernel(%arg0: memref<8x8x4xf32, #tpu.memory_space<vmem>>, %arg1: memref<216x24xf32, #tpu.memory_space<vmem>>, %arg2: memref<24x16xf32, #tpu.memory_space<vmem>>, %arg3: memref<1x16xf32, #tpu.memory_space<vmem>>, %arg4: memref<16x96xf32, #tpu.memory_space<vmem>>, %arg5: memref<1x96xf32, #tpu.memory_space<vmem>>, %arg6: memref<32x96xf32, #tpu.memory_space<vmem>>, %arg7: memref<1x96xf32, #tpu.memory_space<vmem>>, %arg8: memref<16x12xf32, #tpu.memory_space<vmem>>, %arg9: memref<1x12xf32, #tpu.memory_space<vmem>>, %arg10: memref<4x12xf32, #tpu.memory_space<vmem>>, %arg11: memref<1x12xf32, #tpu.memory_space<vmem>>, %arg12: memref<64x4xf32, #tpu.memory_space<vmem>>, %arg13: memref<1x4xf32, #tpu.memory_space<vmem>>, %arg14: memref<1x8x1xf32, #tpu.memory_space<vmem>>, %arg15: memref<1x1xf32, #tpu.memory_space<vmem>>, %arg16: memref<8x4xf32, #tpu.memory_space<vmem>>, %arg17: memref<216x16xf32, #tpu.memory_space<vmem>>, %arg18: memref<216x96xf32, #tpu.memory_space<vmem>>, %arg19: memref<192x12xf32, #tpu.memory_space<vmem>>) attributes {dimension_semantics = [], scalar_prefetch = 0 : i64, scratch_operands = 3 : i64, tpu.core_type = #tpu.core_type<tc>} {
    %c0 = arith.constant 0 : index
    %c0_0 = arith.constant 0 : index
    %0 = vector.load %arg1[%c0, %c0_0] : memref<216x24xf32, #tpu.memory_space<vmem>>, vector<216x24xf32>
    %c0_1 = arith.constant 0 : index
    %c0_2 = arith.constant 0 : index
    %1 = vector.load %arg2[%c0_1, %c0_2] : memref<24x16xf32, #tpu.memory_space<vmem>>, vector<24x16xf32>
    %cst = arith.constant dense<0.000000e+00> : vector<216x16xf32>
    %2 = tpu.matmul %0, %1, %cst {dimension_numbers = #tpu.dot_dimension_numbers<[1], [0], [0], [1], [0, 0, 1, 1], [], []>} : vector<216x24xf32>, vector<24x16xf32>, vector<216x16xf32> -> vector<216x16xf32>
    %c0_3 = arith.constant 0 : index
    %c0_4 = arith.constant 0 : index
    %3 = vector.load %arg3[%c0_3, %c0_4] : memref<1x16xf32, #tpu.memory_space<vmem>>, vector<1x16xf32>
    %4 = vector.broadcast %3 : vector<1x16xf32> to vector<216x16xf32>
    %5 = arith.addf %2, %4 : vector<216x16xf32>
    %cst_5 = arith.constant 0.000000e+00 : f32
    %6 = vector.broadcast %cst_5 : f32 to vector<216x16xf32>
    %7 = arith.maximumf %5, %6 : vector<216x16xf32>
    %c0_6 = arith.constant 0 : index
    %c0_7 = arith.constant 0 : index
    %8 = vector.load %arg17[%c0_6, %c0_7] : memref<216x16xf32, #tpu.memory_space<vmem>>, vector<216x16xf32>
    tpu.vector_store %arg17[%c0_6, %c0_7], %7 {strides = array<i32>} : memref<216x16xf32, #tpu.memory_space<vmem>>, vector<216x16xf32>,
    %c0_8 = arith.constant 0 : index
    %c0_9 = arith.constant 0 : index
    %9 = vector.load %arg17[%c0_8, %c0_9] : memref<216x16xf32, #tpu.memory_space<vmem>>, vector<216x16xf32>
    %c0_10 = arith.constant 0 : index
    %c0_11 = arith.constant 0 : index
    %10 = vector.load %arg4[%c0_10, %c0_11] : memref<16x96xf32, #tpu.memory_space<vmem>>, vector<16x96xf32>
    %cst_12 = arith.constant dense<0.000000e+00> : vector<216x96xf32>
    %11 = tpu.matmul %9, %10, %cst_12 {dimension_numbers = #tpu.dot_dimension_numbers<[1], [0], [0], [1], [0, 0, 1, 1], [], []>} : vector<216x16xf32>, vector<16x96xf32>, vector<216x96xf32> -> vector<216x96xf32>
    %c0_13 = arith.constant 0 : index
    %c0_14 = arith.constant 0 : index
    %12 = vector.load %arg5[%c0_13, %c0_14] : memref<1x96xf32, #tpu.memory_space<vmem>>, vector<1x96xf32>
    %13 = vector.broadcast %12 : vector<1x96xf32> to vector<216x96xf32>
    %14 = arith.addf %11, %13 : vector<216x96xf32>
    %c0_15 = arith.constant 0 : index
    %c0_16 = arith.constant 0 : index
    %15 = vector.load %arg18[%c0_15, %c0_16] : memref<216x96xf32, #tpu.memory_space<vmem>>, vector<216x96xf32>
    tpu.vector_store %arg18[%c0_15, %c0_16], %14 {strides = array<i32>} : memref<216x96xf32, #tpu.memory_space<vmem>>, vector<216x96xf32>,
    %c24 = arith.constant 24 : index
    %c0_17 = arith.constant 0 : index
    %16 = vector.load %arg17[%c24, %c0_17] : memref<216x16xf32, #tpu.memory_space<vmem>>, vector<192x16xf32>
    %c0_18 = arith.constant 0 : index
    %c0_19 = arith.constant 0 : index
    %17 = vector.load %arg8[%c0_18, %c0_19] : memref<16x12xf32, #tpu.memory_space<vmem>>, vector<16x12xf32>
    %cst_20 = arith.constant dense<0.000000e+00> : vector<192x12xf32>
    %18 = tpu.matmul %16, %17, %cst_20 {dimension_numbers = #tpu.dot_dimension_numbers<[1], [0], [0], [1], [0, 0, 1, 1], [], []>} : vector<192x16xf32>, vector<16x12xf32>, vector<192x12xf32> -> vector<192x12xf32>
    %c0_21 = arith.constant 0 : index
    %c0_22 = arith.constant 0 : index
    %19 = vector.load %arg9[%c0_21, %c0_22] : memref<1x12xf32, #tpu.memory_space<vmem>>, vector<1x12xf32>
    %20 = vector.broadcast %19 : vector<1x12xf32> to vector<192x12xf32>
    %21 = arith.addf %18, %20 : vector<192x12xf32>
    %c0_23 = arith.constant 0 : index
    %c0_24 = arith.constant 0 : index
    %22 = vector.load %arg19[%c0_23, %c0_24] : memref<192x12xf32, #tpu.memory_space<vmem>>, vector<192x12xf32>
    tpu.vector_store %arg19[%c0_23, %c0_24], %21 {strides = array<i32>} : memref<192x12xf32, #tpu.memory_space<vmem>>, vector<192x12xf32>,
    %c0_25 = arith.constant 0 : index
    %c0_26 = arith.constant 0 : index
    %23 = vector.load %arg6[%c0_25, %c0_26] : memref<32x96xf32, #tpu.memory_space<vmem>>, vector<32x96xf32>
    %c0_27 = arith.constant 0 : index
    %c0_28 = arith.constant 0 : index
    %24 = vector.load %arg7[%c0_27, %c0_28] : memref<1x96xf32, #tpu.memory_space<vmem>>, vector<1x96xf32>
    %25 = vector.shape_cast %24 : vector<1x96xf32> to vector<1x96xf32>
    %26 = vector.broadcast %25 : vector<1x96xf32> to vector<8x96xf32>
    %cst_29 = arith.constant 0.000000e+00 : f32
    %27 = vector.broadcast %cst_29 : f32 to vector<8x32xf32>
    %c0_30 = arith.constant 0 : index
    %c0_31 = arith.constant 0 : index
    %28 = vector.load %arg18[%c0_30, %c0_31] : memref<216x96xf32, #tpu.memory_space<vmem>>, vector<8x96xf32>
    %cst_32 = arith.constant dense<0.000000e+00> : vector<8x96xf32>
    %29 = tpu.matmul %27, %23, %cst_32 {dimension_numbers = #tpu.dot_dimension_numbers<[1], [0], [0], [1], [0, 0, 1, 1], [], []>} : vector<8x32xf32>, vector<32x96xf32>, vector<8x96xf32> -> vector<8x96xf32>
    %30 = arith.addf %29, %26 : vector<8x96xf32>
    %31 = vector.extract_strided_slice %28 {offsets = [0, 0], sizes = [8, 32], strides = [1, 1]} : vector<8x96xf32> to vector<8x32xf32>
    %32 = vector.extract_strided_slice %30 {offsets = [0, 0], sizes = [8, 32], strides = [1, 1]} : vector<8x96xf32> to vector<8x32xf32>
    %33 = arith.addf %31, %32 : vector<8x32xf32>
    %34 = arith.negf %33 : vector<8x32xf32>
    %35 = math.exp %34 : vector<8x32xf32>
    %cst_33 = arith.constant 1.000000e+00 : f32
    %36 = vector.broadcast %cst_33 : f32 to vector<8x32xf32>
    %37 = arith.addf %36, %35 : vector<8x32xf32>
    %38 = arith.divf %36, %37 : vector<8x32xf32>
    %39 = vector.extract_strided_slice %28 {offsets = [0, 32], sizes = [8, 32], strides = [1, 1]} : vector<8x96xf32> to vector<8x32xf32>
    %40 = vector.extract_strided_slice %30 {offsets = [0, 32], sizes = [8, 32], strides = [1, 1]} : vector<8x96xf32> to vector<8x32xf32>
    %41 = arith.addf %39, %40 : vector<8x32xf32>
    %42 = arith.negf %41 : vector<8x32xf32>
    %43 = math.exp %42 : vector<8x32xf32>
    %cst_34 = arith.constant 1.000000e+00 : f32
    %44 = vector.broadcast %cst_34 : f32 to vector<8x32xf32>
    %45 = arith.addf %44, %43 : vector<8x32xf32>
    %46 = arith.divf %44, %45 : vector<8x32xf32>
    %47 = vector.extract_strided_slice %28 {offsets = [0, 64], sizes = [8, 32], strides = [1, 1]} : vector<8x96xf32> to vector<8x32xf32>
    %48 = vector.extract_strided_slice %30 {offsets = [0, 64], sizes = [8, 32], strides = [1, 1]} : vector<8x96xf32> to vector<8x32xf32>
    %49 = arith.mulf %38, %48 : vector<8x32xf32>
    %50 = arith.addf %47, %49 : vector<8x32xf32>
    %51 = math.tanh %50 : vector<8x32xf32>
    %cst_35 = arith.constant 1.000000e+00 : f32
    %52 = vector.broadcast %cst_35 : f32 to vector<8x32xf32>
    %53 = arith.subf %52, %46 : vector<8x32xf32>
    %54 = arith.mulf %53, %51 : vector<8x32xf32>
    %55 = arith.mulf %46, %27 : vector<8x32xf32>
    %56 = arith.addf %54, %55 : vector<8x32xf32>
    %c8 = arith.constant 8 : index
    %c0_36 = arith.constant 0 : index
    %57 = vector.load %arg18[%c8, %c0_36] : memref<216x96xf32, #tpu.memory_space<vmem>>, vector<8x96xf32>
    %cst_37 = arith.constant dense<0.000000e+00> : vector<8x96xf32>
    %58 = tpu.matmul %56, %23, %cst_37 {dimension_numbers = #tpu.dot_dimension_numbers<[1], [0], [0], [1], [0, 0, 1, 1], [], []>} : vector<8x32xf32>, vector<32x96xf32>, vector<8x96xf32> -> vector<8x96xf32>
    %59 = arith.addf %58, %26 : vector<8x96xf32>
    %60 = vector.extract_strided_slice %57 {offsets = [0, 0], sizes = [8, 32], strides = [1, 1]} : vector<8x96xf32> to vector<8x32xf32>
    %61 = vector.extract_strided_slice %59 {offsets = [0, 0], sizes = [8, 32], strides = [1, 1]} : vector<8x96xf32> to vector<8x32xf32>
    %62 = arith.addf %60, %61 : vector<8x32xf32>
    %63 = arith.negf %62 : vector<8x32xf32>
    %64 = math.exp %63 : vector<8x32xf32>
    %cst_38 = arith.constant 1.000000e+00 : f32
    %65 = vector.broadcast %cst_38 : f32 to vector<8x32xf32>
    %66 = arith.addf %65, %64 : vector<8x32xf32>
    %67 = arith.divf %65, %66 : vector<8x32xf32>
    %68 = vector.extract_strided_slice %57 {offsets = [0, 32], sizes = [8, 32], strides = [1, 1]} : vector<8x96xf32> to vector<8x32xf32>
    %69 = vector.extract_strided_slice %59 {offsets = [0, 32], sizes = [8, 32], strides = [1, 1]} : vector<8x96xf32> to vector<8x32xf32>
    %70 = arith.addf %68, %69 : vector<8x32xf32>
    %71 = arith.negf %70 : vector<8x32xf32>
    %72 = math.exp %71 : vector<8x32xf32>
    %cst_39 = arith.constant 1.000000e+00 : f32
    %73 = vector.broadcast %cst_39 : f32 to vector<8x32xf32>
    %74 = arith.addf %73, %72 : vector<8x32xf32>
    %75 = arith.divf %73, %74 : vector<8x32xf32>
    %76 = vector.extract_strided_slice %57 {offsets = [0, 64], sizes = [8, 32], strides = [1, 1]} : vector<8x96xf32> to vector<8x32xf32>
    %77 = vector.extract_strided_slice %59 {offsets = [0, 64], sizes = [8, 32], strides = [1, 1]} : vector<8x96xf32> to vector<8x32xf32>
    %78 = arith.mulf %67, %77 : vector<8x32xf32>
    %79 = arith.addf %76, %78 : vector<8x32xf32>
    %80 = math.tanh %79 : vector<8x32xf32>
    %cst_40 = arith.constant 1.000000e+00 : f32
    %81 = vector.broadcast %cst_40 : f32 to vector<8x32xf32>
    %82 = arith.subf %81, %75 : vector<8x32xf32>
    %83 = arith.mulf %82, %80 : vector<8x32xf32>
    %84 = arith.mulf %75, %56 : vector<8x32xf32>
    %85 = arith.addf %83, %84 : vector<8x32xf32>
    %c16 = arith.constant 16 : index
    %c0_41 = arith.constant 0 : index
    %86 = vector.load %arg18[%c16, %c0_41] : memref<216x96xf32, #tpu.memory_space<vmem>>, vector<8x96xf32>
    %cst_42 = arith.constant dense<0.000000e+00> : vector<8x96xf32>
    %87 = tpu.matmul %85, %23, %cst_42 {dimension_numbers = #tpu.dot_dimension_numbers<[1], [0], [0], [1], [0, 0, 1, 1], [], []>} : vector<8x32xf32>, vector<32x96xf32>, vector<8x96xf32> -> vector<8x96xf32>
    %88 = arith.addf %87, %26 : vector<8x96xf32>
    %89 = vector.extract_strided_slice %86 {offsets = [0, 0], sizes = [8, 32], strides = [1, 1]} : vector<8x96xf32> to vector<8x32xf32>
    %90 = vector.extract_strided_slice %88 {offsets = [0, 0], sizes = [8, 32], strides = [1, 1]} : vector<8x96xf32> to vector<8x32xf32>
    %91 = arith.addf %89, %90 : vector<8x32xf32>
    %92 = arith.negf %91 : vector<8x32xf32>
    %93 = math.exp %92 : vector<8x32xf32>
    %cst_43 = arith.constant 1.000000e+00 : f32
    %94 = vector.broadcast %cst_43 : f32 to vector<8x32xf32>
    %95 = arith.addf %94, %93 : vector<8x32xf32>
    %96 = arith.divf %94, %95 : vector<8x32xf32>
    %97 = vector.extract_strided_slice %86 {offsets = [0, 32], sizes = [8, 32], strides = [1, 1]} : vector<8x96xf32> to vector<8x32xf32>
    %98 = vector.extract_strided_slice %88 {offsets = [0, 32], sizes = [8, 32], strides = [1, 1]} : vector<8x96xf32> to vector<8x32xf32>
    %99 = arith.addf %97, %98 : vector<8x32xf32>
    %100 = arith.negf %99 : vector<8x32xf32>
    %101 = math.exp %100 : vector<8x32xf32>
    %cst_44 = arith.constant 1.000000e+00 : f32
    %102 = vector.broadcast %cst_44 : f32 to vector<8x32xf32>
    %103 = arith.addf %102, %101 : vector<8x32xf32>
    %104 = arith.divf %102, %103 : vector<8x32xf32>
    %105 = vector.extract_strided_slice %86 {offsets = [0, 64], sizes = [8, 32], strides = [1, 1]} : vector<8x96xf32> to vector<8x32xf32>
    %106 = vector.extract_strided_slice %88 {offsets = [0, 64], sizes = [8, 32], strides = [1, 1]} : vector<8x96xf32> to vector<8x32xf32>
    %107 = arith.mulf %96, %106 : vector<8x32xf32>
    %108 = arith.addf %105, %107 : vector<8x32xf32>
    %109 = math.tanh %108 : vector<8x32xf32>
    %cst_45 = arith.constant 1.000000e+00 : f32
    %110 = vector.broadcast %cst_45 : f32 to vector<8x32xf32>
    %111 = arith.subf %110, %104 : vector<8x32xf32>
    %112 = arith.mulf %111, %109 : vector<8x32xf32>
    %113 = arith.mulf %104, %85 : vector<8x32xf32>
    %114 = arith.addf %112, %113 : vector<8x32xf32>
    %c24_46 = arith.constant 24 : index
    %c0_47 = arith.constant 0 : index
    %115 = vector.load %arg18[%c24_46, %c0_47] : memref<216x96xf32, #tpu.memory_space<vmem>>, vector<8x96xf32>
    %cst_48 = arith.constant dense<0.000000e+00> : vector<8x96xf32>
    %116 = tpu.matmul %114, %23, %cst_48 {dimension_numbers = #tpu.dot_dimension_numbers<[1], [0], [0], [1], [0, 0, 1, 1], [], []>} : vector<8x32xf32>, vector<32x96xf32>, vector<8x96xf32> -> vector<8x96xf32>
    %117 = arith.addf %116, %26 : vector<8x96xf32>
    %118 = vector.extract_strided_slice %115 {offsets = [0, 0], sizes = [8, 32], strides = [1, 1]} : vector<8x96xf32> to vector<8x32xf32>
    %119 = vector.extract_strided_slice %117 {offsets = [0, 0], sizes = [8, 32], strides = [1, 1]} : vector<8x96xf32> to vector<8x32xf32>
    %120 = arith.addf %118, %119 : vector<8x32xf32>
    %121 = arith.negf %120 : vector<8x32xf32>
    %122 = math.exp %121 : vector<8x32xf32>
    %cst_49 = arith.constant 1.000000e+00 : f32
    %123 = vector.broadcast %cst_49 : f32 to vector<8x32xf32>
    %124 = arith.addf %123, %122 : vector<8x32xf32>
    %125 = arith.divf %123, %124 : vector<8x32xf32>
    %126 = vector.extract_strided_slice %115 {offsets = [0, 32], sizes = [8, 32], strides = [1, 1]} : vector<8x96xf32> to vector<8x32xf32>
    %127 = vector.extract_strided_slice %117 {offsets = [0, 32], sizes = [8, 32], strides = [1, 1]} : vector<8x96xf32> to vector<8x32xf32>
    %128 = arith.addf %126, %127 : vector<8x32xf32>
    %129 = arith.negf %128 : vector<8x32xf32>
    %130 = math.exp %129 : vector<8x32xf32>
    %cst_50 = arith.constant 1.000000e+00 : f32
    %131 = vector.broadcast %cst_50 : f32 to vector<8x32xf32>
    %132 = arith.addf %131, %130 : vector<8x32xf32>
    %133 = arith.divf %131, %132 : vector<8x32xf32>
    %134 = vector.extract_strided_slice %115 {offsets = [0, 64], sizes = [8, 32], strides = [1, 1]} : vector<8x96xf32> to vector<8x32xf32>
    %135 = vector.extract_strided_slice %117 {offsets = [0, 64], sizes = [8, 32], strides = [1, 1]} : vector<8x96xf32> to vector<8x32xf32>
    %136 = arith.mulf %125, %135 : vector<8x32xf32>
    %137 = arith.addf %134, %136 : vector<8x32xf32>
    %138 = math.tanh %137 : vector<8x32xf32>
    %cst_51 = arith.constant 1.000000e+00 : f32
    %139 = vector.broadcast %cst_51 : f32 to vector<8x32xf32>
    %140 = arith.subf %139, %133 : vector<8x32xf32>
    %141 = arith.mulf %140, %138 : vector<8x32xf32>
    %142 = arith.mulf %133, %114 : vector<8x32xf32>
    %143 = arith.addf %141, %142 : vector<8x32xf32>
    %c32 = arith.constant 32 : index
    %c0_52 = arith.constant 0 : index
    %144 = vector.load %arg18[%c32, %c0_52] : memref<216x96xf32, #tpu.memory_space<vmem>>, vector<8x96xf32>
    %cst_53 = arith.constant dense<0.000000e+00> : vector<8x96xf32>
    %145 = tpu.matmul %143, %23, %cst_53 {dimension_numbers = #tpu.dot_dimension_numbers<[1], [0], [0], [1], [0, 0, 1, 1], [], []>} : vector<8x32xf32>, vector<32x96xf32>, vector<8x96xf32> -> vector<8x96xf32>
    %146 = arith.addf %145, %26 : vector<8x96xf32>
    %147 = vector.extract_strided_slice %144 {offsets = [0, 0], sizes = [8, 32], strides = [1, 1]} : vector<8x96xf32> to vector<8x32xf32>
    %148 = vector.extract_strided_slice %146 {offsets = [0, 0], sizes = [8, 32], strides = [1, 1]} : vector<8x96xf32> to vector<8x32xf32>
    %149 = arith.addf %147, %148 : vector<8x32xf32>
    %150 = arith.negf %149 : vector<8x32xf32>
    %151 = math.exp %150 : vector<8x32xf32>
    %cst_54 = arith.constant 1.000000e+00 : f32
    %152 = vector.broadcast %cst_54 : f32 to vector<8x32xf32>
    %153 = arith.addf %152, %151 : vector<8x32xf32>
    %154 = arith.divf %152, %153 : vector<8x32xf32>
    %155 = vector.extract_strided_slice %144 {offsets = [0, 32], sizes = [8, 32], strides = [1, 1]} : vector<8x96xf32> to vector<8x32xf32>
    %156 = vector.extract_strided_slice %146 {offsets = [0, 32], sizes = [8, 32], strides = [1, 1]} : vector<8x96xf32> to vector<8x32xf32>
    %157 = arith.addf %155, %156 : vector<8x32xf32>
    %158 = arith.negf %157 : vector<8x32xf32>
    %159 = math.exp %158 : vector<8x32xf32>
    %cst_55 = arith.constant 1.000000e+00 : f32
    %160 = vector.broadcast %cst_55 : f32 to vector<8x32xf32>
    %161 = arith.addf %160, %159 : vector<8x32xf32>
    %162 = arith.divf %160, %161 : vector<8x32xf32>
    %163 = vector.extract_strided_slice %144 {offsets = [0, 64], sizes = [8, 32], strides = [1, 1]} : vector<8x96xf32> to vector<8x32xf32>
    %164 = vector.extract_strided_slice %146 {offsets = [0, 64], sizes = [8, 32], strides = [1, 1]} : vector<8x96xf32> to vector<8x32xf32>
    %165 = arith.mulf %154, %164 : vector<8x32xf32>
    %166 = arith.addf %163, %165 : vector<8x32xf32>
    %167 = math.tanh %166 : vector<8x32xf32>
    %cst_56 = arith.constant 1.000000e+00 : f32
    %168 = vector.broadcast %cst_56 : f32 to vector<8x32xf32>
    %169 = arith.subf %168, %162 : vector<8x32xf32>
    %170 = arith.mulf %169, %167 : vector<8x32xf32>
    %171 = arith.mulf %162, %143 : vector<8x32xf32>
    %172 = arith.addf %170, %171 : vector<8x32xf32>
    %c40 = arith.constant 40 : index
    %c0_57 = arith.constant 0 : index
    %173 = vector.load %arg18[%c40, %c0_57] : memref<216x96xf32, #tpu.memory_space<vmem>>, vector<8x96xf32>
    %cst_58 = arith.constant dense<0.000000e+00> : vector<8x96xf32>
    %174 = tpu.matmul %172, %23, %cst_58 {dimension_numbers = #tpu.dot_dimension_numbers<[1], [0], [0], [1], [0, 0, 1, 1], [], []>} : vector<8x32xf32>, vector<32x96xf32>, vector<8x96xf32> -> vector<8x96xf32>
    %175 = arith.addf %174, %26 : vector<8x96xf32>
    %176 = vector.extract_strided_slice %173 {offsets = [0, 0], sizes = [8, 32], strides = [1, 1]} : vector<8x96xf32> to vector<8x32xf32>
    %177 = vector.extract_strided_slice %175 {offsets = [0, 0], sizes = [8, 32], strides = [1, 1]} : vector<8x96xf32> to vector<8x32xf32>
    %178 = arith.addf %176, %177 : vector<8x32xf32>
    %179 = arith.negf %178 : vector<8x32xf32>
    %180 = math.exp %179 : vector<8x32xf32>
    %cst_59 = arith.constant 1.000000e+00 : f32
    %181 = vector.broadcast %cst_59 : f32 to vector<8x32xf32>
    %182 = arith.addf %181, %180 : vector<8x32xf32>
    %183 = arith.divf %181, %182 : vector<8x32xf32>
    %184 = vector.extract_strided_slice %173 {offsets = [0, 32], sizes = [8, 32], strides = [1, 1]} : vector<8x96xf32> to vector<8x32xf32>
    %185 = vector.extract_strided_slice %175 {offsets = [0, 32], sizes = [8, 32], strides = [1, 1]} : vector<8x96xf32> to vector<8x32xf32>
    %186 = arith.addf %184, %185 : vector<8x32xf32>
    %187 = arith.negf %186 : vector<8x32xf32>
    %188 = math.exp %187 : vector<8x32xf32>
    %cst_60 = arith.constant 1.000000e+00 : f32
    %189 = vector.broadcast %cst_60 : f32 to vector<8x32xf32>
    %190 = arith.addf %189, %188 : vector<8x32xf32>
    %191 = arith.divf %189, %190 : vector<8x32xf32>
    %192 = vector.extract_strided_slice %173 {offsets = [0, 64], sizes = [8, 32], strides = [1, 1]} : vector<8x96xf32> to vector<8x32xf32>
    %193 = vector.extract_strided_slice %175 {offsets = [0, 64], sizes = [8, 32], strides = [1, 1]} : vector<8x96xf32> to vector<8x32xf32>
    %194 = arith.mulf %183, %193 : vector<8x32xf32>
    %195 = arith.addf %192, %194 : vector<8x32xf32>
    %196 = math.tanh %195 : vector<8x32xf32>
    %cst_61 = arith.constant 1.000000e+00 : f32
    %197 = vector.broadcast %cst_61 : f32 to vector<8x32xf32>
    %198 = arith.subf %197, %191 : vector<8x32xf32>
    %199 = arith.mulf %198, %196 : vector<8x32xf32>
    %200 = arith.mulf %191, %172 : vector<8x32xf32>
    %201 = arith.addf %199, %200 : vector<8x32xf32>
    %c48 = arith.constant 48 : index
    %c0_62 = arith.constant 0 : index
    %202 = vector.load %arg18[%c48, %c0_62] : memref<216x96xf32, #tpu.memory_space<vmem>>, vector<8x96xf32>
    %cst_63 = arith.constant dense<0.000000e+00> : vector<8x96xf32>
    %203 = tpu.matmul %201, %23, %cst_63 {dimension_numbers = #tpu.dot_dimension_numbers<[1], [0], [0], [1], [0, 0, 1, 1], [], []>} : vector<8x32xf32>, vector<32x96xf32>, vector<8x96xf32> -> vector<8x96xf32>
    %204 = arith.addf %203, %26 : vector<8x96xf32>
    %205 = vector.extract_strided_slice %202 {offsets = [0, 0], sizes = [8, 32], strides = [1, 1]} : vector<8x96xf32> to vector<8x32xf32>
    %206 = vector.extract_strided_slice %204 {offsets = [0, 0], sizes = [8, 32], strides = [1, 1]} : vector<8x96xf32> to vector<8x32xf32>
    %207 = arith.addf %205, %206 : vector<8x32xf32>
    %208 = arith.negf %207 : vector<8x32xf32>
    %209 = math.exp %208 : vector<8x32xf32>
    %cst_64 = arith.constant 1.000000e+00 : f32
    %210 = vector.broadcast %cst_64 : f32 to vector<8x32xf32>
    %211 = arith.addf %210, %209 : vector<8x32xf32>
    %212 = arith.divf %210, %211 : vector<8x32xf32>
    %213 = vector.extract_strided_slice %202 {offsets = [0, 32], sizes = [8, 32], strides = [1, 1]} : vector<8x96xf32> to vector<8x32xf32>
    %214 = vector.extract_strided_slice %204 {offsets = [0, 32], sizes = [8, 32], strides = [1, 1]} : vector<8x96xf32> to vector<8x32xf32>
    %215 = arith.addf %213, %214 : vector<8x32xf32>
    %216 = arith.negf %215 : vector<8x32xf32>
    %217 = math.exp %216 : vector<8x32xf32>
    %cst_65 = arith.constant 1.000000e+00 : f32
    %218 = vector.broadcast %cst_65 : f32 to vector<8x32xf32>
    %219 = arith.addf %218, %217 : vector<8x32xf32>
    %220 = arith.divf %218, %219 : vector<8x32xf32>
    %221 = vector.extract_strided_slice %202 {offsets = [0, 64], sizes = [8, 32], strides = [1, 1]} : vector<8x96xf32> to vector<8x32xf32>
    %222 = vector.extract_strided_slice %204 {offsets = [0, 64], sizes = [8, 32], strides = [1, 1]} : vector<8x96xf32> to vector<8x32xf32>
    %223 = arith.mulf %212, %222 : vector<8x32xf32>
    %224 = arith.addf %221, %223 : vector<8x32xf32>
    %225 = math.tanh %224 : vector<8x32xf32>
    %cst_66 = arith.constant 1.000000e+00 : f32
    %226 = vector.broadcast %cst_66 : f32 to vector<8x32xf32>
    %227 = arith.subf %226, %220 : vector<8x32xf32>
    %228 = arith.mulf %227, %225 : vector<8x32xf32>
    %229 = arith.mulf %220, %201 : vector<8x32xf32>
    %230 = arith.addf %228, %229 : vector<8x32xf32>
    %c56 = arith.constant 56 : index
    %c0_67 = arith.constant 0 : index
    %231 = vector.load %arg18[%c56, %c0_67] : memref<216x96xf32, #tpu.memory_space<vmem>>, vector<8x96xf32>
    %cst_68 = arith.constant dense<0.000000e+00> : vector<8x96xf32>
    %232 = tpu.matmul %230, %23, %cst_68 {dimension_numbers = #tpu.dot_dimension_numbers<[1], [0], [0], [1], [0, 0, 1, 1], [], []>} : vector<8x32xf32>, vector<32x96xf32>, vector<8x96xf32> -> vector<8x96xf32>
    %233 = arith.addf %232, %26 : vector<8x96xf32>
    %234 = vector.extract_strided_slice %231 {offsets = [0, 0], sizes = [8, 32], strides = [1, 1]} : vector<8x96xf32> to vector<8x32xf32>
    %235 = vector.extract_strided_slice %233 {offsets = [0, 0], sizes = [8, 32], strides = [1, 1]} : vector<8x96xf32> to vector<8x32xf32>
    %236 = arith.addf %234, %235 : vector<8x32xf32>
    %237 = arith.negf %236 : vector<8x32xf32>
    %238 = math.exp %237 : vector<8x32xf32>
    %cst_69 = arith.constant 1.000000e+00 : f32
    %239 = vector.broadcast %cst_69 : f32 to vector<8x32xf32>
    %240 = arith.addf %239, %238 : vector<8x32xf32>
    %241 = arith.divf %239, %240 : vector<8x32xf32>
    %242 = vector.extract_strided_slice %231 {offsets = [0, 32], sizes = [8, 32], strides = [1, 1]} : vector<8x96xf32> to vector<8x32xf32>
    %243 = vector.extract_strided_slice %233 {offsets = [0, 32], sizes = [8, 32], strides = [1, 1]} : vector<8x96xf32> to vector<8x32xf32>
    %244 = arith.addf %242, %243 : vector<8x32xf32>
    %245 = arith.negf %244 : vector<8x32xf32>
    %246 = math.exp %245 : vector<8x32xf32>
    %cst_70 = arith.constant 1.000000e+00 : f32
    %247 = vector.broadcast %cst_70 : f32 to vector<8x32xf32>
    %248 = arith.addf %247, %246 : vector<8x32xf32>
    %249 = arith.divf %247, %248 : vector<8x32xf32>
    %250 = vector.extract_strided_slice %231 {offsets = [0, 64], sizes = [8, 32], strides = [1, 1]} : vector<8x96xf32> to vector<8x32xf32>
    %251 = vector.extract_strided_slice %233 {offsets = [0, 64], sizes = [8, 32], strides = [1, 1]} : vector<8x96xf32> to vector<8x32xf32>
    %252 = arith.mulf %241, %251 : vector<8x32xf32>
    %253 = arith.addf %250, %252 : vector<8x32xf32>
    %254 = math.tanh %253 : vector<8x32xf32>
    %cst_71 = arith.constant 1.000000e+00 : f32
    %255 = vector.broadcast %cst_71 : f32 to vector<8x32xf32>
    %256 = arith.subf %255, %249 : vector<8x32xf32>
    %257 = arith.mulf %256, %254 : vector<8x32xf32>
    %258 = arith.mulf %249, %230 : vector<8x32xf32>
    %259 = arith.addf %257, %258 : vector<8x32xf32>
    %c64 = arith.constant 64 : index
    %c0_72 = arith.constant 0 : index
    %260 = vector.load %arg18[%c64, %c0_72] : memref<216x96xf32, #tpu.memory_space<vmem>>, vector<8x96xf32>
    %cst_73 = arith.constant dense<0.000000e+00> : vector<8x96xf32>
    %261 = tpu.matmul %259, %23, %cst_73 {dimension_numbers = #tpu.dot_dimension_numbers<[1], [0], [0], [1], [0, 0, 1, 1], [], []>} : vector<8x32xf32>, vector<32x96xf32>, vector<8x96xf32> -> vector<8x96xf32>
    %262 = arith.addf %261, %26 : vector<8x96xf32>
    %263 = vector.extract_strided_slice %260 {offsets = [0, 0], sizes = [8, 32], strides = [1, 1]} : vector<8x96xf32> to vector<8x32xf32>
    %264 = vector.extract_strided_slice %262 {offsets = [0, 0], sizes = [8, 32], strides = [1, 1]} : vector<8x96xf32> to vector<8x32xf32>
    %265 = arith.addf %263, %264 : vector<8x32xf32>
    %266 = arith.negf %265 : vector<8x32xf32>
    %267 = math.exp %266 : vector<8x32xf32>
    %cst_74 = arith.constant 1.000000e+00 : f32
    %268 = vector.broadcast %cst_74 : f32 to vector<8x32xf32>
    %269 = arith.addf %268, %267 : vector<8x32xf32>
    %270 = arith.divf %268, %269 : vector<8x32xf32>
    %271 = vector.extract_strided_slice %260 {offsets = [0, 32], sizes = [8, 32], strides = [1, 1]} : vector<8x96xf32> to vector<8x32xf32>
    %272 = vector.extract_strided_slice %262 {offsets = [0, 32], sizes = [8, 32], strides = [1, 1]} : vector<8x96xf32> to vector<8x32xf32>
    %273 = arith.addf %271, %272 : vector<8x32xf32>
    %274 = arith.negf %273 : vector<8x32xf32>
    %275 = math.exp %274 : vector<8x32xf32>
    %cst_75 = arith.constant 1.000000e+00 : f32
    %276 = vector.broadcast %cst_75 : f32 to vector<8x32xf32>
    %277 = arith.addf %276, %275 : vector<8x32xf32>
    %278 = arith.divf %276, %277 : vector<8x32xf32>
    %279 = vector.extract_strided_slice %260 {offsets = [0, 64], sizes = [8, 32], strides = [1, 1]} : vector<8x96xf32> to vector<8x32xf32>
    %280 = vector.extract_strided_slice %262 {offsets = [0, 64], sizes = [8, 32], strides = [1, 1]} : vector<8x96xf32> to vector<8x32xf32>
    %281 = arith.mulf %270, %280 : vector<8x32xf32>
    %282 = arith.addf %279, %281 : vector<8x32xf32>
    %283 = math.tanh %282 : vector<8x32xf32>
    %cst_76 = arith.constant 1.000000e+00 : f32
    %284 = vector.broadcast %cst_76 : f32 to vector<8x32xf32>
    %285 = arith.subf %284, %278 : vector<8x32xf32>
    %286 = arith.mulf %285, %283 : vector<8x32xf32>
    %287 = arith.mulf %278, %259 : vector<8x32xf32>
    %288 = arith.addf %286, %287 : vector<8x32xf32>
    %c72 = arith.constant 72 : index
    %c0_77 = arith.constant 0 : index
    %289 = vector.load %arg18[%c72, %c0_77] : memref<216x96xf32, #tpu.memory_space<vmem>>, vector<8x96xf32>
    %cst_78 = arith.constant dense<0.000000e+00> : vector<8x96xf32>
    %290 = tpu.matmul %288, %23, %cst_78 {dimension_numbers = #tpu.dot_dimension_numbers<[1], [0], [0], [1], [0, 0, 1, 1], [], []>} : vector<8x32xf32>, vector<32x96xf32>, vector<8x96xf32> -> vector<8x96xf32>
    %291 = arith.addf %290, %26 : vector<8x96xf32>
    %292 = vector.extract_strided_slice %289 {offsets = [0, 0], sizes = [8, 32], strides = [1, 1]} : vector<8x96xf32> to vector<8x32xf32>
    %293 = vector.extract_strided_slice %291 {offsets = [0, 0], sizes = [8, 32], strides = [1, 1]} : vector<8x96xf32> to vector<8x32xf32>
    %294 = arith.addf %292, %293 : vector<8x32xf32>
    %295 = arith.negf %294 : vector<8x32xf32>
    %296 = math.exp %295 : vector<8x32xf32>
    %cst_79 = arith.constant 1.000000e+00 : f32
    %297 = vector.broadcast %cst_79 : f32 to vector<8x32xf32>
    %298 = arith.addf %297, %296 : vector<8x32xf32>
    %299 = arith.divf %297, %298 : vector<8x32xf32>
    %300 = vector.extract_strided_slice %289 {offsets = [0, 32], sizes = [8, 32], strides = [1, 1]} : vector<8x96xf32> to vector<8x32xf32>
    %301 = vector.extract_strided_slice %291 {offsets = [0, 32], sizes = [8, 32], strides = [1, 1]} : vector<8x96xf32> to vector<8x32xf32>
    %302 = arith.addf %300, %301 : vector<8x32xf32>
    %303 = arith.negf %302 : vector<8x32xf32>
    %304 = math.exp %303 : vector<8x32xf32>
    %cst_80 = arith.constant 1.000000e+00 : f32
    %305 = vector.broadcast %cst_80 : f32 to vector<8x32xf32>
    %306 = arith.addf %305, %304 : vector<8x32xf32>
    %307 = arith.divf %305, %306 : vector<8x32xf32>
    %308 = vector.extract_strided_slice %289 {offsets = [0, 64], sizes = [8, 32], strides = [1, 1]} : vector<8x96xf32> to vector<8x32xf32>
    %309 = vector.extract_strided_slice %291 {offsets = [0, 64], sizes = [8, 32], strides = [1, 1]} : vector<8x96xf32> to vector<8x32xf32>
    %310 = arith.mulf %299, %309 : vector<8x32xf32>
    %311 = arith.addf %308, %310 : vector<8x32xf32>
    %312 = math.tanh %311 : vector<8x32xf32>
    %cst_81 = arith.constant 1.000000e+00 : f32
    %313 = vector.broadcast %cst_81 : f32 to vector<8x32xf32>
    %314 = arith.subf %313, %307 : vector<8x32xf32>
    %315 = arith.mulf %314, %312 : vector<8x32xf32>
    %316 = arith.mulf %307, %288 : vector<8x32xf32>
    %317 = arith.addf %315, %316 : vector<8x32xf32>
    %c80 = arith.constant 80 : index
    %c0_82 = arith.constant 0 : index
    %318 = vector.load %arg18[%c80, %c0_82] : memref<216x96xf32, #tpu.memory_space<vmem>>, vector<8x96xf32>
    %cst_83 = arith.constant dense<0.000000e+00> : vector<8x96xf32>
    %319 = tpu.matmul %317, %23, %cst_83 {dimension_numbers = #tpu.dot_dimension_numbers<[1], [0], [0], [1], [0, 0, 1, 1], [], []>} : vector<8x32xf32>, vector<32x96xf32>, vector<8x96xf32> -> vector<8x96xf32>
    %320 = arith.addf %319, %26 : vector<8x96xf32>
    %321 = vector.extract_strided_slice %318 {offsets = [0, 0], sizes = [8, 32], strides = [1, 1]} : vector<8x96xf32> to vector<8x32xf32>
    %322 = vector.extract_strided_slice %320 {offsets = [0, 0], sizes = [8, 32], strides = [1, 1]} : vector<8x96xf32> to vector<8x32xf32>
    %323 = arith.addf %321, %322 : vector<8x32xf32>
    %324 = arith.negf %323 : vector<8x32xf32>
    %325 = math.exp %324 : vector<8x32xf32>
    %cst_84 = arith.constant 1.000000e+00 : f32
    %326 = vector.broadcast %cst_84 : f32 to vector<8x32xf32>
    %327 = arith.addf %326, %325 : vector<8x32xf32>
    %328 = arith.divf %326, %327 : vector<8x32xf32>
    %329 = vector.extract_strided_slice %318 {offsets = [0, 32], sizes = [8, 32], strides = [1, 1]} : vector<8x96xf32> to vector<8x32xf32>
    %330 = vector.extract_strided_slice %320 {offsets = [0, 32], sizes = [8, 32], strides = [1, 1]} : vector<8x96xf32> to vector<8x32xf32>
    %331 = arith.addf %329, %330 : vector<8x32xf32>
    %332 = arith.negf %331 : vector<8x32xf32>
    %333 = math.exp %332 : vector<8x32xf32>
    %cst_85 = arith.constant 1.000000e+00 : f32
    %334 = vector.broadcast %cst_85 : f32 to vector<8x32xf32>
    %335 = arith.addf %334, %333 : vector<8x32xf32>
    %336 = arith.divf %334, %335 : vector<8x32xf32>
    %337 = vector.extract_strided_slice %318 {offsets = [0, 64], sizes = [8, 32], strides = [1, 1]} : vector<8x96xf32> to vector<8x32xf32>
    %338 = vector.extract_strided_slice %320 {offsets = [0, 64], sizes = [8, 32], strides = [1, 1]} : vector<8x96xf32> to vector<8x32xf32>
    %339 = arith.mulf %328, %338 : vector<8x32xf32>
    %340 = arith.addf %337, %339 : vector<8x32xf32>
    %341 = math.tanh %340 : vector<8x32xf32>
    %cst_86 = arith.constant 1.000000e+00 : f32
    %342 = vector.broadcast %cst_86 : f32 to vector<8x32xf32>
    %343 = arith.subf %342, %336 : vector<8x32xf32>
    %344 = arith.mulf %343, %341 : vector<8x32xf32>
    %345 = arith.mulf %336, %317 : vector<8x32xf32>
    %346 = arith.addf %344, %345 : vector<8x32xf32>
    %c88 = arith.constant 88 : index
    %c0_87 = arith.constant 0 : index
    %347 = vector.load %arg18[%c88, %c0_87] : memref<216x96xf32, #tpu.memory_space<vmem>>, vector<8x96xf32>
    %cst_88 = arith.constant dense<0.000000e+00> : vector<8x96xf32>
    %348 = tpu.matmul %346, %23, %cst_88 {dimension_numbers = #tpu.dot_dimension_numbers<[1], [0], [0], [1], [0, 0, 1, 1], [], []>} : vector<8x32xf32>, vector<32x96xf32>, vector<8x96xf32> -> vector<8x96xf32>
    %349 = arith.addf %348, %26 : vector<8x96xf32>
    %350 = vector.extract_strided_slice %347 {offsets = [0, 0], sizes = [8, 32], strides = [1, 1]} : vector<8x96xf32> to vector<8x32xf32>
    %351 = vector.extract_strided_slice %349 {offsets = [0, 0], sizes = [8, 32], strides = [1, 1]} : vector<8x96xf32> to vector<8x32xf32>
    %352 = arith.addf %350, %351 : vector<8x32xf32>
    %353 = arith.negf %352 : vector<8x32xf32>
    %354 = math.exp %353 : vector<8x32xf32>
    %cst_89 = arith.constant 1.000000e+00 : f32
    %355 = vector.broadcast %cst_89 : f32 to vector<8x32xf32>
    %356 = arith.addf %355, %354 : vector<8x32xf32>
    %357 = arith.divf %355, %356 : vector<8x32xf32>
    %358 = vector.extract_strided_slice %347 {offsets = [0, 32], sizes = [8, 32], strides = [1, 1]} : vector<8x96xf32> to vector<8x32xf32>
    %359 = vector.extract_strided_slice %349 {offsets = [0, 32], sizes = [8, 32], strides = [1, 1]} : vector<8x96xf32> to vector<8x32xf32>
    %360 = arith.addf %358, %359 : vector<8x32xf32>
    %361 = arith.negf %360 : vector<8x32xf32>
    %362 = math.exp %361 : vector<8x32xf32>
    %cst_90 = arith.constant 1.000000e+00 : f32
    %363 = vector.broadcast %cst_90 : f32 to vector<8x32xf32>
    %364 = arith.addf %363, %362 : vector<8x32xf32>
    %365 = arith.divf %363, %364 : vector<8x32xf32>
    %366 = vector.extract_strided_slice %347 {offsets = [0, 64], sizes = [8, 32], strides = [1, 1]} : vector<8x96xf32> to vector<8x32xf32>
    %367 = vector.extract_strided_slice %349 {offsets = [0, 64], sizes = [8, 32], strides = [1, 1]} : vector<8x96xf32> to vector<8x32xf32>
    %368 = arith.mulf %357, %367 : vector<8x32xf32>
    %369 = arith.addf %366, %368 : vector<8x32xf32>
    %370 = math.tanh %369 : vector<8x32xf32>
    %cst_91 = arith.constant 1.000000e+00 : f32
    %371 = vector.broadcast %cst_91 : f32 to vector<8x32xf32>
    %372 = arith.subf %371, %365 : vector<8x32xf32>
    %373 = arith.mulf %372, %370 : vector<8x32xf32>
    %374 = arith.mulf %365, %346 : vector<8x32xf32>
    %375 = arith.addf %373, %374 : vector<8x32xf32>
    %c96 = arith.constant 96 : index
    %c0_92 = arith.constant 0 : index
    %376 = vector.load %arg18[%c96, %c0_92] : memref<216x96xf32, #tpu.memory_space<vmem>>, vector<8x96xf32>
    %cst_93 = arith.constant dense<0.000000e+00> : vector<8x96xf32>
    %377 = tpu.matmul %375, %23, %cst_93 {dimension_numbers = #tpu.dot_dimension_numbers<[1], [0], [0], [1], [0, 0, 1, 1], [], []>} : vector<8x32xf32>, vector<32x96xf32>, vector<8x96xf32> -> vector<8x96xf32>
    %378 = arith.addf %377, %26 : vector<8x96xf32>
    %379 = vector.extract_strided_slice %376 {offsets = [0, 0], sizes = [8, 32], strides = [1, 1]} : vector<8x96xf32> to vector<8x32xf32>
    %380 = vector.extract_strided_slice %378 {offsets = [0, 0], sizes = [8, 32], strides = [1, 1]} : vector<8x96xf32> to vector<8x32xf32>
    %381 = arith.addf %379, %380 : vector<8x32xf32>
    %382 = arith.negf %381 : vector<8x32xf32>
    %383 = math.exp %382 : vector<8x32xf32>
    %cst_94 = arith.constant 1.000000e+00 : f32
    %384 = vector.broadcast %cst_94 : f32 to vector<8x32xf32>
    %385 = arith.addf %384, %383 : vector<8x32xf32>
    %386 = arith.divf %384, %385 : vector<8x32xf32>
    %387 = vector.extract_strided_slice %376 {offsets = [0, 32], sizes = [8, 32], strides = [1, 1]} : vector<8x96xf32> to vector<8x32xf32>
    %388 = vector.extract_strided_slice %378 {offsets = [0, 32], sizes = [8, 32], strides = [1, 1]} : vector<8x96xf32> to vector<8x32xf32>
    %389 = arith.addf %387, %388 : vector<8x32xf32>
    %390 = arith.negf %389 : vector<8x32xf32>
    %391 = math.exp %390 : vector<8x32xf32>
    %cst_95 = arith.constant 1.000000e+00 : f32
    %392 = vector.broadcast %cst_95 : f32 to vector<8x32xf32>
    %393 = arith.addf %392, %391 : vector<8x32xf32>
    %394 = arith.divf %392, %393 : vector<8x32xf32>
    %395 = vector.extract_strided_slice %376 {offsets = [0, 64], sizes = [8, 32], strides = [1, 1]} : vector<8x96xf32> to vector<8x32xf32>
    %396 = vector.extract_strided_slice %378 {offsets = [0, 64], sizes = [8, 32], strides = [1, 1]} : vector<8x96xf32> to vector<8x32xf32>
    %397 = arith.mulf %386, %396 : vector<8x32xf32>
    %398 = arith.addf %395, %397 : vector<8x32xf32>
    %399 = math.tanh %398 : vector<8x32xf32>
    %cst_96 = arith.constant 1.000000e+00 : f32
    %400 = vector.broadcast %cst_96 : f32 to vector<8x32xf32>
    %401 = arith.subf %400, %394 : vector<8x32xf32>
    %402 = arith.mulf %401, %399 : vector<8x32xf32>
    %403 = arith.mulf %394, %375 : vector<8x32xf32>
    %404 = arith.addf %402, %403 : vector<8x32xf32>
    %c104 = arith.constant 104 : index
    %c0_97 = arith.constant 0 : index
    %405 = vector.load %arg18[%c104, %c0_97] : memref<216x96xf32, #tpu.memory_space<vmem>>, vector<8x96xf32>
    %cst_98 = arith.constant dense<0.000000e+00> : vector<8x96xf32>
    %406 = tpu.matmul %404, %23, %cst_98 {dimension_numbers = #tpu.dot_dimension_numbers<[1], [0], [0], [1], [0, 0, 1, 1], [], []>} : vector<8x32xf32>, vector<32x96xf32>, vector<8x96xf32> -> vector<8x96xf32>
    %407 = arith.addf %406, %26 : vector<8x96xf32>
    %408 = vector.extract_strided_slice %405 {offsets = [0, 0], sizes = [8, 32], strides = [1, 1]} : vector<8x96xf32> to vector<8x32xf32>
    %409 = vector.extract_strided_slice %407 {offsets = [0, 0], sizes = [8, 32], strides = [1, 1]} : vector<8x96xf32> to vector<8x32xf32>
    %410 = arith.addf %408, %409 : vector<8x32xf32>
    %411 = arith.negf %410 : vector<8x32xf32>
    %412 = math.exp %411 : vector<8x32xf32>
    %cst_99 = arith.constant 1.000000e+00 : f32
    %413 = vector.broadcast %cst_99 : f32 to vector<8x32xf32>
    %414 = arith.addf %413, %412 : vector<8x32xf32>
    %415 = arith.divf %413, %414 : vector<8x32xf32>
    %416 = vector.extract_strided_slice %405 {offsets = [0, 32], sizes = [8, 32], strides = [1, 1]} : vector<8x96xf32> to vector<8x32xf32>
    %417 = vector.extract_strided_slice %407 {offsets = [0, 32], sizes = [8, 32], strides = [1, 1]} : vector<8x96xf32> to vector<8x32xf32>
    %418 = arith.addf %416, %417 : vector<8x32xf32>
    %419 = arith.negf %418 : vector<8x32xf32>
    %420 = math.exp %419 : vector<8x32xf32>
    %cst_100 = arith.constant 1.000000e+00 : f32
    %421 = vector.broadcast %cst_100 : f32 to vector<8x32xf32>
    %422 = arith.addf %421, %420 : vector<8x32xf32>
    %423 = arith.divf %421, %422 : vector<8x32xf32>
    %424 = vector.extract_strided_slice %405 {offsets = [0, 64], sizes = [8, 32], strides = [1, 1]} : vector<8x96xf32> to vector<8x32xf32>
    %425 = vector.extract_strided_slice %407 {offsets = [0, 64], sizes = [8, 32], strides = [1, 1]} : vector<8x96xf32> to vector<8x32xf32>
    %426 = arith.mulf %415, %425 : vector<8x32xf32>
    %427 = arith.addf %424, %426 : vector<8x32xf32>
    %428 = math.tanh %427 : vector<8x32xf32>
    %cst_101 = arith.constant 1.000000e+00 : f32
    %429 = vector.broadcast %cst_101 : f32 to vector<8x32xf32>
    %430 = arith.subf %429, %423 : vector<8x32xf32>
    %431 = arith.mulf %430, %428 : vector<8x32xf32>
    %432 = arith.mulf %423, %404 : vector<8x32xf32>
    %433 = arith.addf %431, %432 : vector<8x32xf32>
    %c112 = arith.constant 112 : index
    %c0_102 = arith.constant 0 : index
    %434 = vector.load %arg18[%c112, %c0_102] : memref<216x96xf32, #tpu.memory_space<vmem>>, vector<8x96xf32>
    %cst_103 = arith.constant dense<0.000000e+00> : vector<8x96xf32>
    %435 = tpu.matmul %433, %23, %cst_103 {dimension_numbers = #tpu.dot_dimension_numbers<[1], [0], [0], [1], [0, 0, 1, 1], [], []>} : vector<8x32xf32>, vector<32x96xf32>, vector<8x96xf32> -> vector<8x96xf32>
    %436 = arith.addf %435, %26 : vector<8x96xf32>
    %437 = vector.extract_strided_slice %434 {offsets = [0, 0], sizes = [8, 32], strides = [1, 1]} : vector<8x96xf32> to vector<8x32xf32>
    %438 = vector.extract_strided_slice %436 {offsets = [0, 0], sizes = [8, 32], strides = [1, 1]} : vector<8x96xf32> to vector<8x32xf32>
    %439 = arith.addf %437, %438 : vector<8x32xf32>
    %440 = arith.negf %439 : vector<8x32xf32>
    %441 = math.exp %440 : vector<8x32xf32>
    %cst_104 = arith.constant 1.000000e+00 : f32
    %442 = vector.broadcast %cst_104 : f32 to vector<8x32xf32>
    %443 = arith.addf %442, %441 : vector<8x32xf32>
    %444 = arith.divf %442, %443 : vector<8x32xf32>
    %445 = vector.extract_strided_slice %434 {offsets = [0, 32], sizes = [8, 32], strides = [1, 1]} : vector<8x96xf32> to vector<8x32xf32>
    %446 = vector.extract_strided_slice %436 {offsets = [0, 32], sizes = [8, 32], strides = [1, 1]} : vector<8x96xf32> to vector<8x32xf32>
    %447 = arith.addf %445, %446 : vector<8x32xf32>
    %448 = arith.negf %447 : vector<8x32xf32>
    %449 = math.exp %448 : vector<8x32xf32>
    %cst_105 = arith.constant 1.000000e+00 : f32
    %450 = vector.broadcast %cst_105 : f32 to vector<8x32xf32>
    %451 = arith.addf %450, %449 : vector<8x32xf32>
    %452 = arith.divf %450, %451 : vector<8x32xf32>
    %453 = vector.extract_strided_slice %434 {offsets = [0, 64], sizes = [8, 32], strides = [1, 1]} : vector<8x96xf32> to vector<8x32xf32>
    %454 = vector.extract_strided_slice %436 {offsets = [0, 64], sizes = [8, 32], strides = [1, 1]} : vector<8x96xf32> to vector<8x32xf32>
    %455 = arith.mulf %444, %454 : vector<8x32xf32>
    %456 = arith.addf %453, %455 : vector<8x32xf32>
    %457 = math.tanh %456 : vector<8x32xf32>
    %cst_106 = arith.constant 1.000000e+00 : f32
    %458 = vector.broadcast %cst_106 : f32 to vector<8x32xf32>
    %459 = arith.subf %458, %452 : vector<8x32xf32>
    %460 = arith.mulf %459, %457 : vector<8x32xf32>
    %461 = arith.mulf %452, %433 : vector<8x32xf32>
    %462 = arith.addf %460, %461 : vector<8x32xf32>
    %c120 = arith.constant 120 : index
    %c0_107 = arith.constant 0 : index
    %463 = vector.load %arg18[%c120, %c0_107] : memref<216x96xf32, #tpu.memory_space<vmem>>, vector<8x96xf32>
    %cst_108 = arith.constant dense<0.000000e+00> : vector<8x96xf32>
    %464 = tpu.matmul %462, %23, %cst_108 {dimension_numbers = #tpu.dot_dimension_numbers<[1], [0], [0], [1], [0, 0, 1, 1], [], []>} : vector<8x32xf32>, vector<32x96xf32>, vector<8x96xf32> -> vector<8x96xf32>
    %465 = arith.addf %464, %26 : vector<8x96xf32>
    %466 = vector.extract_strided_slice %463 {offsets = [0, 0], sizes = [8, 32], strides = [1, 1]} : vector<8x96xf32> to vector<8x32xf32>
    %467 = vector.extract_strided_slice %465 {offsets = [0, 0], sizes = [8, 32], strides = [1, 1]} : vector<8x96xf32> to vector<8x32xf32>
    %468 = arith.addf %466, %467 : vector<8x32xf32>
    %469 = arith.negf %468 : vector<8x32xf32>
    %470 = math.exp %469 : vector<8x32xf32>
    %cst_109 = arith.constant 1.000000e+00 : f32
    %471 = vector.broadcast %cst_109 : f32 to vector<8x32xf32>
    %472 = arith.addf %471, %470 : vector<8x32xf32>
    %473 = arith.divf %471, %472 : vector<8x32xf32>
    %474 = vector.extract_strided_slice %463 {offsets = [0, 32], sizes = [8, 32], strides = [1, 1]} : vector<8x96xf32> to vector<8x32xf32>
    %475 = vector.extract_strided_slice %465 {offsets = [0, 32], sizes = [8, 32], strides = [1, 1]} : vector<8x96xf32> to vector<8x32xf32>
    %476 = arith.addf %474, %475 : vector<8x32xf32>
    %477 = arith.negf %476 : vector<8x32xf32>
    %478 = math.exp %477 : vector<8x32xf32>
    %cst_110 = arith.constant 1.000000e+00 : f32
    %479 = vector.broadcast %cst_110 : f32 to vector<8x32xf32>
    %480 = arith.addf %479, %478 : vector<8x32xf32>
    %481 = arith.divf %479, %480 : vector<8x32xf32>
    %482 = vector.extract_strided_slice %463 {offsets = [0, 64], sizes = [8, 32], strides = [1, 1]} : vector<8x96xf32> to vector<8x32xf32>
    %483 = vector.extract_strided_slice %465 {offsets = [0, 64], sizes = [8, 32], strides = [1, 1]} : vector<8x96xf32> to vector<8x32xf32>
    %484 = arith.mulf %473, %483 : vector<8x32xf32>
    %485 = arith.addf %482, %484 : vector<8x32xf32>
    %486 = math.tanh %485 : vector<8x32xf32>
    %cst_111 = arith.constant 1.000000e+00 : f32
    %487 = vector.broadcast %cst_111 : f32 to vector<8x32xf32>
    %488 = arith.subf %487, %481 : vector<8x32xf32>
    %489 = arith.mulf %488, %486 : vector<8x32xf32>
    %490 = arith.mulf %481, %462 : vector<8x32xf32>
    %491 = arith.addf %489, %490 : vector<8x32xf32>
    %c128 = arith.constant 128 : index
    %c0_112 = arith.constant 0 : index
    %492 = vector.load %arg18[%c128, %c0_112] : memref<216x96xf32, #tpu.memory_space<vmem>>, vector<8x96xf32>
    %cst_113 = arith.constant dense<0.000000e+00> : vector<8x96xf32>
    %493 = tpu.matmul %491, %23, %cst_113 {dimension_numbers = #tpu.dot_dimension_numbers<[1], [0], [0], [1], [0, 0, 1, 1], [], []>} : vector<8x32xf32>, vector<32x96xf32>, vector<8x96xf32> -> vector<8x96xf32>
    %494 = arith.addf %493, %26 : vector<8x96xf32>
    %495 = vector.extract_strided_slice %492 {offsets = [0, 0], sizes = [8, 32], strides = [1, 1]} : vector<8x96xf32> to vector<8x32xf32>
    %496 = vector.extract_strided_slice %494 {offsets = [0, 0], sizes = [8, 32], strides = [1, 1]} : vector<8x96xf32> to vector<8x32xf32>
    %497 = arith.addf %495, %496 : vector<8x32xf32>
    %498 = arith.negf %497 : vector<8x32xf32>
    %499 = math.exp %498 : vector<8x32xf32>
    %cst_114 = arith.constant 1.000000e+00 : f32
    %500 = vector.broadcast %cst_114 : f32 to vector<8x32xf32>
    %501 = arith.addf %500, %499 : vector<8x32xf32>
    %502 = arith.divf %500, %501 : vector<8x32xf32>
    %503 = vector.extract_strided_slice %492 {offsets = [0, 32], sizes = [8, 32], strides = [1, 1]} : vector<8x96xf32> to vector<8x32xf32>
    %504 = vector.extract_strided_slice %494 {offsets = [0, 32], sizes = [8, 32], strides = [1, 1]} : vector<8x96xf32> to vector<8x32xf32>
    %505 = arith.addf %503, %504 : vector<8x32xf32>
    %506 = arith.negf %505 : vector<8x32xf32>
    %507 = math.exp %506 : vector<8x32xf32>
    %cst_115 = arith.constant 1.000000e+00 : f32
    %508 = vector.broadcast %cst_115 : f32 to vector<8x32xf32>
    %509 = arith.addf %508, %507 : vector<8x32xf32>
    %510 = arith.divf %508, %509 : vector<8x32xf32>
    %511 = vector.extract_strided_slice %492 {offsets = [0, 64], sizes = [8, 32], strides = [1, 1]} : vector<8x96xf32> to vector<8x32xf32>
    %512 = vector.extract_strided_slice %494 {offsets = [0, 64], sizes = [8, 32], strides = [1, 1]} : vector<8x96xf32> to vector<8x32xf32>
    %513 = arith.mulf %502, %512 : vector<8x32xf32>
    %514 = arith.addf %511, %513 : vector<8x32xf32>
    %515 = math.tanh %514 : vector<8x32xf32>
    %cst_116 = arith.constant 1.000000e+00 : f32
    %516 = vector.broadcast %cst_116 : f32 to vector<8x32xf32>
    %517 = arith.subf %516, %510 : vector<8x32xf32>
    %518 = arith.mulf %517, %515 : vector<8x32xf32>
    %519 = arith.mulf %510, %491 : vector<8x32xf32>
    %520 = arith.addf %518, %519 : vector<8x32xf32>
    %c136 = arith.constant 136 : index
    %c0_117 = arith.constant 0 : index
    %521 = vector.load %arg18[%c136, %c0_117] : memref<216x96xf32, #tpu.memory_space<vmem>>, vector<8x96xf32>
    %cst_118 = arith.constant dense<0.000000e+00> : vector<8x96xf32>
    %522 = tpu.matmul %520, %23, %cst_118 {dimension_numbers = #tpu.dot_dimension_numbers<[1], [0], [0], [1], [0, 0, 1, 1], [], []>} : vector<8x32xf32>, vector<32x96xf32>, vector<8x96xf32> -> vector<8x96xf32>
    %523 = arith.addf %522, %26 : vector<8x96xf32>
    %524 = vector.extract_strided_slice %521 {offsets = [0, 0], sizes = [8, 32], strides = [1, 1]} : vector<8x96xf32> to vector<8x32xf32>
    %525 = vector.extract_strided_slice %523 {offsets = [0, 0], sizes = [8, 32], strides = [1, 1]} : vector<8x96xf32> to vector<8x32xf32>
    %526 = arith.addf %524, %525 : vector<8x32xf32>
    %527 = arith.negf %526 : vector<8x32xf32>
    %528 = math.exp %527 : vector<8x32xf32>
    %cst_119 = arith.constant 1.000000e+00 : f32
    %529 = vector.broadcast %cst_119 : f32 to vector<8x32xf32>
    %530 = arith.addf %529, %528 : vector<8x32xf32>
    %531 = arith.divf %529, %530 : vector<8x32xf32>
    %532 = vector.extract_strided_slice %521 {offsets = [0, 32], sizes = [8, 32], strides = [1, 1]} : vector<8x96xf32> to vector<8x32xf32>
    %533 = vector.extract_strided_slice %523 {offsets = [0, 32], sizes = [8, 32], strides = [1, 1]} : vector<8x96xf32> to vector<8x32xf32>
    %534 = arith.addf %532, %533 : vector<8x32xf32>
    %535 = arith.negf %534 : vector<8x32xf32>
    %536 = math.exp %535 : vector<8x32xf32>
    %cst_120 = arith.constant 1.000000e+00 : f32
    %537 = vector.broadcast %cst_120 : f32 to vector<8x32xf32>
    %538 = arith.addf %537, %536 : vector<8x32xf32>
    %539 = arith.divf %537, %538 : vector<8x32xf32>
    %540 = vector.extract_strided_slice %521 {offsets = [0, 64], sizes = [8, 32], strides = [1, 1]} : vector<8x96xf32> to vector<8x32xf32>
    %541 = vector.extract_strided_slice %523 {offsets = [0, 64], sizes = [8, 32], strides = [1, 1]} : vector<8x96xf32> to vector<8x32xf32>
    %542 = arith.mulf %531, %541 : vector<8x32xf32>
    %543 = arith.addf %540, %542 : vector<8x32xf32>
    %544 = math.tanh %543 : vector<8x32xf32>
    %cst_121 = arith.constant 1.000000e+00 : f32
    %545 = vector.broadcast %cst_121 : f32 to vector<8x32xf32>
    %546 = arith.subf %545, %539 : vector<8x32xf32>
    %547 = arith.mulf %546, %544 : vector<8x32xf32>
    %548 = arith.mulf %539, %520 : vector<8x32xf32>
    %549 = arith.addf %547, %548 : vector<8x32xf32>
    %c144 = arith.constant 144 : index
    %c0_122 = arith.constant 0 : index
    %550 = vector.load %arg18[%c144, %c0_122] : memref<216x96xf32, #tpu.memory_space<vmem>>, vector<8x96xf32>
    %cst_123 = arith.constant dense<0.000000e+00> : vector<8x96xf32>
    %551 = tpu.matmul %549, %23, %cst_123 {dimension_numbers = #tpu.dot_dimension_numbers<[1], [0], [0], [1], [0, 0, 1, 1], [], []>} : vector<8x32xf32>, vector<32x96xf32>, vector<8x96xf32> -> vector<8x96xf32>
    %552 = arith.addf %551, %26 : vector<8x96xf32>
    %553 = vector.extract_strided_slice %550 {offsets = [0, 0], sizes = [8, 32], strides = [1, 1]} : vector<8x96xf32> to vector<8x32xf32>
    %554 = vector.extract_strided_slice %552 {offsets = [0, 0], sizes = [8, 32], strides = [1, 1]} : vector<8x96xf32> to vector<8x32xf32>
    %555 = arith.addf %553, %554 : vector<8x32xf32>
    %556 = arith.negf %555 : vector<8x32xf32>
    %557 = math.exp %556 : vector<8x32xf32>
    %cst_124 = arith.constant 1.000000e+00 : f32
    %558 = vector.broadcast %cst_124 : f32 to vector<8x32xf32>
    %559 = arith.addf %558, %557 : vector<8x32xf32>
    %560 = arith.divf %558, %559 : vector<8x32xf32>
    %561 = vector.extract_strided_slice %550 {offsets = [0, 32], sizes = [8, 32], strides = [1, 1]} : vector<8x96xf32> to vector<8x32xf32>
    %562 = vector.extract_strided_slice %552 {offsets = [0, 32], sizes = [8, 32], strides = [1, 1]} : vector<8x96xf32> to vector<8x32xf32>
    %563 = arith.addf %561, %562 : vector<8x32xf32>
    %564 = arith.negf %563 : vector<8x32xf32>
    %565 = math.exp %564 : vector<8x32xf32>
    %cst_125 = arith.constant 1.000000e+00 : f32
    %566 = vector.broadcast %cst_125 : f32 to vector<8x32xf32>
    %567 = arith.addf %566, %565 : vector<8x32xf32>
    %568 = arith.divf %566, %567 : vector<8x32xf32>
    %569 = vector.extract_strided_slice %550 {offsets = [0, 64], sizes = [8, 32], strides = [1, 1]} : vector<8x96xf32> to vector<8x32xf32>
    %570 = vector.extract_strided_slice %552 {offsets = [0, 64], sizes = [8, 32], strides = [1, 1]} : vector<8x96xf32> to vector<8x32xf32>
    %571 = arith.mulf %560, %570 : vector<8x32xf32>
    %572 = arith.addf %569, %571 : vector<8x32xf32>
    %573 = math.tanh %572 : vector<8x32xf32>
    %cst_126 = arith.constant 1.000000e+00 : f32
    %574 = vector.broadcast %cst_126 : f32 to vector<8x32xf32>
    %575 = arith.subf %574, %568 : vector<8x32xf32>
    %576 = arith.mulf %575, %573 : vector<8x32xf32>
    %577 = arith.mulf %568, %549 : vector<8x32xf32>
    %578 = arith.addf %576, %577 : vector<8x32xf32>
    %c152 = arith.constant 152 : index
    %c0_127 = arith.constant 0 : index
    %579 = vector.load %arg18[%c152, %c0_127] : memref<216x96xf32, #tpu.memory_space<vmem>>, vector<8x96xf32>
    %cst_128 = arith.constant dense<0.000000e+00> : vector<8x96xf32>
    %580 = tpu.matmul %578, %23, %cst_128 {dimension_numbers = #tpu.dot_dimension_numbers<[1], [0], [0], [1], [0, 0, 1, 1], [], []>} : vector<8x32xf32>, vector<32x96xf32>, vector<8x96xf32> -> vector<8x96xf32>
    %581 = arith.addf %580, %26 : vector<8x96xf32>
    %582 = vector.extract_strided_slice %579 {offsets = [0, 0], sizes = [8, 32], strides = [1, 1]} : vector<8x96xf32> to vector<8x32xf32>
    %583 = vector.extract_strided_slice %581 {offsets = [0, 0], sizes = [8, 32], strides = [1, 1]} : vector<8x96xf32> to vector<8x32xf32>
    %584 = arith.addf %582, %583 : vector<8x32xf32>
    %585 = arith.negf %584 : vector<8x32xf32>
    %586 = math.exp %585 : vector<8x32xf32>
    %cst_129 = arith.constant 1.000000e+00 : f32
    %587 = vector.broadcast %cst_129 : f32 to vector<8x32xf32>
    %588 = arith.addf %587, %586 : vector<8x32xf32>
    %589 = arith.divf %587, %588 : vector<8x32xf32>
    %590 = vector.extract_strided_slice %579 {offsets = [0, 32], sizes = [8, 32], strides = [1, 1]} : vector<8x96xf32> to vector<8x32xf32>
    %591 = vector.extract_strided_slice %581 {offsets = [0, 32], sizes = [8, 32], strides = [1, 1]} : vector<8x96xf32> to vector<8x32xf32>
    %592 = arith.addf %590, %591 : vector<8x32xf32>
    %593 = arith.negf %592 : vector<8x32xf32>
    %594 = math.exp %593 : vector<8x32xf32>
    %cst_130 = arith.constant 1.000000e+00 : f32
    %595 = vector.broadcast %cst_130 : f32 to vector<8x32xf32>
    %596 = arith.addf %595, %594 : vector<8x32xf32>
    %597 = arith.divf %595, %596 : vector<8x32xf32>
    %598 = vector.extract_strided_slice %579 {offsets = [0, 64], sizes = [8, 32], strides = [1, 1]} : vector<8x96xf32> to vector<8x32xf32>
    %599 = vector.extract_strided_slice %581 {offsets = [0, 64], sizes = [8, 32], strides = [1, 1]} : vector<8x96xf32> to vector<8x32xf32>
    %600 = arith.mulf %589, %599 : vector<8x32xf32>
    %601 = arith.addf %598, %600 : vector<8x32xf32>
    %602 = math.tanh %601 : vector<8x32xf32>
    %cst_131 = arith.constant 1.000000e+00 : f32
    %603 = vector.broadcast %cst_131 : f32 to vector<8x32xf32>
    %604 = arith.subf %603, %597 : vector<8x32xf32>
    %605 = arith.mulf %604, %602 : vector<8x32xf32>
    %606 = arith.mulf %597, %578 : vector<8x32xf32>
    %607 = arith.addf %605, %606 : vector<8x32xf32>
    %c160 = arith.constant 160 : index
    %c0_132 = arith.constant 0 : index
    %608 = vector.load %arg18[%c160, %c0_132] : memref<216x96xf32, #tpu.memory_space<vmem>>, vector<8x96xf32>
    %cst_133 = arith.constant dense<0.000000e+00> : vector<8x96xf32>
    %609 = tpu.matmul %607, %23, %cst_133 {dimension_numbers = #tpu.dot_dimension_numbers<[1], [0], [0], [1], [0, 0, 1, 1], [], []>} : vector<8x32xf32>, vector<32x96xf32>, vector<8x96xf32> -> vector<8x96xf32>
    %610 = arith.addf %609, %26 : vector<8x96xf32>
    %611 = vector.extract_strided_slice %608 {offsets = [0, 0], sizes = [8, 32], strides = [1, 1]} : vector<8x96xf32> to vector<8x32xf32>
    %612 = vector.extract_strided_slice %610 {offsets = [0, 0], sizes = [8, 32], strides = [1, 1]} : vector<8x96xf32> to vector<8x32xf32>
    %613 = arith.addf %611, %612 : vector<8x32xf32>
    %614 = arith.negf %613 : vector<8x32xf32>
    %615 = math.exp %614 : vector<8x32xf32>
    %cst_134 = arith.constant 1.000000e+00 : f32
    %616 = vector.broadcast %cst_134 : f32 to vector<8x32xf32>
    %617 = arith.addf %616, %615 : vector<8x32xf32>
    %618 = arith.divf %616, %617 : vector<8x32xf32>
    %619 = vector.extract_strided_slice %608 {offsets = [0, 32], sizes = [8, 32], strides = [1, 1]} : vector<8x96xf32> to vector<8x32xf32>
    %620 = vector.extract_strided_slice %610 {offsets = [0, 32], sizes = [8, 32], strides = [1, 1]} : vector<8x96xf32> to vector<8x32xf32>
    %621 = arith.addf %619, %620 : vector<8x32xf32>
    %622 = arith.negf %621 : vector<8x32xf32>
    %623 = math.exp %622 : vector<8x32xf32>
    %cst_135 = arith.constant 1.000000e+00 : f32
    %624 = vector.broadcast %cst_135 : f32 to vector<8x32xf32>
    %625 = arith.addf %624, %623 : vector<8x32xf32>
    %626 = arith.divf %624, %625 : vector<8x32xf32>
    %627 = vector.extract_strided_slice %608 {offsets = [0, 64], sizes = [8, 32], strides = [1, 1]} : vector<8x96xf32> to vector<8x32xf32>
    %628 = vector.extract_strided_slice %610 {offsets = [0, 64], sizes = [8, 32], strides = [1, 1]} : vector<8x96xf32> to vector<8x32xf32>
    %629 = arith.mulf %618, %628 : vector<8x32xf32>
    %630 = arith.addf %627, %629 : vector<8x32xf32>
    %631 = math.tanh %630 : vector<8x32xf32>
    %cst_136 = arith.constant 1.000000e+00 : f32
    %632 = vector.broadcast %cst_136 : f32 to vector<8x32xf32>
    %633 = arith.subf %632, %626 : vector<8x32xf32>
    %634 = arith.mulf %633, %631 : vector<8x32xf32>
    %635 = arith.mulf %626, %607 : vector<8x32xf32>
    %636 = arith.addf %634, %635 : vector<8x32xf32>
    %c168 = arith.constant 168 : index
    %c0_137 = arith.constant 0 : index
    %637 = vector.load %arg18[%c168, %c0_137] : memref<216x96xf32, #tpu.memory_space<vmem>>, vector<8x96xf32>
    %cst_138 = arith.constant dense<0.000000e+00> : vector<8x96xf32>
    %638 = tpu.matmul %636, %23, %cst_138 {dimension_numbers = #tpu.dot_dimension_numbers<[1], [0], [0], [1], [0, 0, 1, 1], [], []>} : vector<8x32xf32>, vector<32x96xf32>, vector<8x96xf32> -> vector<8x96xf32>
    %639 = arith.addf %638, %26 : vector<8x96xf32>
    %640 = vector.extract_strided_slice %637 {offsets = [0, 0], sizes = [8, 32], strides = [1, 1]} : vector<8x96xf32> to vector<8x32xf32>
    %641 = vector.extract_strided_slice %639 {offsets = [0, 0], sizes = [8, 32], strides = [1, 1]} : vector<8x96xf32> to vector<8x32xf32>
    %642 = arith.addf %640, %641 : vector<8x32xf32>
    %643 = arith.negf %642 : vector<8x32xf32>
    %644 = math.exp %643 : vector<8x32xf32>
    %cst_139 = arith.constant 1.000000e+00 : f32
    %645 = vector.broadcast %cst_139 : f32 to vector<8x32xf32>
    %646 = arith.addf %645, %644 : vector<8x32xf32>
    %647 = arith.divf %645, %646 : vector<8x32xf32>
    %648 = vector.extract_strided_slice %637 {offsets = [0, 32], sizes = [8, 32], strides = [1, 1]} : vector<8x96xf32> to vector<8x32xf32>
    %649 = vector.extract_strided_slice %639 {offsets = [0, 32], sizes = [8, 32], strides = [1, 1]} : vector<8x96xf32> to vector<8x32xf32>
    %650 = arith.addf %648, %649 : vector<8x32xf32>
    %651 = arith.negf %650 : vector<8x32xf32>
    %652 = math.exp %651 : vector<8x32xf32>
    %cst_140 = arith.constant 1.000000e+00 : f32
    %653 = vector.broadcast %cst_140 : f32 to vector<8x32xf32>
    %654 = arith.addf %653, %652 : vector<8x32xf32>
    %655 = arith.divf %653, %654 : vector<8x32xf32>
    %656 = vector.extract_strided_slice %637 {offsets = [0, 64], sizes = [8, 32], strides = [1, 1]} : vector<8x96xf32> to vector<8x32xf32>
    %657 = vector.extract_strided_slice %639 {offsets = [0, 64], sizes = [8, 32], strides = [1, 1]} : vector<8x96xf32> to vector<8x32xf32>
    %658 = arith.mulf %647, %657 : vector<8x32xf32>
    %659 = arith.addf %656, %658 : vector<8x32xf32>
    %660 = math.tanh %659 : vector<8x32xf32>
    %cst_141 = arith.constant 1.000000e+00 : f32
    %661 = vector.broadcast %cst_141 : f32 to vector<8x32xf32>
    %662 = arith.subf %661, %655 : vector<8x32xf32>
    %663 = arith.mulf %662, %660 : vector<8x32xf32>
    %664 = arith.mulf %655, %636 : vector<8x32xf32>
    %665 = arith.addf %663, %664 : vector<8x32xf32>
    %c176 = arith.constant 176 : index
    %c0_142 = arith.constant 0 : index
    %666 = vector.load %arg18[%c176, %c0_142] : memref<216x96xf32, #tpu.memory_space<vmem>>, vector<8x96xf32>
    %cst_143 = arith.constant dense<0.000000e+00> : vector<8x96xf32>
    %667 = tpu.matmul %665, %23, %cst_143 {dimension_numbers = #tpu.dot_dimension_numbers<[1], [0], [0], [1], [0, 0, 1, 1], [], []>} : vector<8x32xf32>, vector<32x96xf32>, vector<8x96xf32> -> vector<8x96xf32>
    %668 = arith.addf %667, %26 : vector<8x96xf32>
    %669 = vector.extract_strided_slice %666 {offsets = [0, 0], sizes = [8, 32], strides = [1, 1]} : vector<8x96xf32> to vector<8x32xf32>
    %670 = vector.extract_strided_slice %668 {offsets = [0, 0], sizes = [8, 32], strides = [1, 1]} : vector<8x96xf32> to vector<8x32xf32>
    %671 = arith.addf %669, %670 : vector<8x32xf32>
    %672 = arith.negf %671 : vector<8x32xf32>
    %673 = math.exp %672 : vector<8x32xf32>
    %cst_144 = arith.constant 1.000000e+00 : f32
    %674 = vector.broadcast %cst_144 : f32 to vector<8x32xf32>
    %675 = arith.addf %674, %673 : vector<8x32xf32>
    %676 = arith.divf %674, %675 : vector<8x32xf32>
    %677 = vector.extract_strided_slice %666 {offsets = [0, 32], sizes = [8, 32], strides = [1, 1]} : vector<8x96xf32> to vector<8x32xf32>
    %678 = vector.extract_strided_slice %668 {offsets = [0, 32], sizes = [8, 32], strides = [1, 1]} : vector<8x96xf32> to vector<8x32xf32>
    %679 = arith.addf %677, %678 : vector<8x32xf32>
    %680 = arith.negf %679 : vector<8x32xf32>
    %681 = math.exp %680 : vector<8x32xf32>
    %cst_145 = arith.constant 1.000000e+00 : f32
    %682 = vector.broadcast %cst_145 : f32 to vector<8x32xf32>
    %683 = arith.addf %682, %681 : vector<8x32xf32>
    %684 = arith.divf %682, %683 : vector<8x32xf32>
    %685 = vector.extract_strided_slice %666 {offsets = [0, 64], sizes = [8, 32], strides = [1, 1]} : vector<8x96xf32> to vector<8x32xf32>
    %686 = vector.extract_strided_slice %668 {offsets = [0, 64], sizes = [8, 32], strides = [1, 1]} : vector<8x96xf32> to vector<8x32xf32>
    %687 = arith.mulf %676, %686 : vector<8x32xf32>
    %688 = arith.addf %685, %687 : vector<8x32xf32>
    %689 = math.tanh %688 : vector<8x32xf32>
    %cst_146 = arith.constant 1.000000e+00 : f32
    %690 = vector.broadcast %cst_146 : f32 to vector<8x32xf32>
    %691 = arith.subf %690, %684 : vector<8x32xf32>
    %692 = arith.mulf %691, %689 : vector<8x32xf32>
    %693 = arith.mulf %684, %665 : vector<8x32xf32>
    %694 = arith.addf %692, %693 : vector<8x32xf32>
    %c184 = arith.constant 184 : index
    %c0_147 = arith.constant 0 : index
    %695 = vector.load %arg18[%c184, %c0_147] : memref<216x96xf32, #tpu.memory_space<vmem>>, vector<8x96xf32>
    %cst_148 = arith.constant dense<0.000000e+00> : vector<8x96xf32>
    %696 = tpu.matmul %694, %23, %cst_148 {dimension_numbers = #tpu.dot_dimension_numbers<[1], [0], [0], [1], [0, 0, 1, 1], [], []>} : vector<8x32xf32>, vector<32x96xf32>, vector<8x96xf32> -> vector<8x96xf32>
    %697 = arith.addf %696, %26 : vector<8x96xf32>
    %698 = vector.extract_strided_slice %695 {offsets = [0, 0], sizes = [8, 32], strides = [1, 1]} : vector<8x96xf32> to vector<8x32xf32>
    %699 = vector.extract_strided_slice %697 {offsets = [0, 0], sizes = [8, 32], strides = [1, 1]} : vector<8x96xf32> to vector<8x32xf32>
    %700 = arith.addf %698, %699 : vector<8x32xf32>
    %701 = arith.negf %700 : vector<8x32xf32>
    %702 = math.exp %701 : vector<8x32xf32>
    %cst_149 = arith.constant 1.000000e+00 : f32
    %703 = vector.broadcast %cst_149 : f32 to vector<8x32xf32>
    %704 = arith.addf %703, %702 : vector<8x32xf32>
    %705 = arith.divf %703, %704 : vector<8x32xf32>
    %706 = vector.extract_strided_slice %695 {offsets = [0, 32], sizes = [8, 32], strides = [1, 1]} : vector<8x96xf32> to vector<8x32xf32>
    %707 = vector.extract_strided_slice %697 {offsets = [0, 32], sizes = [8, 32], strides = [1, 1]} : vector<8x96xf32> to vector<8x32xf32>
    %708 = arith.addf %706, %707 : vector<8x32xf32>
    %709 = arith.negf %708 : vector<8x32xf32>
    %710 = math.exp %709 : vector<8x32xf32>
    %cst_150 = arith.constant 1.000000e+00 : f32
    %711 = vector.broadcast %cst_150 : f32 to vector<8x32xf32>
    %712 = arith.addf %711, %710 : vector<8x32xf32>
    %713 = arith.divf %711, %712 : vector<8x32xf32>
    %714 = vector.extract_strided_slice %695 {offsets = [0, 64], sizes = [8, 32], strides = [1, 1]} : vector<8x96xf32> to vector<8x32xf32>
    %715 = vector.extract_strided_slice %697 {offsets = [0, 64], sizes = [8, 32], strides = [1, 1]} : vector<8x96xf32> to vector<8x32xf32>
    %716 = arith.mulf %705, %715 : vector<8x32xf32>
    %717 = arith.addf %714, %716 : vector<8x32xf32>
    %718 = math.tanh %717 : vector<8x32xf32>
    %cst_151 = arith.constant 1.000000e+00 : f32
    %719 = vector.broadcast %cst_151 : f32 to vector<8x32xf32>
    %720 = arith.subf %719, %713 : vector<8x32xf32>
    %721 = arith.mulf %720, %718 : vector<8x32xf32>
    %722 = arith.mulf %713, %694 : vector<8x32xf32>
    %723 = arith.addf %721, %722 : vector<8x32xf32>
    %c192 = arith.constant 192 : index
    %c0_152 = arith.constant 0 : index
    %724 = vector.load %arg18[%c192, %c0_152] : memref<216x96xf32, #tpu.memory_space<vmem>>, vector<8x96xf32>
    %cst_153 = arith.constant dense<0.000000e+00> : vector<8x96xf32>
    %725 = tpu.matmul %723, %23, %cst_153 {dimension_numbers = #tpu.dot_dimension_numbers<[1], [0], [0], [1], [0, 0, 1, 1], [], []>} : vector<8x32xf32>, vector<32x96xf32>, vector<8x96xf32> -> vector<8x96xf32>
    %726 = arith.addf %725, %26 : vector<8x96xf32>
    %727 = vector.extract_strided_slice %724 {offsets = [0, 0], sizes = [8, 32], strides = [1, 1]} : vector<8x96xf32> to vector<8x32xf32>
    %728 = vector.extract_strided_slice %726 {offsets = [0, 0], sizes = [8, 32], strides = [1, 1]} : vector<8x96xf32> to vector<8x32xf32>
    %729 = arith.addf %727, %728 : vector<8x32xf32>
    %730 = arith.negf %729 : vector<8x32xf32>
    %731 = math.exp %730 : vector<8x32xf32>
    %cst_154 = arith.constant 1.000000e+00 : f32
    %732 = vector.broadcast %cst_154 : f32 to vector<8x32xf32>
    %733 = arith.addf %732, %731 : vector<8x32xf32>
    %734 = arith.divf %732, %733 : vector<8x32xf32>
    %735 = vector.extract_strided_slice %724 {offsets = [0, 32], sizes = [8, 32], strides = [1, 1]} : vector<8x96xf32> to vector<8x32xf32>
    %736 = vector.extract_strided_slice %726 {offsets = [0, 32], sizes = [8, 32], strides = [1, 1]} : vector<8x96xf32> to vector<8x32xf32>
    %737 = arith.addf %735, %736 : vector<8x32xf32>
    %738 = arith.negf %737 : vector<8x32xf32>
    %739 = math.exp %738 : vector<8x32xf32>
    %cst_155 = arith.constant 1.000000e+00 : f32
    %740 = vector.broadcast %cst_155 : f32 to vector<8x32xf32>
    %741 = arith.addf %740, %739 : vector<8x32xf32>
    %742 = arith.divf %740, %741 : vector<8x32xf32>
    %743 = vector.extract_strided_slice %724 {offsets = [0, 64], sizes = [8, 32], strides = [1, 1]} : vector<8x96xf32> to vector<8x32xf32>
    %744 = vector.extract_strided_slice %726 {offsets = [0, 64], sizes = [8, 32], strides = [1, 1]} : vector<8x96xf32> to vector<8x32xf32>
    %745 = arith.mulf %734, %744 : vector<8x32xf32>
    %746 = arith.addf %743, %745 : vector<8x32xf32>
    %747 = math.tanh %746 : vector<8x32xf32>
    %cst_156 = arith.constant 1.000000e+00 : f32
    %748 = vector.broadcast %cst_156 : f32 to vector<8x32xf32>
    %749 = arith.subf %748, %742 : vector<8x32xf32>
    %750 = arith.mulf %749, %747 : vector<8x32xf32>
    %751 = arith.mulf %742, %723 : vector<8x32xf32>
    %752 = arith.addf %750, %751 : vector<8x32xf32>
    %c200 = arith.constant 200 : index
    %c0_157 = arith.constant 0 : index
    %753 = vector.load %arg18[%c200, %c0_157] : memref<216x96xf32, #tpu.memory_space<vmem>>, vector<8x96xf32>
    %cst_158 = arith.constant dense<0.000000e+00> : vector<8x96xf32>
    %754 = tpu.matmul %752, %23, %cst_158 {dimension_numbers = #tpu.dot_dimension_numbers<[1], [0], [0], [1], [0, 0, 1, 1], [], []>} : vector<8x32xf32>, vector<32x96xf32>, vector<8x96xf32> -> vector<8x96xf32>
    %755 = arith.addf %754, %26 : vector<8x96xf32>
    %756 = vector.extract_strided_slice %753 {offsets = [0, 0], sizes = [8, 32], strides = [1, 1]} : vector<8x96xf32> to vector<8x32xf32>
    %757 = vector.extract_strided_slice %755 {offsets = [0, 0], sizes = [8, 32], strides = [1, 1]} : vector<8x96xf32> to vector<8x32xf32>
    %758 = arith.addf %756, %757 : vector<8x32xf32>
    %759 = arith.negf %758 : vector<8x32xf32>
    %760 = math.exp %759 : vector<8x32xf32>
    %cst_159 = arith.constant 1.000000e+00 : f32
    %761 = vector.broadcast %cst_159 : f32 to vector<8x32xf32>
    %762 = arith.addf %761, %760 : vector<8x32xf32>
    %763 = arith.divf %761, %762 : vector<8x32xf32>
    %764 = vector.extract_strided_slice %753 {offsets = [0, 32], sizes = [8, 32], strides = [1, 1]} : vector<8x96xf32> to vector<8x32xf32>
    %765 = vector.extract_strided_slice %755 {offsets = [0, 32], sizes = [8, 32], strides = [1, 1]} : vector<8x96xf32> to vector<8x32xf32>
    %766 = arith.addf %764, %765 : vector<8x32xf32>
    %767 = arith.negf %766 : vector<8x32xf32>
    %768 = math.exp %767 : vector<8x32xf32>
    %cst_160 = arith.constant 1.000000e+00 : f32
    %769 = vector.broadcast %cst_160 : f32 to vector<8x32xf32>
    %770 = arith.addf %769, %768 : vector<8x32xf32>
    %771 = arith.divf %769, %770 : vector<8x32xf32>
    %772 = vector.extract_strided_slice %753 {offsets = [0, 64], sizes = [8, 32], strides = [1, 1]} : vector<8x96xf32> to vector<8x32xf32>
    %773 = vector.extract_strided_slice %755 {offsets = [0, 64], sizes = [8, 32], strides = [1, 1]} : vector<8x96xf32> to vector<8x32xf32>
    %774 = arith.mulf %763, %773 : vector<8x32xf32>
    %775 = arith.addf %772, %774 : vector<8x32xf32>
    %776 = math.tanh %775 : vector<8x32xf32>
    %cst_161 = arith.constant 1.000000e+00 : f32
    %777 = vector.broadcast %cst_161 : f32 to vector<8x32xf32>
    %778 = arith.subf %777, %771 : vector<8x32xf32>
    %779 = arith.mulf %778, %776 : vector<8x32xf32>
    %780 = arith.mulf %771, %752 : vector<8x32xf32>
    %781 = arith.addf %779, %780 : vector<8x32xf32>
    %c208 = arith.constant 208 : index
    %c0_162 = arith.constant 0 : index
    %782 = vector.load %arg18[%c208, %c0_162] : memref<216x96xf32, #tpu.memory_space<vmem>>, vector<8x96xf32>
    %cst_163 = arith.constant dense<0.000000e+00> : vector<8x96xf32>
    %783 = tpu.matmul %781, %23, %cst_163 {dimension_numbers = #tpu.dot_dimension_numbers<[1], [0], [0], [1], [0, 0, 1, 1], [], []>} : vector<8x32xf32>, vector<32x96xf32>, vector<8x96xf32> -> vector<8x96xf32>
    %784 = arith.addf %783, %26 : vector<8x96xf32>
    %785 = vector.extract_strided_slice %782 {offsets = [0, 0], sizes = [8, 32], strides = [1, 1]} : vector<8x96xf32> to vector<8x32xf32>
    %786 = vector.extract_strided_slice %784 {offsets = [0, 0], sizes = [8, 32], strides = [1, 1]} : vector<8x96xf32> to vector<8x32xf32>
    %787 = arith.addf %785, %786 : vector<8x32xf32>
    %788 = arith.negf %787 : vector<8x32xf32>
    %789 = math.exp %788 : vector<8x32xf32>
    %cst_164 = arith.constant 1.000000e+00 : f32
    %790 = vector.broadcast %cst_164 : f32 to vector<8x32xf32>
    %791 = arith.addf %790, %789 : vector<8x32xf32>
    %792 = arith.divf %790, %791 : vector<8x32xf32>
    %793 = vector.extract_strided_slice %782 {offsets = [0, 32], sizes = [8, 32], strides = [1, 1]} : vector<8x96xf32> to vector<8x32xf32>
    %794 = vector.extract_strided_slice %784 {offsets = [0, 32], sizes = [8, 32], strides = [1, 1]} : vector<8x96xf32> to vector<8x32xf32>
    %795 = arith.addf %793, %794 : vector<8x32xf32>
    %796 = arith.negf %795 : vector<8x32xf32>
    %797 = math.exp %796 : vector<8x32xf32>
    %cst_165 = arith.constant 1.000000e+00 : f32
    %798 = vector.broadcast %cst_165 : f32 to vector<8x32xf32>
    %799 = arith.addf %798, %797 : vector<8x32xf32>
    %800 = arith.divf %798, %799 : vector<8x32xf32>
    %801 = vector.extract_strided_slice %782 {offsets = [0, 64], sizes = [8, 32], strides = [1, 1]} : vector<8x96xf32> to vector<8x32xf32>
    %802 = vector.extract_strided_slice %784 {offsets = [0, 64], sizes = [8, 32], strides = [1, 1]} : vector<8x96xf32> to vector<8x32xf32>
    %803 = arith.mulf %792, %802 : vector<8x32xf32>
    %804 = arith.addf %801, %803 : vector<8x32xf32>
    %805 = math.tanh %804 : vector<8x32xf32>
    %cst_166 = arith.constant 1.000000e+00 : f32
    %806 = vector.broadcast %cst_166 : f32 to vector<8x32xf32>
    %807 = arith.subf %806, %800 : vector<8x32xf32>
    %808 = arith.mulf %807, %805 : vector<8x32xf32>
    %809 = arith.mulf %800, %781 : vector<8x32xf32>
    %810 = arith.addf %808, %809 : vector<8x32xf32>
    %c0_167 = arith.constant 0 : index
    %c0_168 = arith.constant 0 : index
    %811 = vector.load %arg10[%c0_167, %c0_168] : memref<4x12xf32, #tpu.memory_space<vmem>>, vector<4x12xf32>
    %c0_169 = arith.constant 0 : index
    %c0_170 = arith.constant 0 : index
    %812 = vector.load %arg11[%c0_169, %c0_170] : memref<1x12xf32, #tpu.memory_space<vmem>>, vector<1x12xf32>
    %813 = vector.shape_cast %812 : vector<1x12xf32> to vector<1x12xf32>
    %814 = vector.broadcast %813 : vector<1x12xf32> to vector<64x12xf32>
    %cst_171 = arith.constant 0.000000e+00 : f32
    %815 = vector.broadcast %cst_171 : f32 to vector<64x4xf32>
    %c0_172 = arith.constant 0 : index
    %c0_173 = arith.constant 0 : index
    %816 = vector.load %arg19[%c0_172, %c0_173] : memref<192x12xf32, #tpu.memory_space<vmem>>, vector<64x12xf32>
    %cst_174 = arith.constant dense<0.000000e+00> : vector<64x12xf32>
    %817 = tpu.matmul %815, %811, %cst_174 {dimension_numbers = #tpu.dot_dimension_numbers<[1], [0], [0], [1], [0, 0, 1, 1], [], []>} : vector<64x4xf32>, vector<4x12xf32>, vector<64x12xf32> -> vector<64x12xf32>
    %818 = arith.addf %817, %814 : vector<64x12xf32>
    %819 = vector.extract_strided_slice %816 {offsets = [0, 0], sizes = [64, 4], strides = [1, 1]} : vector<64x12xf32> to vector<64x4xf32>
    %820 = vector.extract_strided_slice %818 {offsets = [0, 0], sizes = [64, 4], strides = [1, 1]} : vector<64x12xf32> to vector<64x4xf32>
    %821 = arith.addf %819, %820 : vector<64x4xf32>
    %822 = arith.negf %821 : vector<64x4xf32>
    %823 = math.exp %822 : vector<64x4xf32>
    %cst_175 = arith.constant 1.000000e+00 : f32
    %824 = vector.broadcast %cst_175 : f32 to vector<64x4xf32>
    %825 = arith.addf %824, %823 : vector<64x4xf32>
    %826 = arith.divf %824, %825 : vector<64x4xf32>
    %827 = vector.extract_strided_slice %816 {offsets = [0, 4], sizes = [64, 4], strides = [1, 1]} : vector<64x12xf32> to vector<64x4xf32>
    %828 = vector.extract_strided_slice %818 {offsets = [0, 4], sizes = [64, 4], strides = [1, 1]} : vector<64x12xf32> to vector<64x4xf32>
    %829 = arith.addf %827, %828 : vector<64x4xf32>
    %830 = arith.negf %829 : vector<64x4xf32>
    %831 = math.exp %830 : vector<64x4xf32>
    %cst_176 = arith.constant 1.000000e+00 : f32
    %832 = vector.broadcast %cst_176 : f32 to vector<64x4xf32>
    %833 = arith.addf %832, %831 : vector<64x4xf32>
    %834 = arith.divf %832, %833 : vector<64x4xf32>
    %835 = vector.extract_strided_slice %816 {offsets = [0, 8], sizes = [64, 4], strides = [1, 1]} : vector<64x12xf32> to vector<64x4xf32>
    %836 = vector.extract_strided_slice %818 {offsets = [0, 8], sizes = [64, 4], strides = [1, 1]} : vector<64x12xf32> to vector<64x4xf32>
    %837 = arith.mulf %826, %836 : vector<64x4xf32>
    %838 = arith.addf %835, %837 : vector<64x4xf32>
    %839 = math.tanh %838 : vector<64x4xf32>
    %cst_177 = arith.constant 1.000000e+00 : f32
    %840 = vector.broadcast %cst_177 : f32 to vector<64x4xf32>
    %841 = arith.subf %840, %834 : vector<64x4xf32>
    %842 = arith.mulf %841, %839 : vector<64x4xf32>
    %843 = arith.mulf %834, %815 : vector<64x4xf32>
    %844 = arith.addf %842, %843 : vector<64x4xf32>
    %c64_178 = arith.constant 64 : index
    %c0_179 = arith.constant 0 : index
    %845 = vector.load %arg19[%c64_178, %c0_179] : memref<192x12xf32, #tpu.memory_space<vmem>>, vector<64x12xf32>
    %cst_180 = arith.constant dense<0.000000e+00> : vector<64x12xf32>
    %846 = tpu.matmul %844, %811, %cst_180 {dimension_numbers = #tpu.dot_dimension_numbers<[1], [0], [0], [1], [0, 0, 1, 1], [], []>} : vector<64x4xf32>, vector<4x12xf32>, vector<64x12xf32> -> vector<64x12xf32>
    %847 = arith.addf %846, %814 : vector<64x12xf32>
    %848 = vector.extract_strided_slice %845 {offsets = [0, 0], sizes = [64, 4], strides = [1, 1]} : vector<64x12xf32> to vector<64x4xf32>
    %849 = vector.extract_strided_slice %847 {offsets = [0, 0], sizes = [64, 4], strides = [1, 1]} : vector<64x12xf32> to vector<64x4xf32>
    %850 = arith.addf %848, %849 : vector<64x4xf32>
    %851 = arith.negf %850 : vector<64x4xf32>
    %852 = math.exp %851 : vector<64x4xf32>
    %cst_181 = arith.constant 1.000000e+00 : f32
    %853 = vector.broadcast %cst_181 : f32 to vector<64x4xf32>
    %854 = arith.addf %853, %852 : vector<64x4xf32>
    %855 = arith.divf %853, %854 : vector<64x4xf32>
    %856 = vector.extract_strided_slice %845 {offsets = [0, 4], sizes = [64, 4], strides = [1, 1]} : vector<64x12xf32> to vector<64x4xf32>
    %857 = vector.extract_strided_slice %847 {offsets = [0, 4], sizes = [64, 4], strides = [1, 1]} : vector<64x12xf32> to vector<64x4xf32>
    %858 = arith.addf %856, %857 : vector<64x4xf32>
    %859 = arith.negf %858 : vector<64x4xf32>
    %860 = math.exp %859 : vector<64x4xf32>
    %cst_182 = arith.constant 1.000000e+00 : f32
    %861 = vector.broadcast %cst_182 : f32 to vector<64x4xf32>
    %862 = arith.addf %861, %860 : vector<64x4xf32>
    %863 = arith.divf %861, %862 : vector<64x4xf32>
    %864 = vector.extract_strided_slice %845 {offsets = [0, 8], sizes = [64, 4], strides = [1, 1]} : vector<64x12xf32> to vector<64x4xf32>
    %865 = vector.extract_strided_slice %847 {offsets = [0, 8], sizes = [64, 4], strides = [1, 1]} : vector<64x12xf32> to vector<64x4xf32>
    %866 = arith.mulf %855, %865 : vector<64x4xf32>
    %867 = arith.addf %864, %866 : vector<64x4xf32>
    %868 = math.tanh %867 : vector<64x4xf32>
    %cst_183 = arith.constant 1.000000e+00 : f32
    %869 = vector.broadcast %cst_183 : f32 to vector<64x4xf32>
    %870 = arith.subf %869, %863 : vector<64x4xf32>
    %871 = arith.mulf %870, %868 : vector<64x4xf32>
    %872 = arith.mulf %863, %844 : vector<64x4xf32>
    %873 = arith.addf %871, %872 : vector<64x4xf32>
    %c128_184 = arith.constant 128 : index
    %c0_185 = arith.constant 0 : index
    %874 = vector.load %arg19[%c128_184, %c0_185] : memref<192x12xf32, #tpu.memory_space<vmem>>, vector<64x12xf32>
    %cst_186 = arith.constant dense<0.000000e+00> : vector<64x12xf32>
    %875 = tpu.matmul %873, %811, %cst_186 {dimension_numbers = #tpu.dot_dimension_numbers<[1], [0], [0], [1], [0, 0, 1, 1], [], []>} : vector<64x4xf32>, vector<4x12xf32>, vector<64x12xf32> -> vector<64x12xf32>
    %876 = arith.addf %875, %814 : vector<64x12xf32>
    %877 = vector.extract_strided_slice %874 {offsets = [0, 0], sizes = [64, 4], strides = [1, 1]} : vector<64x12xf32> to vector<64x4xf32>
    %878 = vector.extract_strided_slice %876 {offsets = [0, 0], sizes = [64, 4], strides = [1, 1]} : vector<64x12xf32> to vector<64x4xf32>
    %879 = arith.addf %877, %878 : vector<64x4xf32>
    %880 = arith.negf %879 : vector<64x4xf32>
    %881 = math.exp %880 : vector<64x4xf32>
    %cst_187 = arith.constant 1.000000e+00 : f32
    %882 = vector.broadcast %cst_187 : f32 to vector<64x4xf32>
    %883 = arith.addf %882, %881 : vector<64x4xf32>
    %884 = arith.divf %882, %883 : vector<64x4xf32>
    %885 = vector.extract_strided_slice %874 {offsets = [0, 4], sizes = [64, 4], strides = [1, 1]} : vector<64x12xf32> to vector<64x4xf32>
    %886 = vector.extract_strided_slice %876 {offsets = [0, 4], sizes = [64, 4], strides = [1, 1]} : vector<64x12xf32> to vector<64x4xf32>
    %887 = arith.addf %885, %886 : vector<64x4xf32>
    %888 = arith.negf %887 : vector<64x4xf32>
    %889 = math.exp %888 : vector<64x4xf32>
    %cst_188 = arith.constant 1.000000e+00 : f32
    %890 = vector.broadcast %cst_188 : f32 to vector<64x4xf32>
    %891 = arith.addf %890, %889 : vector<64x4xf32>
    %892 = arith.divf %890, %891 : vector<64x4xf32>
    %893 = vector.extract_strided_slice %874 {offsets = [0, 8], sizes = [64, 4], strides = [1, 1]} : vector<64x12xf32> to vector<64x4xf32>
    %894 = vector.extract_strided_slice %876 {offsets = [0, 8], sizes = [64, 4], strides = [1, 1]} : vector<64x12xf32> to vector<64x4xf32>
    %895 = arith.mulf %884, %894 : vector<64x4xf32>
    %896 = arith.addf %893, %895 : vector<64x4xf32>
    %897 = math.tanh %896 : vector<64x4xf32>
    %cst_189 = arith.constant 1.000000e+00 : f32
    %898 = vector.broadcast %cst_189 : f32 to vector<64x4xf32>
    %899 = arith.subf %898, %892 : vector<64x4xf32>
    %900 = arith.mulf %899, %897 : vector<64x4xf32>
    %901 = arith.mulf %892, %873 : vector<64x4xf32>
    %902 = arith.addf %900, %901 : vector<64x4xf32>
    %903 = vector.extract_strided_slice %902 {offsets = [0, 0], sizes = [8, 4], strides = [1, 1]} : vector<64x4xf32> to vector<8x4xf32>
    %904 = vector.extract_strided_slice %902 {offsets = [8, 0], sizes = [8, 4], strides = [1, 1]} : vector<64x4xf32> to vector<8x4xf32>
    %905 = vector.extract_strided_slice %902 {offsets = [16, 0], sizes = [8, 4], strides = [1, 1]} : vector<64x4xf32> to vector<8x4xf32>
    %906 = vector.extract_strided_slice %902 {offsets = [24, 0], sizes = [8, 4], strides = [1, 1]} : vector<64x4xf32> to vector<8x4xf32>
    %907 = vector.extract_strided_slice %902 {offsets = [32, 0], sizes = [8, 4], strides = [1, 1]} : vector<64x4xf32> to vector<8x4xf32>
    %908 = vector.extract_strided_slice %902 {offsets = [40, 0], sizes = [8, 4], strides = [1, 1]} : vector<64x4xf32> to vector<8x4xf32>
    %909 = vector.extract_strided_slice %902 {offsets = [48, 0], sizes = [8, 4], strides = [1, 1]} : vector<64x4xf32> to vector<8x4xf32>
    %910 = vector.extract_strided_slice %902 {offsets = [56, 0], sizes = [8, 4], strides = [1, 1]} : vector<64x4xf32> to vector<8x4xf32>
    %911 = tpu.concatenate %810, %903, %904, %905, %906, %907, %908, %909, %910 in 1 : vector<8x32xf32>, vector<8x4xf32>, vector<8x4xf32>, vector<8x4xf32>, vector<8x4xf32>, vector<8x4xf32>, vector<8x4xf32>, vector<8x4xf32>, vector<8x4xf32> -> vector<8x64xf32>
    %c0_190 = arith.constant 0 : index
    %c0_191 = arith.constant 0 : index
    %912 = vector.load %arg12[%c0_190, %c0_191] : memref<64x4xf32, #tpu.memory_space<vmem>>, vector<64x4xf32>
    %cst_192 = arith.constant dense<0.000000e+00> : vector<8x4xf32>
    %913 = tpu.matmul %911, %912, %cst_192 {dimension_numbers = #tpu.dot_dimension_numbers<[1], [0], [0], [1], [0, 0, 1, 1], [], []>} : vector<8x64xf32>, vector<64x4xf32>, vector<8x4xf32> -> vector<8x4xf32>
    %c0_193 = arith.constant 0 : index
    %c0_194 = arith.constant 0 : index
    %914 = vector.load %arg13[%c0_193, %c0_194] : memref<1x4xf32, #tpu.memory_space<vmem>>, vector<1x4xf32>
    %915 = vector.broadcast %914 : vector<1x4xf32> to vector<8x4xf32>
    %916 = arith.addf %913, %915 : vector<8x4xf32>
    %c0_195 = arith.constant 0 : index
    %c0_196 = arith.constant 0 : index
    %c0_197 = arith.constant 0 : index
    %917 = vector.load %arg0[%c0_195, %c0_196, %c0_197] : memref<8x8x4xf32, #tpu.memory_space<vmem>>, vector<8x8x4xf32>
    %c0_198 = arith.constant 0 : index
    %c0_199 = arith.constant 0 : index
    %c0_200 = arith.constant 0 : index
    %918 = vector.load %arg14[%c0_198, %c0_199, %c0_200] : memref<1x8x1xf32, #tpu.memory_space<vmem>>, vector<1x8x1xf32>
    %919 = vector.broadcast %918 : vector<1x8x1xf32> to vector<8x8x4xf32>
    %920 = arith.mulf %917, %919 : vector<8x8x4xf32>
    %cst_201 = arith.constant dense<0.000000e+00> : vector<8x4xf32>
    %921 = vector.multi_reduction <add>, %920, %cst_201 [1] : vector<8x8x4xf32> to vector<8x4xf32>
    %c0_202 = arith.constant 0 : index
    %c0_203 = arith.constant 0 : index
    %922 = vector.load %arg15[%c0_202, %c0_203] : memref<1x1xf32, #tpu.memory_space<vmem>>, vector<1x1xf32>
    %923 = vector.broadcast %922 : vector<1x1xf32> to vector<8x4xf32>
    %924 = arith.addf %921, %923 : vector<8x4xf32>
    %925 = arith.addf %916, %924 : vector<8x4xf32>
    %926 = arith.negf %925 : vector<8x4xf32>
    %927 = math.exp %926 : vector<8x4xf32>
    %cst_204 = arith.constant 1.000000e+00 : f32
    %928 = vector.broadcast %cst_204 : f32 to vector<8x4xf32>
    %929 = arith.addf %928, %927 : vector<8x4xf32>
    %930 = arith.divf %928, %929 : vector<8x4xf32>
    %c0_205 = arith.constant 0 : index
    %c0_206 = arith.constant 0 : index
    %931 = vector.load %arg16[%c0_205, %c0_206] : memref<8x4xf32, #tpu.memory_space<vmem>>, vector<8x4xf32>
    tpu.vector_store %arg16[%c0_205, %c0_206], %930 {strides = array<i32>} : memref<8x4xf32, #tpu.memory_space<vmem>>, vector<8x4xf32>,
    return
  }
}

</mosaic_0001>

<bundles_post_ra>
// kernel: lstnet_forward.1
= control target key start
LH: loop header
LB: loop body
LE: loop exit
PB: predicated region body
PF: predicated region fallthrough
CT: control target
= control target key end

     0   :  { %v6706_v0 = vmov 0.0|0.0   ;;  %vm6707_vm0 = vmmov 0   ;;  %v6708_v3 = vmov 0.0   ;;  %vm92_vm1 = vcmask 195584   ;;  %s6709_s19 = smov 64   ;;  %s6711_s28 = smov 120   ;;  %s8249_s2 = inlined_call_operand.vmem [shape: f32[24,16], index: 2, kind: input, shape index: {}]   ;;  %s8250_s6 = inlined_call_operand.vmem [shape: f32[32,96], index: 6, kind: input, shape index: {}]   ;;  %s8251_s1 = inlined_call_operand.vmem [shape: f32[216,24], index: 1, kind: input, shape index: {}]   ;;  %s8252_s4 = inlined_call_operand.vmem [shape: f32[16,96], index: 4, kind: input, shape index: {}]   ;;  %s8253_s8 = inlined_call_operand.vmem [shape: f32[16,12], index: 8, kind: input, shape index: {}]   ;;  %s8254_s3 = inlined_call_operand.vmem [shape: f32[1,16], index: 3, kind: input, shape index: {}]   ;;  %s8255_s7 = inlined_call_operand.vmem [shape: f32[1,96], index: 7, kind: input, shape index: {}]   ;;  %s8256_s5 = inlined_call_operand.vmem [shape: f32[1,96], index: 5, kind: input, shape index: {}]   ;;  %s8257_s9 = inlined_call_operand.vmem [shape: f32[1,12], index: 9, kind: input, shape index: {}]   ;;  %s8258_s10 = inlined_call_operand.vmem [shape: f32[4,12], index: 10, kind: input, shape index: {}]   ;;  %s8259_s11 = inlined_call_operand.vmem [shape: f32[1,12], index: 11, kind: input, shape index: {}]   ;;  %s8260_s12 = inlined_call_operand.vmem [shape: f32[64,4], index: 12, kind: input, shape index: {}]   ;;  %s8261_s15 = inlined_call_operand.<no memory space> [shape: f32[1,1], index: 15, kind: input, shape index: {}]   ;;  %s8262_s14 = inlined_call_operand.vmem [shape: f32[1,8,1], index: 14, kind: input, shape index: {}]   ;;  %s8263_s0 = inlined_call_operand.vmem [shape: f32[8,8,4], index: 0, kind: input, shape index: {}]   ;;  %s8264_s13 = inlined_call_operand.vmem [shape: f32[1,4], index: 13, kind: input, shape index: {}]   ;;  %s8265_s16 = inlined_call_operand.vmem [shape: f32[8,4], index: 16, kind: output, shape index: {}]  }
   0x1   :  { %8267 = sst [smem:[#allocation6_spill]] %s8249_s2  ;;  %6191 = vmatprep.subr.bf16.mxu0 %v6706_v0  ;;  %5627 = vmatprep.mubr.msk.f32.mxu0 %vm6707_vm0, %v6708_v3  ;;  %v1089_v6 = vld [vmem:[%s8250_s6] sm:$0xff]  ;;  %v1090_v7 = vld [vmem:[%s8250_s6 + $0x8] sm:$0xff]  ;;  %v1091_v11 = vld [vmem:[%s8250_s6 + $0x10] sm:$0xff]  ;;  %vm401_vm2 = vcmask 130048   ;;  %vm746_vm3 = vcmask 785408  }
   0x2   :  { %s8268_s23 = sld [smem:[#allocation6_spill]]  ;;  %6194 = vmatprep.subr.bf16.mxu1 %v6706_v0  ;;  %5712 = vmatprep.mubr.msk.f32.mxu1 %vm6707_vm0, %v6708_v3  ;;  %v55_v8 = vld [vmem:[%s8251_s1] sm:$0xff]  ;;  %v6833_v9 = vpack.c.bf16 %v1090_v7, %v1089_v6  ;;  %v56_v10 = vld [vmem:[%s8251_s1 + $0x8] sm:$0xff]  ;;  %v1092_v12 = vld [vmem:[%s8250_s6 + $0x18] sm:$0xff]  ;;  %vm1064_vm4 = vcmask 97280   ;;  %vm1101_vm5 = vcmask 261120  }
   0x3   :  { %v6850_v13 = vpack.c.bf16 %v1092_v12, %v1091_v11  ;;  %v57_v14 = vld [vmem:[%s8251_s1 + $0x10] sm:$0xff]  ;;  %v58_v15 = vld [vmem:[%s8251_s1 + $0x18] sm:$0xff]  ;;  %v59_v16 = vld [vmem:[%s8251_s1 + $0x20] sm:$0xff]  ;;  %vm3872_vm6 = vcmask 1043456   ;;  %vm3869_vm7 = vcmask 31744   ;;  %s6714_s25 = smov 32  }
   0x4   :  { %v60_v17 = vld [vmem:[%s8251_s1 + $0x28] sm:$0xff]  ;;  %v61_v18 = vld [vmem:[%s8251_s1 + $0x30] sm:$0xff]  ;;  %v62_v19 = vld [vmem:[%s8251_s1 + $0x38] sm:$0xff]  ;;  %s6717_s6 = smov 40   ;;  %s6718_s27 = smov 36   ;;  %vm4948_vm8 = vcmask 293888  }
   0x5   :  { %v63_v20 = vld [vmem:[%s8251_s1 + $0x40] sm:$0xff]  ;;  %v64_v21 = vld [vmem:[%s8251_s1 + $0x48] sm:$0xff]  ;;  %v65_v22 = vld [vmem:[%s8251_s1 + $0x50] sm:$0xff]  ;;  %vm4950_vm9 = vcmask 326656   ;;  %vm4952_vm10 = vcmask 359424   ;;  %vm4954_vm11 = vcmask 392192  }
   0x6   :  { %v66_v23 = vld [vmem:[%s8251_s1 + $0x58] sm:$0xff]  ;;  %v67_v24 = vld [vmem:[%s8251_s1 + $0x60] sm:$0xff]  ;;  %v68_v25 = vld [vmem:[%s8251_s1 + $0x68] sm:$0xff]  ;;  %vm4956_vm12 = vcmask 424960   ;;  %vm4958_vm13 = vcmask 457728   ;;  %vm4960_vm14 = vcmask 490496  }
   0x7   :  { %v69_v26 = vld [vmem:[%s8251_s1 + $0x70] sm:$0xff]  ;;  %v70_v27 = vld [vmem:[%s8251_s1 + $0x78] sm:$0xff]  ;;  %v71_v28 = vld [vmem:[%s8251_s1 + $0x80] sm:$0xff]  ;;  %vm4977_vm15 = vcmask 523264  }
   0x8   :  { %v82_v1 = vld [vmem:[%s8268_s23] sm:$0xff]  ;;  %v83_v2 = vld [vmem:[%s8268_s23 + $0x8] sm:$0xff]  ;;  %v84_v5 = vld [vmem:[%s8268_s23 + $0x10] sm:$0xff] }
   0x9   :  { %v6192_v4 = vpack.c.bf16 %v83_v2, %v82_v1  ;;  %v72_v29 = vld [vmem:[%s8251_s1 + $0x88] sm:$0xff]  ;;  %v73_v30 = vld [vmem:[%s8251_s1 + $0x90] sm:$0xff]  ;;  %v74_v31 = vld [vmem:[%s8251_s1 + $0x98] sm:$0xff] }
   0xa   :  { %v75_v32 = vld [vmem:[%s8251_s1 + $0xa0] sm:$0xff]  ;;  %v76_v33 = vld [vmem:[%s8251_s1 + $0xa8] sm:$0xff]  ;;  %v77_v34 = vld [vmem:[%s8251_s1 + $0xb0] sm:$0xff] }
   0xb   :  { %6193 = vmatpush3.bf16.msra.mxu0 %v6192_v4  ;;  %v78_v35 = vld [vmem:[%s8251_s1 + $0xb8] sm:$0xff]  ;;  %v456_v36 = vld [vmem:[%s8252_s4] sm:$0xff]  ;;  %v457_v37 = vld [vmem:[%s8252_s4 + $0x8] sm:$0xff]  ;;  %s6720_s4 = smov 44  }
   0xc   :  { %5625 = vmatprep.subr.mxu0 %v6708_v3  ;;  %v6195_v38 = vpack.c.bf16 %v457_v37, %v456_v36  ;;  %v79_v39 = vld [vmem:[%s8251_s1 + $0xc0] sm:$0xff]  ;;  %v80_v40 = vld [vmem:[%s8251_s1 + $0xc8] sm:$0xff]  ;;  %v81_v41 = vld [vmem:[%s8251_s1 + $0xd0] sm:$0xff] }
   0xd   :  { %v798_v42 = vld [vmem:[%s8253_s8] sm:$0xff]  ;;  %v799_v43 = vld [vmem:[%s8253_s8 + $0x8] sm:$0xff] }
   0xe   :  { %6196 = vmatpush3.bf16.msra.mxu1 %v6195_v38  ;;  %v6197_v44 = vpack.c.bf16 %v799_v43, %v798_v42  ;;  %v7029_v45 = vld [vmem:[%s8254_s3] ss:$0 sm:$0xff] }
   0xf   :  { %5626 = vmatpush3.msra.mxu0 %v84_v5 }
  0x10   :  { %5628 = vmatmul.mubr.msk.f32.vlgmr.msra.gmra.mrb[0].mxu0 %vm92_vm1, %v55_v8  ;;  %6201 = vmatprep.subr.bf16.mxu0 %v6706_v0 }
  0x11   :  { %5630 = vmatprep.mubr.msk.f32.mxu0 %vm6707_vm0, %v6708_v3  ;;  %6203 = vmatpush3.bf16.msra.mxu0 %v6833_v9 }
  0x12   :  { %6204 = vmatprep.subr.bf16.mxu0 %v6706_v0  ;;  %6198 = vmatprep.subr.bf16.mxu1 %v6197_v44 }
  0x14   :  { %5631 = vmatmul.mubr.msk.f32.gmra.mrb[2].mxu0 %vm92_vm1, %v56_v10 }
  0x15   :  { %5633 = vmatprep.mubr.msk.f32.mxu0 %vm6707_vm0, %v6708_v3  ;;  %6206 = vmatpush3.bf16.msra.mxu0 %v6850_v13 }
  0x16   :  { %6207 = vmatprep.subr.bf16.mxu0 %v6706_v0 }
  0x18   :  { %5634 = vmatmul.mubr.msk.f32.gmra.mrb[4].mxu0 %vm92_vm1, %v57_v14 }
  0x19   :  { %5636 = vmatprep.mubr.msk.f32.mxu0 %vm6707_vm0, %v6708_v3 }
  0x1c   :  { %5637 = vmatmul.mubr.msk.f32.gmra.mrb[6].mxu0 %vm92_vm1, %v58_v15 }
  0x1d   :  { %5639 = vmatprep.mubr.msk.f32.mxu0 %vm6707_vm0, %v6708_v3 }
  0x20   :  { %5640 = vmatmul.mubr.msk.f32.gmra.mrb[8].mxu0 %vm92_vm1, %v59_v16 }
  0x21   :  { %5642 = vmatprep.mubr.msk.f32.mxu0 %vm6707_vm0, %v6708_v3 }
  0x24   :  { %5643 = vmatmul.mubr.msk.f32.gmra.mrb[10].mxu0 %vm92_vm1, %v60_v17 }
  0x25   :  { %5645 = vmatprep.mubr.msk.f32.mxu0 %vm6707_vm0, %v6708_v3 }
  0x28   :  { %5646 = vmatmul.mubr.msk.f32.gmra.mrb[12].mxu0 %vm92_vm1, %v61_v18 }
  0x29   :  { %5648 = vmatprep.mubr.msk.f32.mxu0 %vm6707_vm0, %v6708_v3 }
  0x2c   :  { %5649 = vmatmul.mubr.msk.f32.gmra.mrb[14].mxu0 %vm92_vm1, %v62_v19 }
  0x2d   :  { %5651 = vmatprep.mubr.msk.f32.mxu0 %vm6707_vm0, %v6708_v3 }
  0x30   :  { %5652 = vmatmul.mubr.msk.f32.gmra.mrb[16].mxu0 %vm92_vm1, %v63_v20 }
  0x31   :  { %5654 = vmatprep.mubr.msk.f32.mxu0 %vm6707_vm0, %v6708_v3 }
  0x34   :  { %5655 = vmatmul.mubr.msk.f32.gmra.mrb[18].mxu0 %vm92_vm1, %v64_v21 }
  0x35   :  { %5657 = vmatprep.mubr.msk.f32.mxu0 %vm6707_vm0, %v6708_v3 }
  0x38   :  { %5658 = vmatmul.mubr.msk.f32.gmra.mrb[20].mxu0 %vm92_vm1, %v65_v22 }
  0x39   :  { %5660 = vmatprep.mubr.msk.f32.mxu0 %vm6707_vm0, %v6708_v3 }
  0x3c   :  { %5661 = vmatmul.mubr.msk.f32.gmra.mrb[22].mxu0 %vm92_vm1, %v66_v23 }
  0x3d   :  { %5663 = vmatprep.mubr.msk.f32.mxu0 %vm6707_vm0, %v6708_v3 }
  0x40   :  { %5664 = vmatmul.mubr.msk.f32.gmra.mrb[24].mxu0 %vm92_vm1, %v67_v24 }
  0x41   :  { %5666 = vmatprep.mubr.msk.f32.mxu0 %vm6707_vm0, %v6708_v3 }
  0x44   :  { %5667 = vmatmul.mubr.msk.f32.gmra.mrb[26].mxu0 %vm92_vm1, %v68_v25 }
  0x45   :  { %5669 = vmatprep.mubr.msk.f32.mxu0 %vm6707_vm0, %v6708_v3 }
  0x48   :  { %5670 = vmatmul.mubr.msk.f32.gmra.mrb[28].mxu0 %vm92_vm1, %v69_v26 }
  0x49   :  { %5672 = vmatprep.mubr.msk.f32.mxu0 %vm6707_vm0, %v6708_v3 }
  0x4c   :  { %5673 = vmatmul.mubr.msk.f32.gmra.mrb[30].mxu0 %vm92_vm1, %v70_v27 }
  0x4d   :  { %5675 = vmatprep.mubr.msk.f32.mxu0 %vm6707_vm0, %v6708_v3 }
  0x50   :  { %5676 = vmatmul.mubr.msk.f32.gmra.mrb[32].mxu0 %vm92_vm1, %v71_v28 }
  0x51   :  { %5678 = vmatprep.mubr.msk.f32.mxu0 %vm6707_vm0, %v6708_v3 }
  0x54   :  { %5679 = vmatmul.mubr.msk.f32.gmra.mrb[34].mxu0 %vm92_vm1, %v72_v29 }
  0x55   :  { %5681 = vmatprep.mubr.msk.f32.mxu0 %vm6707_vm0, %v6708_v3 }
  0x58   :  { %5682 = vmatmul.mubr.msk.f32.gmra.mrb[36].mxu0 %vm92_vm1, %v73_v30 }
  0x59   :  { %5684 = vmatprep.mubr.msk.f32.mxu0 %vm6707_vm0, %v6708_v3 }
  0x5c   :  { %5685 = vmatmul.mubr.msk.f32.gmra.mrb[38].mxu0 %vm92_vm1, %v74_v31 }
  0x5d   :  { %5687 = vmatprep.mubr.msk.f32.mxu0 %vm6707_vm0, %v6708_v3 }
  0x60   :  { %5688 = vmatmul.mubr.msk.f32.gmra.mrb[40].mxu0 %vm92_vm1, %v75_v32 }
  0x61   :  { %5690 = vmatprep.mubr.msk.f32.mxu0 %vm6707_vm0, %v6708_v3 }
  0x64   :  { %5691 = vmatmul.mubr.msk.f32.gmra.mrb[42].mxu0 %vm92_vm1, %v76_v33 }
  0x65   :  { %5693 = vmatprep.mubr.msk.f32.mxu0 %vm6707_vm0, %v6708_v3 }
  0x68   :  { %5694 = vmatmul.mubr.msk.f32.gmra.mrb[44].mxu0 %vm92_vm1, %v77_v34 }
  0x69   :  { %5696 = vmatprep.mubr.msk.f32.mxu0 %vm6707_vm0, %v6708_v3 }
  0x6c   :  { %5697 = vmatmul.mubr.msk.f32.gmra.mrb[46].mxu0 %vm92_vm1, %v78_v35 }
  0x6d   :  { %5699 = vmatprep.mubr.msk.f32.mxu0 %vm6707_vm0, %v6708_v3 }
  0x70   :  { %5700 = vmatmul.mubr.msk.f32.gmra.mrb[48].mxu0 %vm92_vm1, %v79_v39 }
  0x71   :  { %5702 = vmatprep.mubr.msk.f32.mxu0 %vm6707_vm0, %v6708_v3 }
  0x74   :  { %5703 = vmatmul.mubr.msk.f32.gmra.mrb[50].mxu0 %vm92_vm1, %v80_v40 }
  0x75   :  { %5705 = vmatprep.mubr.msk.f32.mxu0 %vm6707_vm0, %v6708_v3 }
  0x78   :  { %5706 = vmatmul.mubr.msk.f32.gmra.mrb[52].mxu0 %vm92_vm1, %v81_v41  ;;  %vm5157_vm1 = vcmask 1042434  }
  0x79   :  { %5841 = vmatprep.mubr.msk.f32.mxu0 %vm6707_vm0, %v6708_v3 }
  0x7c   :  { %5842 = vmatmul.mubr.f32.vlgmr.msra.gmra.mrb[54].mxu0 %v6708_v3 }
  0x7d   :  { %6209 = vmatpush3.bf16.msra.mxu0 %v6833_v9  ;;  %5852 = vmatprep.mubr.msk.f32.mxu0 %vm6707_vm0, %v6708_v3 }
  0x7e   :  { %6210 = vmatprep.subr.bf16.mxu0 %v6706_v0 }
  0x81   :  { %6212 = vmatpush3.bf16.msra.mxu0 %v6850_v13 }
  0x82   :  { %6213 = vmatprep.subr.bf16.mxu0 %v6706_v0 }
  0xe3   :  { %v240_v46 = vpop.f32.mrb[0].mxu0 }
  0xe4   :  { %v241_v47 = vadd.f32 %v7029_v45, %v240_v46  ;;  %v5629_v48 = vpop.f32.mrb[1].mxu0 }
  0xe6   :  { %v374_v49 = vmax.f32 %v241_v47, 0.0 }
  0xe7   :  { %v245_v50 = vpop.f32.mrb[2].mxu0 }
  0xe8   :  { %402 = vst.msk [vmem:[#allocation2] sm:$0xff] %vm401_vm2, %v374_v49  ;;  %v246_v51 = vadd.f32 %v7029_v45, %v245_v50  ;;  %v5632_v52 = vpop.f32.mrb[3].mxu0 }
  0xea   :  { %v375_v53 = vmax.f32 %v246_v51, 0.0 }
  0xeb   :  { %v250_v54 = vpop.f32.mrb[4].mxu0 }
  0xec   :  { %403 = vst.msk [vmem:[#allocation2 + $0x8] sm:$0xff] %vm401_vm2, %v375_v53  ;;  %v251_v55 = vadd.f32 %v7029_v45, %v250_v54  ;;  %v5635_v56 = vpop.f32.mrb[5].mxu0 }
  0xee   :  { %v376_v57 = vmax.f32 %v251_v55, 0.0 }
  0xef   :  { %v255_v58 = vpop.f32.mrb[6].mxu0  ;;  %v429_v59 = vld [vmem:[#allocation2] sm:$0xff] }
  0xf0   :  { %404 = vst.msk [vmem:[#allocation2 + $0x10] sm:$0xff] %vm401_vm2, %v376_v57  ;;  %v256_v60 = vadd.f32 %v7029_v45, %v255_v58  ;;  %5713 = vmatmul.mubr.msk.f32.vlgmr.msra.gmra.mrb[0].mxu1 %vm401_vm2, %v429_v59  ;;  %v5638_v61 = vpop.f32.mrb[7].mxu0 }
  0xf1   :  { %5715 = vmatprep.mubr.msk.f32.mxu1 %vm6707_vm0, %v6708_v3  ;;  %6200 = vmatpush3.bf16.msra.mxu1 %v6197_v44 }
  0xf2   :  { %v377_v62 = vmax.f32 %v256_v60, 0.0  ;;  %6237 = vmatprep.subr.bf16.mxu1 %v6706_v0 }
  0xf3   :  { %v260_v63 = vpop.f32.mrb[8].mxu0  ;;  %v430_v1 = vld [vmem:[#allocation2 + $0x8] sm:$0xff] }
  0xf4   :  { %405 = vst.msk [vmem:[#allocation2 + $0x18] sm:$0xff] %vm401_vm2, %v377_v62  ;;  %v261_v2 = vadd.f32 %v7029_v45, %v260_v63  ;;  %5716 = vmatmul.mubr.msk.f32.gmra.mrb[2].mxu1 %vm401_vm2, %v430_v1  ;;  %v5641_v4 = vpop.f32.mrb[9].mxu0 }
  0xf5   :  { %5718 = vmatprep.mubr.msk.f32.mxu1 %vm6707_vm0, %v6708_v3 }
  0xf6   :  { %v378_v5 = vmax.f32 %v261_v2, 0.0 }
  0xf7   :  { %v265_v6 = vpop.f32.mrb[10].mxu0  ;;  %v431_v7 = vld [vmem:[#allocation2 + $0x10] sm:$0xff] }
  0xf8   :  { %406 = vst.msk [vmem:[#allocation2 + $0x20] sm:$0xff] %vm401_vm2, %v378_v5  ;;  %v266_v8 = vadd.f32 %v7029_v45, %v265_v6  ;;  %5719 = vmatmul.mubr.msk.f32.gmra.mrb[4].mxu1 %vm401_vm2, %v431_v7  ;;  %v5644_v10 = vpop.f32.mrb[11].mxu0 }
  0xf9   :  { %5721 = vmatprep.mubr.msk.f32.mxu1 %vm6707_vm0, %v6708_v3 }
  0xfa   :  { %v379_v11 = vmax.f32 %v266_v8, 0.0 }
  0xfb   :  { %v270_v12 = vpop.f32.mrb[12].mxu0  ;;  %v7052_v14 = vld [vmem:[#allocation2 + $0x18] sm:$0xff] }
  0xfc   :  { %407 = vst.msk [vmem:[#allocation2 + $0x28] sm:$0xff] %vm401_vm2, %v379_v11  ;;  %v271_v15 = vadd.f32 %v7029_v45, %v270_v12  ;;  %5722 = vmatmul.mubr.msk.f32.gmra.mrb[6].mxu1 %vm401_vm2, %v7052_v14  ;;  %v5647_v16 = vpop.f32.mrb[13].mxu0 }
  0xfd   :  { %5724 = vmatprep.mubr.msk.f32.mxu1 %vm6707_vm0, %v6708_v3 }
  0xfe   :  { %v380_v17 = vmax.f32 %v271_v15, 0.0 }
  0xff   :  { %v275_v18 = vpop.f32.mrb[14].mxu0  ;;  %v7060_v19 = vld [vmem:[#allocation2 + $0x20] sm:$0xff] }
 0x100   :  { %408 = vst.msk [vmem:[#allocation2 + $0x30] sm:$0xff] %vm401_vm2, %v380_v17  ;;  %v276_v20 = vadd.f32 %v7029_v45, %v275_v18  ;;  %5725 = vmatmul.mubr.msk.f32.gmra.mrb[8].mxu1 %vm401_vm2, %v7060_v19  ;;  %v5650_v21 = vpop.f32.mrb[15].mxu0 }
 0x101   :  { %5727 = vmatprep.mubr.msk.f32.mxu1 %vm6707_vm0, %v6708_v3 }
 0x102   :  { %v381_v22 = vmax.f32 %v276_v20, 0.0 }
 0x103   :  { %v280_v23 = vpop.f32.mrb[16].mxu0  ;;  %v7068_v24 = vld [vmem:[#allocation2 + $0x28] sm:$0xff] }
 0x104   :  { %409 = vst.msk [vmem:[#allocation2 + $0x38] sm:$0xff] %vm401_vm2, %v381_v22  ;;  %v281_v25 = vadd.f32 %v7029_v45, %v280_v23  ;;  %5728 = vmatmul.mubr.msk.f32.gmra.mrb[10].mxu1 %vm401_vm2, %v7068_v24  ;;  %v5653_v26 = vpop.f32.mrb[17].mxu0 }
 0x105   :  { %5730 = vmatprep.mubr.msk.f32.mxu1 %vm6707_vm0, %v6708_v3 }
 0x106   :  { %v382_v27 = vmax.f32 %v281_v25, 0.0 }
 0x107   :  { %v285_v28 = vpop.f32.mrb[18].mxu0  ;;  %v7076_v29 = vld [vmem:[#allocation2 + $0x30] sm:$0xff] }
 0x108   :  { %410 = vst.msk [vmem:[#allocation2 + $0x40] sm:$0xff] %vm401_vm2, %v382_v27  ;;  %v286_v30 = vadd.f32 %v7029_v45, %v285_v28  ;;  %5731 = vmatmul.mubr.msk.f32.gmra.mrb[12].mxu1 %vm401_vm2, %v7076_v29  ;;  %v5656_v31 = vpop.f32.mrb[19].mxu0 }
 0x109   :  { %5733 = vmatprep.mubr.msk.f32.mxu1 %vm6707_vm0, %v6708_v3 }
 0x10a   :  { %v383_v32 = vmax.f32 %v286_v30, 0.0 }
 0x10b   :  { %v290_v33 = vpop.f32.mrb[20].mxu0  ;;  %v7084_v34 = vld [vmem:[#allocation2 + $0x38] sm:$0xff] }
 0x10c   :  { %411 = vst.msk [vmem:[#allocation2 + $0x48] sm:$0xff] %vm401_vm2, %v383_v32  ;;  %v291_v35 = vadd.f32 %v7029_v45, %v290_v33  ;;  %5734 = vmatmul.mubr.msk.f32.gmra.mrb[14].mxu1 %vm401_vm2, %v7084_v34  ;;  %v5659_v36 = vpop.f32.mrb[21].mxu0 }
 0x10d   :  { %5736 = vmatprep.mubr.msk.f32.mxu1 %vm6707_vm0, %v6708_v3 }
 0x10e   :  { %v384_v37 = vmax.f32 %v291_v35, 0.0 }
 0x10f   :  { %v295_v38 = vpop.f32.mrb[22].mxu0  ;;  %v7092_v39 = vld [vmem:[#allocation2 + $0x40] sm:$0xff] }
 0x110   :  { %412 = vst.msk [vmem:[#allocation2 + $0x50] sm:$0xff] %vm401_vm2, %v384_v37  ;;  %v296_v40 = vadd.f32 %v7029_v45, %v295_v38  ;;  %5737 = vmatmul.mubr.msk.f32.gmra.mrb[16].mxu1 %vm401_vm2, %v7092_v39  ;;  %v5662_v41 = vpop.f32.mrb[23].mxu0 }
 0x111   :  { %5739 = vmatprep.mubr.msk.f32.mxu1 %vm6707_vm0, %v6708_v3 }
 0x112   :  { %v385_v42 = vmax.f32 %v296_v40, 0.0 }
 0x113   :  { %v300_v43 = vpop.f32.mrb[24].mxu0  ;;  %v7100_v44 = vld [vmem:[#allocation2 + $0x48] sm:$0xff] }
 0x114   :  { %413 = vst.msk [vmem:[#allocation2 + $0x58] sm:$0xff] %vm401_vm2, %v385_v42  ;;  %v301_v46 = vadd.f32 %v7029_v45, %v300_v43  ;;  %5740 = vmatmul.mubr.msk.f32.gmra.mrb[18].mxu1 %vm401_vm2, %v7100_v44  ;;  %v5665_v47 = vpop.f32.mrb[25].mxu0 }
 0x115   :  { %5742 = vmatprep.mubr.msk.f32.mxu1 %vm6707_vm0, %v6708_v3 }
 0x116   :  { %v386_v48 = vmax.f32 %v301_v46, 0.0 }
 0x117   :  { %v305_v49 = vpop.f32.mrb[26].mxu0  ;;  %v7108_v50 = vld [vmem:[#allocation2 + $0x50] sm:$0xff] }
 0x118   :  { %414 = vst.msk [vmem:[#allocation2 + $0x60] sm:$0xff] %vm401_vm2, %v386_v48  ;;  %v306_v51 = vadd.f32 %v7029_v45, %v305_v49  ;;  %5743 = vmatmul.mubr.msk.f32.gmra.mrb[20].mxu1 %vm401_vm2, %v7108_v50  ;;  %v5668_v52 = vpop.f32.mrb[27].mxu0 }
 0x119   :  { %5745 = vmatprep.mubr.msk.f32.mxu1 %vm6707_vm0, %v6708_v3 }
 0x11a   :  { %v387_v53 = vmax.f32 %v306_v51, 0.0 }
 0x11b   :  { %v310_v54 = vpop.f32.mrb[28].mxu0  ;;  %v7116_v55 = vld [vmem:[#allocation2 + $0x58] sm:$0xff] }
 0x11c   :  { %415 = vst.msk [vmem:[#allocation2 + $0x68] sm:$0xff] %vm401_vm2, %v387_v53  ;;  %v311_v56 = vadd.f32 %v7029_v45, %v310_v54  ;;  %5746 = vmatmul.mubr.msk.f32.gmra.mrb[22].mxu1 %vm401_vm2, %v7116_v55  ;;  %v5671_v57 = vpop.f32.mrb[29].mxu0 }
 0x11d   :  { %5748 = vmatprep.mubr.msk.f32.mxu1 %vm6707_vm0, %v6708_v3 }
 0x11e   :  { %v388_v58 = vmax.f32 %v311_v56, 0.0 }
 0x11f   :  { %v315_v59 = vpop.f32.mrb[30].mxu0  ;;  %v7124_v60 = vld [vmem:[#allocation2 + $0x60] sm:$0xff] }
 0x120   :  { %416 = vst.msk [vmem:[#allocation2 + $0x70] sm:$0xff] %vm401_vm2, %v388_v58  ;;  %v316_v61 = vadd.f32 %v7029_v45, %v315_v59  ;;  %5749 = vmatmul.mubr.msk.f32.gmra.mrb[24].mxu1 %vm401_vm2, %v7124_v60  ;;  %v5674_v62 = vpop.f32.mrb[31].mxu0 }
 0x121   :  { %5751 = vmatprep.mubr.msk.f32.mxu1 %vm6707_vm0, %v6708_v3 }
 0x122   :  { %v389_v63 = vmax.f32 %v316_v61, 0.0 }
 0x123   :  { %v320_v1 = vpop.f32.mrb[32].mxu0  ;;  %v7132_v2 = vld [vmem:[#allocation2 + $0x68] sm:$0xff] }
 0x124   :  { %417 = vst.msk [vmem:[#allocation2 + $0x78] sm:$0xff] %vm401_vm2, %v389_v63  ;;  %v321_v4 = vadd.f32 %v7029_v45, %v320_v1  ;;  %5752 = vmatmul.mubr.msk.f32.gmra.mrb[26].mxu1 %vm401_vm2, %v7132_v2  ;;  %v5677_v5 = vpop.f32.mrb[33].mxu0 }
 0x125   :  { %5754 = vmatprep.mubr.msk.f32.mxu1 %vm6707_vm0, %v6708_v3 }
 0x126   :  { %v390_v6 = vmax.f32 %v321_v4, 0.0 }
 0x127   :  { %v325_v7 = vpop.f32.mrb[34].mxu0  ;;  %v7140_v8 = vld [vmem:[#allocation2 + $0x70] sm:$0xff] }
 0x128   :  { %418 = vst.msk [vmem:[#allocation2 + $0x80] sm:$0xff] %vm401_vm2, %v390_v6  ;;  %v326_v10 = vadd.f32 %v7029_v45, %v325_v7  ;;  %5755 = vmatmul.mubr.msk.f32.gmra.mrb[28].mxu1 %vm401_vm2, %v7140_v8  ;;  %v5680_v11 = vpop.f32.mrb[35].mxu0 }
 0x129   :  { %5757 = vmatprep.mubr.msk.f32.mxu1 %vm6707_vm0, %v6708_v3 }
 0x12a   :  { %v391_v12 = vmax.f32 %v326_v10, 0.0  ;;  %v7214_v10 = vld [vmem:[%s8255_s7] ss:$0 sm:$0xff] }
 0x12b   :  { %v330_v15 = vpop.f32.mrb[36].mxu0  ;;  %v7148_v16 = vld [vmem:[#allocation2 + $0x78] sm:$0xff] }
 0x12c   :  { %419 = vst.msk [vmem:[#allocation2 + $0x88] sm:$0xff] %vm401_vm2, %v391_v12  ;;  %v331_v17 = vadd.f32 %v7029_v45, %v330_v15  ;;  %5758 = vmatmul.mubr.msk.f32.gmra.mrb[30].mxu1 %vm401_vm2, %v7148_v16  ;;  %v5683_v18 = vpop.f32.mrb[37].mxu0 }
 0x12d   :  { %5760 = vmatprep.mubr.msk.f32.mxu1 %vm6707_vm0, %v6708_v3 }
 0x12e   :  { %v392_v20 = vmax.f32 %v331_v17, 0.0 }
 0x12f   :  { %v335_v21 = vpop.f32.mrb[38].mxu0  ;;  %v7156_v22 = vld [vmem:[#allocation2 + $0x80] sm:$0xff] }
 0x130   :  { %420 = vst.msk [vmem:[#allocation2 + $0x90] sm:$0xff] %vm401_vm2, %v392_v20  ;;  %v336_v23 = vadd.f32 %v7029_v45, %v335_v21  ;;  %5761 = vmatmul.mubr.msk.f32.gmra.mrb[32].mxu1 %vm401_vm2, %v7156_v22  ;;  %v5686_v25 = vpop.f32.mrb[39].mxu0 }
 0x131   :  { %5763 = vmatprep.mubr.msk.f32.mxu1 %vm6707_vm0, %v6708_v3 }
 0x132   :  { %v393_v26 = vmax.f32 %v336_v23, 0.0 }
 0x133   :  { %v340_v27 = vpop.f32.mrb[40].mxu0  ;;  %v7164_v28 = vld [vmem:[#allocation2 + $0x88] sm:$0xff] }
 0x134   :  { %421 = vst.msk [vmem:[#allocation2 + $0x98] sm:$0xff] %vm401_vm2, %v393_v26  ;;  %v341_v30 = vadd.f32 %v7029_v45, %v340_v27  ;;  %5764 = vmatmul.mubr.msk.f32.gmra.mrb[34].mxu1 %vm401_vm2, %v7164_v28  ;;  %v5689_v31 = vpop.f32.mrb[41].mxu0 }
 0x135   :  { %5766 = vmatprep.mubr.msk.f32.mxu1 %vm6707_vm0, %v6708_v3 }
 0x136   :  { %v394_v32 = vmax.f32 %v341_v30, 0.0 }
 0x137   :  { %v345_v33 = vpop.f32.mrb[42].mxu0  ;;  %v7172_v35 = vld [vmem:[#allocation2 + $0x90] sm:$0xff] }
 0x138   :  { %422 = vst.msk [vmem:[#allocation2 + $0xa0] sm:$0xff] %vm401_vm2, %v394_v32  ;;  %v346_v36 = vadd.f32 %v7029_v45, %v345_v33  ;;  %5767 = vmatmul.mubr.msk.f32.gmra.mrb[36].mxu1 %vm401_vm2, %v7172_v35  ;;  %v5692_v37 = vpop.f32.mrb[43].mxu0 }
 0x139   :  { %5769 = vmatprep.mubr.msk.f32.mxu1 %vm6707_vm0, %v6708_v3 }
 0x13a   :  { %v395_v38 = vmax.f32 %v346_v36, 0.0 }
 0x13b   :  { %v350_v40 = vpop.f32.mrb[44].mxu0  ;;  %v7180_v41 = vld [vmem:[#allocation2 + $0x98] sm:$0xff] }
 0x13c   :  { %423 = vst.msk [vmem:[#allocation2 + $0xa8] sm:$0xff] %vm401_vm2, %v395_v38  ;;  %v351_v42 = vadd.f32 %v7029_v45, %v350_v40  ;;  %5770 = vmatmul.mubr.msk.f32.gmra.mrb[38].mxu1 %vm401_vm2, %v7180_v41  ;;  %v5695_v43 = vpop.f32.mrb[45].mxu0 }
 0x13d   :  { %5772 = vmatprep.mubr.msk.f32.mxu1 %vm6707_vm0, %v6708_v3 }
 0x13e   :  { %v396_v46 = vmax.f32 %v351_v42, 0.0 }
 0x13f   :  { %v355_v47 = vpop.f32.mrb[46].mxu0  ;;  %v7188_v48 = vld [vmem:[#allocation2 + $0xa0] sm:$0xff] }
 0x140   :  { %424 = vst.msk [vmem:[#allocation2 + $0xb0] sm:$0xff] %vm401_vm2, %v396_v46  ;;  %v356_v49 = vadd.f32 %v7029_v45, %v355_v47  ;;  %5773 = vmatmul.mubr.msk.f32.gmra.mrb[40].mxu1 %vm401_vm2, %v7188_v48  ;;  %v5698_v51 = vpop.f32.mrb[47].mxu0 }
 0x141   :  { %5775 = vmatprep.mubr.msk.f32.mxu1 %vm6707_vm0, %v6708_v3 }
 0x142   :  { %v397_v52 = vmax.f32 %v356_v49, 0.0 }
 0x143   :  { %v360_v53 = vpop.f32.mrb[48].mxu0  ;;  %v450_v54 = vld [vmem:[#allocation2 + $0xa8] sm:$0xff] }
 0x144   :  { %425 = vst.msk [vmem:[#allocation2 + $0xb8] sm:$0xff] %vm401_vm2, %v397_v52  ;;  %v361_v56 = vadd.f32 %v7029_v45, %v360_v53  ;;  %5776 = vmatmul.mubr.msk.f32.gmra.mrb[42].mxu1 %vm401_vm2, %v450_v54  ;;  %v5701_v57 = vpop.f32.mrb[49].mxu0 }
 0x145   :  { %5778 = vmatprep.mubr.msk.f32.mxu1 %vm6707_vm0, %v6708_v3 }
 0x146   :  { %v398_v58 = vmax.f32 %v361_v56, 0.0 }
 0x147   :  { %v365_v59 = vpop.f32.mrb[50].mxu0  ;;  %v451_v61 = vld [vmem:[#allocation2 + $0xb0] sm:$0xff] }
 0x148   :  { %426 = vst.msk [vmem:[#allocation2 + $0xc0] sm:$0xff] %vm401_vm2, %v398_v58  ;;  %v366_v62 = vadd.f32 %v7029_v45, %v365_v59  ;;  %5779 = vmatmul.mubr.msk.f32.gmra.mrb[44].mxu1 %vm401_vm2, %v451_v61  ;;  %v5704_v63 = vpop.f32.mrb[51].mxu0 }
 0x149   :  { %5781 = vmatprep.mubr.msk.f32.mxu1 %vm6707_vm0, %v6708_v3 }
 0x14a   :  { %v399_v1 = vmax.f32 %v366_v62, 0.0 }
 0x14b   :  { %v370_v4 = vpop.f32.mrb[52].mxu0  ;;  %v452_v5 = vld [vmem:[#allocation2 + $0xb8] sm:$0xff] }
 0x14c   :  { %427 = vst.msk [vmem:[#allocation2 + $0xc8] sm:$0xff] %vm401_vm2, %v399_v1  ;;  %v371_v6 = vadd.f32 %v7029_v45, %v370_v4  ;;  %5782 = vmatmul.mubr.msk.f32.gmra.mrb[46].mxu1 %vm401_vm2, %v452_v5  ;;  %v5707_v7 = vpop.f32.mrb[53].mxu0 }
 0x14d   :  { %5784 = vmatprep.mubr.msk.f32.mxu1 %vm6707_vm0, %v6708_v3 }
 0x14e   :  { %v400_v11 = vmax.f32 %v371_v6, 0.0 }
 0x14f   :  { %v453_v12 = vld [vmem:[#allocation2 + $0xc0] sm:$0xff]  ;;  %v1171_v15 = vpop.f32.mrb[54].mxu0 }
 0x150   :  { %428 = vst.msk [vmem:[#allocation2 + $0xd0] sm:$0xff] %vm401_vm2, %v400_v11  ;;  %5785 = vmatmul.mubr.msk.f32.gmra.mrb[48].mxu1 %vm401_vm2, %v453_v12  ;;  %v1172_v45 = vadd.f32 %v7214_v10, %v1171_v15  ;;  %v5843_v17 = vpop.f32.mrb[55].mxu0 }
 0x151   :  { %5787 = vmatprep.mubr.msk.f32.mxu1 %vm6707_vm0, %v6708_v3 }
 0x152   :  { %1183 = vrot.lane.b32.xlu0 %v1172_v45, %s6709_s19 }
 0x153   :  { %v454_v18 = vld [vmem:[#allocation2 + $0xc8] sm:$0xff] }
 0x154   :  { %5788 = vmatmul.mubr.msk.f32.gmra.mrb[50].mxu1 %vm401_vm2, %v454_v18 }
 0x155   :  { %5790 = vmatprep.mubr.msk.f32.mxu1 %vm6707_vm0, %v6708_v3 }
 0x157   :  { %v455_v20 = vld [vmem:[#allocation2 + $0xd0] sm:$0xff] }
 0x158   :  { %5791 = vmatmul.mubr.msk.f32.gmra.mrb[52].mxu1 %vm401_vm2, %v455_v20 }
 0x159   :  { %5797 = vmatprep.mubr.msk.f32.mxu1 %vm401_vm2, %v7052_v14  ;;  %v7277_v14 = vld [vmem:[%s8256_s5] ss:$0 sm:$0xff] }
 0x15c   :  { %5798 = vmatmul.mubr.msk.f32.vlgmr.msra.gmra.mrb[54].mxu1 %vm401_vm2, %v7060_v19 }
 0x15d   :  { %5800 = vmatprep.mubr.msk.f32.mxu1 %vm401_vm2, %v7068_v24  ;;  %6239 = vmatpush3.bf16.msra.mxu1 %v6833_v9 }
 0x15e   :  { %6240 = vmatprep.subr.bf16.mxu1 %v6706_v0 }
 0x160   :  { %5801 = vmatmul.mubr.msk.f32.gmra.mrb[56].mxu1 %vm401_vm2, %v7076_v29 }
 0x161   :  { %5803 = vmatprep.mubr.msk.f32.mxu1 %vm401_vm2, %v7084_v34  ;;  %6242 = vmatpush3.bf16.msra.mxu1 %v6850_v13 }
 0x162   :  { %6249 = vmatprep.subr.bf16.mxu1 %v6706_v0 }
 0x164   :  { %5804 = vmatmul.mubr.msk.f32.gmra.mrb[58].mxu1 %vm401_vm2, %v7092_v39 }
 0x165   :  { %5806 = vmatprep.mubr.msk.f32.mxu1 %vm401_vm2, %v7100_v44 }
 0x168   :  { %5807 = vmatmul.mubr.msk.f32.gmra.mrb[60].mxu1 %vm401_vm2, %v7108_v50 }
 0x169   :  { %5809 = vmatprep.mubr.msk.f32.mxu1 %vm401_vm2, %v7116_v55 }
 0x16c   :  { %5810 = vmatmul.mubr.msk.f32.gmra.mrb[62].mxu1 %vm401_vm2, %v7124_v60 }
 0x16d   :  { %5812 = vmatprep.mubr.msk.f32.mxu1 %vm401_vm2, %v7132_v2 }
 0x170   :  { %5813 = vmatmul.mubr.msk.f32.gmra.mrb[64].mxu1 %vm401_vm2, %v7140_v8 }
 0x171   :  { %5815 = vmatprep.mubr.msk.f32.mxu1 %vm401_vm2, %v7148_v16 }
 0x174   :  { %5816 = vmatmul.mubr.msk.f32.gmra.mrb[66].mxu1 %vm401_vm2, %v7156_v22 }
 0x175   :  { %5818 = vmatprep.mubr.msk.f32.mxu1 %vm401_vm2, %v7164_v28 }
 0x178   :  { %5819 = vmatmul.mubr.msk.f32.gmra.mrb[68].mxu1 %vm401_vm2, %v7172_v35 }
 0x179   :  { %5821 = vmatprep.mubr.msk.f32.mxu1 %vm401_vm2, %v7180_v41 }
 0x17c   :  { %5822 = vmatmul.mubr.msk.f32.gmra.mrb[70].mxu1 %vm401_vm2, %v7188_v48 }
 0x17d   :  { %5824 = vmatprep.mubr.msk.f32.mxu1 %vm401_vm2, %v450_v54 }
 0x180   :  { %5825 = vmatmul.mubr.msk.f32.gmra.mrb[72].mxu1 %vm401_vm2, %v451_v61 }
 0x181   :  { %5827 = vmatprep.mubr.msk.f32.mxu1 %vm401_vm2, %v452_v5 }
 0x184   :  { %5828 = vmatmul.mubr.msk.f32.gmra.mrb[74].mxu1 %vm401_vm2, %v453_v12 }
 0x185   :  { %5830 = vmatprep.mubr.msk.f32.mxu1 %vm401_vm2, %v454_v18 }
 0x188   :  { %5831 = vmatmul.mubr.msk.f32.gmra.mrb[76].mxu1 %vm401_vm2, %v455_v20  ;;  %vm5159_vm2 = vcmask 1043459  }
 0x189   :  { %5907 = vmatprep.mubr.msk.f32.mxu1 %vm6707_vm0, %v6708_v3 }
 0x1c3   :  { %v612_v19 = vpop.f32.mrb[0].mxu1 }
 0x1c4   :  { %v613_v24 = vadd.f32 %v7277_v14, %v612_v19  ;;  %v5714_v29 = vpop.f32.mrb[1].mxu1  ;;  %v1184_v47 = vpop.permute.xlu0 %1183 }
 0x1c6   :  { %747 = vst.msk [vmem:[#allocation3] sm:$0xff] %vm746_vm3, %v613_v24 }
 0x1c7   :  { %v617_v34 = vpop.f32.mrb[2].mxu1 }
 0x1c8   :  { %v618_v39 = vadd.f32 %v7277_v14, %v617_v34  ;;  %v5717_v44 = vpop.f32.mrb[3].mxu1 }
 0x1ca   :  { %748 = vst.msk [vmem:[#allocation3 + $0x8] sm:$0xff] %vm746_vm3, %v618_v39 }
 0x1cb   :  { %v622_v50 = vpop.f32.mrb[4].mxu1 }
 0x1cc   :  { %v623_v55 = vadd.f32 %v7277_v14, %v622_v50  ;;  %v5720_v60 = vpop.f32.mrb[5].mxu1 }
 0x1cd   :  { %v7284_v2 = vld [vmem:[#allocation3] sm:$0xff] }
 0x1ce   :  { %v1175_v8 = vadd.f32 %v1172_v45, %v7284_v2  ;;  %749 = vst.msk [vmem:[#allocation3 + $0x10] sm:$0xff] %vm746_vm3, %v623_v55 }
 0x1cf   :  { %v627_v16 = vpop.f32.mrb[6].mxu1 }
 0x1d0   :  { %v5264_v21 = vmul.f32 -1.442695, %v1175_v8  ;;  %v628_v22 = vadd.f32 %v7277_v14, %v627_v16  ;;  %v5723_v23 = vpop.f32.mrb[7].mxu1 }
 0x1d2   :  { %6394 = vpow2.f32 %v5264_v21  ;;  %750 = vst.msk [vmem:[#allocation3 + $0x18] sm:$0xff] %vm746_vm3, %v628_v22 }
 0x1d3   :  { %v632_v25 = vpop.f32.mrb[8].mxu1 }
 0x1d4   :  { %v633_v26 = vadd.f32 %v7277_v14, %v632_v25  ;;  %v5726_v27 = vpop.f32.mrb[9].mxu1 }
 0x1d6   :  { %751 = vst.msk [vmem:[#allocation3 + $0x20] sm:$0xff] %vm746_vm3, %v633_v26 }
 0x1d7   :  { %v637_v28 = vpop.f32.mrb[10].mxu1 }
 0x1d8   :  { %v638_v30 = vadd.f32 %v7277_v14, %v637_v28  ;;  %v5729_v31 = vpop.f32.mrb[11].mxu1 }
 0x1da   :  { %752 = vst.msk [vmem:[#allocation3 + $0x28] sm:$0xff] %vm746_vm3, %v638_v30 }
 0x1db   :  { %v642_v32 = vpop.f32.mrb[12].mxu1 }
 0x1dc   :  { %v6395_v33 = vpop.eup %6394  ;;  %v643_v35 = vadd.f32 %v7277_v14, %v642_v32  ;;  %v5732_v36 = vpop.f32.mrb[13].mxu1 }
 0x1dd   :  { %v1179_v37 = vadd.f32 1.0, %v6395_v33 }
 0x1de   :  { %753 = vst.msk [vmem:[#allocation3 + $0x30] sm:$0xff] %vm746_vm3, %v643_v35 }
 0x1df   :  { %6396 = vrcp.f32 %v1179_v37  ;;  %v647_v38 = vpop.f32.mrb[14].mxu1 }
 0x1e0   :  { %v648_v40 = vadd.f32 %v7277_v14, %v647_v38  ;;  %v5735_v41 = vpop.f32.mrb[15].mxu1 }
 0x1e2   :  { %754 = vst.msk [vmem:[#allocation3 + $0x38] sm:$0xff] %vm746_vm3, %v648_v40 }
 0x1e3   :  { %v652_v42 = vpop.f32.mrb[16].mxu1 }
 0x1e4   :  { %v653_v43 = vadd.f32 %v7277_v14, %v652_v42  ;;  %v5738_v46 = vpop.f32.mrb[17].mxu1 }
 0x1e6   :  { %755 = vst.msk [vmem:[#allocation3 + $0x40] sm:$0xff] %vm746_vm3, %v653_v43 }
 0x1e7   :  { %v657_v48 = vpop.f32.mrb[18].mxu1 }
 0x1e8   :  { %v658_v49 = vadd.f32 %v7277_v14, %v657_v48  ;;  %v5741_v51 = vpop.f32.mrb[19].mxu1 }
 0x1e9   :  { %v7301_v52 = vpop.eup %6396 }
 0x1ea   :  { %v1186_v53 = vmul.f32 %v7301_v52, %v1184_v47  ;;  %756 = vst.msk [vmem:[#allocation3 + $0x48] sm:$0xff] %vm746_vm3, %v658_v49  ;;  %v7342_v47 = vld [vmem:[%s8257_s9] ss:$0 sm:$0xff]  ;;  %s6710_s9 = smov 96  }
 0x1eb   :  { %v662_v54 = vpop.f32.mrb[20].mxu1 }
 0x1ec   :  { %1188 = vrot.lane.b32.xlu0 %v1186_v53, %s6709_s19  ;;  %v663_v56 = vadd.f32 %v7277_v14, %v662_v54  ;;  %v5744_v57 = vpop.f32.mrb[21].mxu1 }
 0x1ee   :  { %757 = vst.msk [vmem:[#allocation3 + $0x50] sm:$0xff] %vm746_vm3, %v663_v56 }
 0x1ef   :  { %v667_v58 = vpop.f32.mrb[22].mxu1 }
 0x1f0   :  { %v668_v59 = vadd.f32 %v7277_v14, %v667_v58  ;;  %v5747_v61 = vpop.f32.mrb[23].mxu1 }
 0x1f2   :  { %758 = vst.msk [vmem:[#allocation3 + $0x58] sm:$0xff] %vm746_vm3, %v668_v59 }
 0x1f3   :  { %v672_v62 = vpop.f32.mrb[24].mxu1 }
 0x1f4   :  { %v673_v63 = vadd.f32 %v7277_v14, %v672_v62  ;;  %v5750_v1 = vpop.f32.mrb[25].mxu1 }
 0x1f6   :  { %759 = vst.msk [vmem:[#allocation3 + $0x60] sm:$0xff] %vm746_vm3, %v673_v63 }
 0x1f7   :  { %v677_v4 = vpop.f32.mrb[26].mxu1 }
 0x1f8   :  { %v678_v5 = vadd.f32 %v7277_v14, %v677_v4  ;;  %v5753_v6 = vpop.f32.mrb[27].mxu1 }
 0x1fa   :  { %760 = vst.msk [vmem:[#allocation3 + $0x68] sm:$0xff] %vm746_vm3, %v678_v5 }
 0x1fb   :  { %v682_v7 = vpop.f32.mrb[28].mxu1 }
 0x1fc   :  { %v683_v11 = vadd.f32 %v7277_v14, %v682_v7  ;;  %v5756_v12 = vpop.f32.mrb[29].mxu1 }
 0x1fe   :  { %761 = vst.msk [vmem:[#allocation3 + $0x70] sm:$0xff] %vm746_vm3, %v683_v11 }
 0x1ff   :  { %v687_v15 = vpop.f32.mrb[30].mxu1 }
 0x200   :  { %v688_v45 = vadd.f32 %v7277_v14, %v687_v15  ;;  %v5759_v17 = vpop.f32.mrb[31].mxu1 }
 0x202   :  { %762 = vst.msk [vmem:[#allocation3 + $0x78] sm:$0xff] %vm746_vm3, %v688_v45 }
 0x203   :  { %v692_v18 = vpop.f32.mrb[32].mxu1 }
 0x204   :  { %v693_v20 = vadd.f32 %v7277_v14, %v692_v18  ;;  %v5762_v19 = vpop.f32.mrb[33].mxu1 }
 0x206   :  { %763 = vst.msk [vmem:[#allocation3 + $0x80] sm:$0xff] %vm746_vm3, %v693_v20 }
 0x207   :  { %v697_v24 = vpop.f32.mrb[34].mxu1 }
 0x208   :  { %v698_v29 = vadd.f32 %v7277_v14, %v697_v24  ;;  %v5765_v34 = vpop.f32.mrb[35].mxu1 }
 0x20a   :  { %764 = vst.msk [vmem:[#allocation3 + $0x88] sm:$0xff] %vm746_vm3, %v698_v29 }
 0x20b   :  { %v702_v39 = vpop.f32.mrb[36].mxu1 }
 0x20c   :  { %v703_v44 = vadd.f32 %v7277_v14, %v702_v39  ;;  %v5768_v50 = vpop.f32.mrb[37].mxu1 }
 0x20e   :  { %765 = vst.msk [vmem:[#allocation3 + $0x90] sm:$0xff] %vm746_vm3, %v703_v44 }
 0x20f   :  { %v707_v55 = vpop.f32.mrb[38].mxu1 }
 0x210   :  { %v708_v60 = vadd.f32 %v7277_v14, %v707_v55  ;;  %v5771_v8 = vpop.f32.mrb[39].mxu1 }
 0x212   :  { %766 = vst.msk [vmem:[#allocation3 + $0x98] sm:$0xff] %vm746_vm3, %v708_v60 }
 0x213   :  { %v712_v16 = vpop.f32.mrb[40].mxu1 }
 0x214   :  { %v713_v21 = vadd.f32 %v7277_v14, %v712_v16  ;;  %v5774_v22 = vpop.f32.mrb[41].mxu1 }
 0x216   :  { %767 = vst.msk [vmem:[#allocation3 + $0xa0] sm:$0xff] %vm746_vm3, %v713_v21 }
 0x217   :  { %v717_v23 = vpop.f32.mrb[42].mxu1 }
 0x218   :  { %v718_v25 = vadd.f32 %v7277_v14, %v717_v23  ;;  %v5777_v26 = vpop.f32.mrb[43].mxu1 }
 0x21a   :  { %768 = vst.msk [vmem:[#allocation3 + $0xa8] sm:$0xff] %vm746_vm3, %v718_v25 }
 0x21b   :  { %v722_v27 = vpop.f32.mrb[44].mxu1 }
 0x21c   :  { %v723_v28 = vadd.f32 %v7277_v14, %v722_v27  ;;  %v5780_v30 = vpop.f32.mrb[45].mxu1 }
 0x21e   :  { %769 = vst.msk [vmem:[#allocation3 + $0xb0] sm:$0xff] %vm746_vm3, %v723_v28 }
 0x21f   :  { %v727_v31 = vpop.f32.mrb[46].mxu1 }
 0x220   :  { %v728_v32 = vadd.f32 %v7277_v14, %v727_v31  ;;  %v5783_v33 = vpop.f32.mrb[47].mxu1 }
 0x222   :  { %770 = vst.msk [vmem:[#allocation3 + $0xb8] sm:$0xff] %vm746_vm3, %v728_v32 }
 0x223   :  { %v732_v35 = vpop.f32.mrb[48].mxu1 }
 0x224   :  { %v733_v36 = vadd.f32 %v7277_v14, %v732_v35  ;;  %v5786_v37 = vpop.f32.mrb[49].mxu1 }
 0x226   :  { %771 = vst.msk [vmem:[#allocation3 + $0xc0] sm:$0xff] %vm746_vm3, %v733_v36 }
 0x227   :  { %v737_v38 = vpop.f32.mrb[50].mxu1 }
 0x228   :  { %v738_v40 = vadd.f32 %v7277_v14, %v737_v38  ;;  %v5789_v41 = vpop.f32.mrb[51].mxu1 }
 0x22a   :  { %772 = vst.msk [vmem:[#allocation3 + $0xc8] sm:$0xff] %vm746_vm3, %v738_v40  ;;  %v1193_v40 = vsub.f32 1.0, %v7301_v52 }
 0x22b   :  { %v742_v42 = vpop.f32.mrb[52].mxu1 }
 0x22c   :  { %v743_v43 = vadd.f32 %v7277_v14, %v742_v42  ;;  %v5792_v46 = vpop.f32.mrb[53].mxu1  ;;  %v1199_v42 = vmul.f32 0.0, %v7301_v52 }
 0x22e   :  { %773 = vst.msk [vmem:[#allocation3 + $0xd0] sm:$0xff] %vm746_vm3, %v743_v43  ;;  %vm5161_vm3 = vcmask 1044484  }
 0x22f   :  { %v5799_v48 = vpop.f32.mrb[54].mxu1 }
 0x230   :  { %v951_v49 = vadd.f32 %v5799_v48, %v7342_v47  ;;  %v945_v51 = vpop.f32.mrb[55].mxu1 }
 0x231   :  { %v946_v53 = vadd.f32 %v7342_v47, %v945_v51 }
 0x232   :  { %1066 = vst.msk [vmem:[#allocation4 + $0x8] sm:$0xff] %vm1064_vm4, %v951_v49  ;;  %v1201_v49 = vld [vmem:[#allocation3 + $0x8] sm:$0xff] }
 0x233   :  { %1065 = vst.msk [vmem:[#allocation4] sm:$0xff] %vm1064_vm4, %v946_v53  ;;  %v5802_v14 = vpop.f32.mrb[56].mxu1 }
 0x234   :  { %v961_v54 = vadd.f32 %v5802_v14, %v7342_v47  ;;  %v955_v56 = vpop.f32.mrb[57].mxu1 }
 0x235   :  { %v956_v57 = vadd.f32 %v7342_v47, %v955_v56 }
 0x236   :  { %1068 = vst.msk [vmem:[#allocation4 + $0x18] sm:$0xff] %vm1064_vm4, %v961_v54 }
 0x237   :  { %1067 = vst.msk [vmem:[#allocation4 + $0x10] sm:$0xff] %vm1064_vm4, %v956_v57  ;;  %v5805_v58 = vpop.f32.mrb[58].mxu1 }
 0x238   :  { %v971_v59 = vadd.f32 %v5805_v58, %v7342_v47  ;;  %v965_v61 = vpop.f32.mrb[59].mxu1 }
 0x239   :  { %v966_v62 = vadd.f32 %v7342_v47, %v965_v61 }
 0x23a   :  { %1070 = vst.msk [vmem:[#allocation4 + $0x28] sm:$0xff] %vm1064_vm4, %v971_v59 }
 0x23b   :  { %1069 = vst.msk [vmem:[#allocation4 + $0x20] sm:$0xff] %vm1064_vm4, %v966_v62  ;;  %v5808_v63 = vpop.f32.mrb[60].mxu1 }
 0x23c   :  { %v981_v1 = vadd.f32 %v5808_v63, %v7342_v47  ;;  %v975_v4 = vpop.f32.mrb[61].mxu1 }
 0x23d   :  { %v976_v5 = vadd.f32 %v7342_v47, %v975_v4 }
 0x23e   :  { %1072 = vst.msk [vmem:[#allocation4 + $0x38] sm:$0xff] %vm1064_vm4, %v981_v1 }
 0x23f   :  { %1071 = vst.msk [vmem:[#allocation4 + $0x30] sm:$0xff] %vm1064_vm4, %v976_v5  ;;  %v5811_v6 = vpop.f32.mrb[62].mxu1 }
 0x240   :  { %v991_v7 = vadd.f32 %v5811_v6, %v7342_v47  ;;  %v985_v11 = vpop.f32.mrb[63].mxu1 }
 0x241   :  { %v986_v12 = vadd.f32 %v7342_v47, %v985_v11 }
 0x242   :  { %1074 = vst.msk [vmem:[#allocation4 + $0x48] sm:$0xff] %vm1064_vm4, %v991_v7 }
 0x243   :  { %1073 = vst.msk [vmem:[#allocation4 + $0x40] sm:$0xff] %vm1064_vm4, %v986_v12  ;;  %v5814_v15 = vpop.f32.mrb[64].mxu1 }
 0x244   :  { %v1001_v45 = vadd.f32 %v5814_v15, %v7342_v47  ;;  %v995_v17 = vpop.f32.mrb[65].mxu1 }
 0x245   :  { %v996_v18 = vadd.f32 %v7342_v47, %v995_v17 }
 0x246   :  { %1076 = vst.msk [vmem:[#allocation4 + $0x58] sm:$0xff] %vm1064_vm4, %v1001_v45  ;;  %v1303_v45 = vld [vmem:[#allocation3 + $0x10] sm:$0xff] }
 0x247   :  { %1075 = vst.msk [vmem:[#allocation4 + $0x50] sm:$0xff] %vm1064_vm4, %v996_v18  ;;  %v5817_v20 = vpop.f32.mrb[66].mxu1 }
 0x248   :  { %v1011_v19 = vadd.f32 %v5817_v20, %v7342_v47  ;;  %v1005_v24 = vpop.f32.mrb[67].mxu1 }
 0x249   :  { %v1006_v29 = vadd.f32 %v7342_v47, %v1005_v24 }
 0x24a   :  { %1078 = vst.msk [vmem:[#allocation4 + $0x68] sm:$0xff] %vm1064_vm4, %v1011_v19 }
 0x24b   :  { %1077 = vst.msk [vmem:[#allocation4 + $0x60] sm:$0xff] %vm1064_vm4, %v1006_v29  ;;  %v5820_v34 = vpop.f32.mrb[68].mxu1 }
 0x24c   :  { %v1021_v39 = vadd.f32 %v5820_v34, %v7342_v47  ;;  %v1015_v44 = vpop.f32.mrb[69].mxu1 }
 0x24d   :  { %v1016_v50 = vadd.f32 %v7342_v47, %v1015_v44 }
 0x24e   :  { %1080 = vst.msk [vmem:[#allocation4 + $0x78] sm:$0xff] %vm1064_vm4, %v1021_v39 }
 0x24f   :  { %1079 = vst.msk [vmem:[#allocation4 + $0x70] sm:$0xff] %vm1064_vm4, %v1016_v50  ;;  %v5823_v55 = vpop.f32.mrb[70].mxu1 }
 0x250   :  { %v1031_v60 = vadd.f32 %v5823_v55, %v7342_v47  ;;  %v1025_v8 = vpop.f32.mrb[71].mxu1 }
 0x251   :  { %v1026_v16 = vadd.f32 %v7342_v47, %v1025_v8 }
 0x252   :  { %1082 = vst.msk [vmem:[#allocation4 + $0x88] sm:$0xff] %vm1064_vm4, %v1031_v60 }
 0x253   :  { %1081 = vst.msk [vmem:[#allocation4 + $0x80] sm:$0xff] %vm1064_vm4, %v1026_v16  ;;  %v5826_v21 = vpop.f32.mrb[72].mxu1 }
 0x254   :  { %v1041_v22 = vadd.f32 %v5826_v21, %v7342_v47  ;;  %v1035_v23 = vpop.f32.mrb[73].mxu1 }
 0x255   :  { %v1036_v25 = vadd.f32 %v7342_v47, %v1035_v23 }
 0x256   :  { %1084 = vst.msk [vmem:[#allocation4 + $0x98] sm:$0xff] %vm1064_vm4, %v1041_v22 }
 0x257   :  { %1083 = vst.msk [vmem:[#allocation4 + $0x90] sm:$0xff] %vm1064_vm4, %v1036_v25  ;;  %v5829_v26 = vpop.f32.mrb[74].mxu1 }
 0x258   :  { %v1051_v27 = vadd.f32 %v5829_v26, %v7342_v47  ;;  %v1045_v28 = vpop.f32.mrb[75].mxu1 }
 0x259   :  { %v1046_v30 = vadd.f32 %v7342_v47, %v1045_v28 }
 0x25a   :  { %1086 = vst.msk [vmem:[#allocation4 + $0xa8] sm:$0xff] %vm1064_vm4, %v1051_v27  ;;  %v1405_v27 = vld [vmem:[#allocation3 + $0x18] sm:$0xff] }
 0x25b   :  { %1085 = vst.msk [vmem:[#allocation4 + $0xa0] sm:$0xff] %vm1064_vm4, %v1046_v30  ;;  %v5832_v31 = vpop.f32.mrb[76].mxu1 }
 0x25c   :  { %v1061_v32 = vadd.f32 %v5832_v31, %v7342_v47  ;;  %v1055_v33 = vpop.f32.mrb[77].mxu1 }
 0x25d   :  { %v1056_v35 = vadd.f32 %v7342_v47, %v1055_v33 }
 0x25e   :  { %1088 = vst.msk [vmem:[#allocation4 + $0xb8] sm:$0xff] %vm1064_vm4, %v1061_v32  ;;  %v1189_v36 = vpop.permute.xlu0 %1188 }
 0x25f   :  { %1087 = vst.msk [vmem:[#allocation4 + $0xb0] sm:$0xff] %vm1064_vm4, %v1056_v35  ;;  %v1191_v37 = vadd.f32 %v1189_v36, %v7284_v2  ;;  %vm5163_vm4 = vcmask 1045509  }
 0x261   :  { %6398 = vtanh.f32 %v1191_v37 }
 0x26b   :  { %v6399_v38 = vpop.eup %6398 }
 0x26c   :  { %1195 = vrot.lane.b32.xlu1 %v6399_v38, %s6710_s9 }
 0x2de   :  { %v1196_v41 = vpop.permute.xlu1 %1195 }
 0x2df   :  { %v1198_v43 = vmul.f32 %v1196_v41, %v1193_v40 }
 0x2e1   :  { %v1200_v46 = vadd.f32 %v1199_v42, %v1198_v43 }
 0x2e3   :  { %1203 = vrot.lane.b32.xlu1 %v1200_v46, %s6710_s9 }
 0x355   :  { %v1204_v47 = vpop.permute.xlu1 %1203 }
 0x356   :  { %5853 = vmatmul.mubr.msk.f32.vlgmr.msra.gmra.mrb[56].mxu0 %vm1101_vm5, %v1204_v47 }
 0x357   :  { %6215 = vmatpush3.bf16.msra.mxu0 %v6833_v9  ;;  %5863 = vmatprep.mubr.msk.f32.mxu0 %vm6707_vm0, %v6708_v3 }
 0x358   :  { %6216 = vmatprep.subr.bf16.mxu0 %v6706_v0 }
 0x35b   :  { %6218 = vmatpush3.bf16.msra.mxu0 %v6850_v13 }
 0x35c   :  { %6219 = vmatprep.subr.bf16.mxu0 %v6706_v0 }
 0x429   :  { %v1273_v2 = vpop.f32.mrb[56].mxu0 }
 0x42a   :  { %v1274_v52 = vadd.f32 %v7214_v10, %v1273_v2  ;;  %v5854_v48 = vpop.f32.mrb[57].mxu0 }
 0x42c   :  { %1285 = vrot.lane.b32.xlu0 %v1274_v52, %s6709_s19  ;;  %v1277_v51 = vadd.f32 %v1274_v52, %v1201_v49 }
 0x42e   :  { %v5266_v53 = vmul.f32 -1.442695, %v1277_v51  ;;  %v1507_v51 = vld [vmem:[#allocation3 + $0x20] sm:$0xff] }
 0x430   :  { %6400 = vpow2.f32 %v5266_v53 }
 0x43a   :  { %v6401_v14 = vpop.eup %6400 }
 0x43b   :  { %v1281_v54 = vadd.f32 1.0, %v6401_v14 }
 0x43d   :  { %6402 = vrcp.f32 %v1281_v54 }
 0x447   :  { %v6403_v56 = vpop.eup %6402 }
 0x448   :  { %v1295_v63 = vsub.f32 1.0, %v6403_v56  ;;  %v1301_v4 = vmul.f32 %v6403_v56, %v1200_v46 }
 0x49e   :  { %v1286_v57 = vpop.permute.xlu0 %1285 }
 0x49f   :  { %v1288_v58 = vmul.f32 %v6403_v56, %v1286_v57 }
 0x4a1   :  { %1290 = vrot.lane.b32.xlu1 %v1288_v58, %s6709_s19 }
 0x513   :  { %v1291_v59 = vpop.permute.xlu1 %1290 }
 0x514   :  { %v1293_v61 = vadd.f32 %v1291_v59, %v1201_v49 }
 0x516   :  { %6404 = vtanh.f32 %v1293_v61 }
 0x520   :  { %v6405_v62 = vpop.eup %6404 }
 0x521   :  { %1297 = vrot.lane.b32.xlu0 %v6405_v62, %s6710_s9 }
 0x593   :  { %v1298_v1 = vpop.permute.xlu0 %1297 }
 0x594   :  { %v1300_v5 = vmul.f32 %v1298_v1, %v1295_v63 }
 0x596   :  { %v1302_v6 = vadd.f32 %v1301_v4, %v1300_v5 }
 0x598   :  { %1305 = vrot.lane.b32.xlu1 %v1302_v6, %s6710_s9 }
 0x60a   :  { %v1306_v7 = vpop.permute.xlu1 %1305 }
 0x60b   :  { %5864 = vmatmul.mubr.msk.f32.vlgmr.msra.gmra.mrb[58].mxu0 %vm1101_vm5, %v1306_v7 }
 0x60c   :  { %6221 = vmatpush3.bf16.msra.mxu0 %v6833_v9  ;;  %5874 = vmatprep.mubr.msk.f32.mxu0 %vm6707_vm0, %v6708_v3 }
 0x60d   :  { %6222 = vmatprep.subr.bf16.mxu0 %v6706_v0 }
 0x610   :  { %6224 = vmatpush3.bf16.msra.mxu0 %v6850_v13 }
 0x611   :  { %6225 = vmatprep.subr.bf16.mxu0 %v6706_v0 }
 0x6de   :  { %v1375_v11 = vpop.f32.mrb[58].mxu0 }
 0x6df   :  { %v1376_v12 = vadd.f32 %v7214_v10, %v1375_v11  ;;  %v5865_v15 = vpop.f32.mrb[59].mxu0 }
 0x6e1   :  { %1387 = vrot.lane.b32.xlu0 %v1376_v12, %s6709_s19  ;;  %v1379_v17 = vadd.f32 %v1376_v12, %v1303_v45 }
 0x6e3   :  { %v5268_v18 = vmul.f32 -1.442695, %v1379_v17  ;;  %v1609_v17 = vld [vmem:[#allocation3 + $0x28] sm:$0xff] }
 0x6e5   :  { %6406 = vpow2.f32 %v5268_v18 }
 0x6ef   :  { %v6407_v20 = vpop.eup %6406 }
 0x6f0   :  { %v1383_v19 = vadd.f32 1.0, %v6407_v20 }
 0x6f2   :  { %6408 = vrcp.f32 %v1383_v19 }
 0x6fc   :  { %v6409_v24 = vpop.eup %6408 }
 0x6fd   :  { %v1397_v55 = vsub.f32 1.0, %v6409_v24  ;;  %v1403_v8 = vmul.f32 %v6409_v24, %v1302_v6 }
 0x753   :  { %v1388_v29 = vpop.permute.xlu0 %1387 }
 0x754   :  { %v1390_v34 = vmul.f32 %v6409_v24, %v1388_v29 }
 0x756   :  { %1392 = vrot.lane.b32.xlu1 %v1390_v34, %s6709_s19 }
 0x7c8   :  { %v1393_v39 = vpop.permute.xlu1 %1392 }
 0x7c9   :  { %v1395_v44 = vadd.f32 %v1393_v39, %v1303_v45 }
 0x7cb   :  { %6410 = vtanh.f32 %v1395_v44 }
 0x7d5   :  { %v6411_v50 = vpop.eup %6410 }
 0x7d6   :  { %1399 = vrot.lane.b32.xlu0 %v6411_v50, %s6710_s9 }
 0x848   :  { %v1400_v60 = vpop.permute.xlu0 %1399 }
 0x849   :  { %v1402_v16 = vmul.f32 %v1400_v60, %v1397_v55 }
 0x84b   :  { %v1404_v21 = vadd.f32 %v1403_v8, %v1402_v16 }
 0x84d   :  { %1407 = vrot.lane.b32.xlu1 %v1404_v21, %s6710_s9 }
 0x8bf   :  { %v1408_v22 = vpop.permute.xlu1 %1407 }
 0x8c0   :  { %5875 = vmatmul.mubr.msk.f32.vlgmr.msra.gmra.mrb[60].mxu0 %vm1101_vm5, %v1408_v22 }
 0x8c1   :  { %6227 = vmatpush3.bf16.msra.mxu0 %v6833_v9  ;;  %5885 = vmatprep.mubr.msk.f32.mxu0 %vm6707_vm0, %v6708_v3 }
 0x8c2   :  { %6228 = vmatprep.subr.bf16.mxu0 %v6706_v0 }
 0x8c5   :  { %6230 = vmatpush3.bf16.msra.mxu0 %v6850_v13 }
 0x8c6   :  { %6231 = vmatprep.subr.bf16.mxu0 %v6706_v0 }
 0x993   :  { %v1477_v23 = vpop.f32.mrb[60].mxu0 }
 0x994   :  { %v1478_v25 = vadd.f32 %v7214_v10, %v1477_v23  ;;  %v5876_v26 = vpop.f32.mrb[61].mxu0 }
 0x996   :  { %1489 = vrot.lane.b32.xlu0 %v1478_v25, %s6709_s19  ;;  %v1481_v28 = vadd.f32 %v1478_v25, %v1405_v27 }
 0x998   :  { %v5270_v30 = vmul.f32 -1.442695, %v1481_v28  ;;  %v1711_v28 = vld [vmem:[#allocation3 + $0x30] sm:$0xff] }
 0x99a   :  { %6412 = vpow2.f32 %v5270_v30 }
 0x9a4   :  { %v6413_v31 = vpop.eup %6412 }
 0x9a5   :  { %v1485_v32 = vadd.f32 1.0, %v6413_v31 }
 0x9a7   :  { %6414 = vrcp.f32 %v1485_v32 }
 0x9b1   :  { %v6415_v33 = vpop.eup %6414 }
 0x9b2   :  { %v1499_v41 = vsub.f32 1.0, %v6415_v33  ;;  %v1505_v43 = vmul.f32 %v6415_v33, %v1404_v21 }
 0xa08   :  { %v1490_v35 = vpop.permute.xlu0 %1489 }
 0xa09   :  { %v1492_v36 = vmul.f32 %v6415_v33, %v1490_v35 }
 0xa0b   :  { %1494 = vrot.lane.b32.xlu1 %v1492_v36, %s6709_s19 }
 0xa7d   :  { %v1495_v37 = vpop.permute.xlu1 %1494 }
 0xa7e   :  { %v1497_v38 = vadd.f32 %v1495_v37, %v1405_v27 }
 0xa80   :  { %6416 = vtanh.f32 %v1497_v38 }
 0xa8a   :  { %v6417_v40 = vpop.eup %6416 }
 0xa8b   :  { %1501 = vrot.lane.b32.xlu0 %v6417_v40, %s6710_s9 }
 0xafd   :  { %v1502_v42 = vpop.permute.xlu0 %1501 }
 0xafe   :  { %v1504_v46 = vmul.f32 %v1502_v42, %v1499_v41 }
 0xb00   :  { %v1506_v47 = vadd.f32 %v1505_v43, %v1504_v46 }
 0xb02   :  { %1509 = vrot.lane.b32.xlu1 %v1506_v47, %s6710_s9 }
 0xb74   :  { %v1510_v2 = vpop.permute.xlu1 %1509 }
 0xb75   :  { %5886 = vmatmul.mubr.msk.f32.vlgmr.msra.gmra.mrb[62].mxu0 %vm1101_vm5, %v1510_v2 }
 0xb76   :  { %6233 = vmatpush3.bf16.msra.mxu0 %v6833_v9  ;;  %5896 = vmatprep.mubr.msk.f32.mxu0 %vm6707_vm0, %v6708_v3 }
 0xb77   :  { %6234 = vmatprep.subr.bf16.mxu0 %v6706_v0 }
 0xb7a   :  { %6236 = vmatpush3.bf16.msra.mxu0 %v6850_v13 }
 0xb7b   :  { %6243 = vmatprep.subr.bf16.mxu0 %v6706_v0 }
 0xc48   :  { %v1579_v52 = vpop.f32.mrb[62].mxu0 }
 0xc49   :  { %v1580_v48 = vadd.f32 %v7214_v10, %v1579_v52  ;;  %v5887_v49 = vpop.f32.mrb[63].mxu0 }
 0xc4b   :  { %1591 = vrot.lane.b32.xlu0 %v1580_v48, %s6709_s19  ;;  %v1583_v53 = vadd.f32 %v1580_v48, %v1507_v51 }
 0xc4d   :  { %v5272_v14 = vmul.f32 -1.442695, %v1583_v53  ;;  %v1813_v53 = vld [vmem:[#allocation3 + $0x38] sm:$0xff] }
 0xc4f   :  { %6418 = vpow2.f32 %v5272_v14 }
 0xc59   :  { %v6419_v54 = vpop.eup %6418 }
 0xc5a   :  { %v1587_v56 = vadd.f32 1.0, %v6419_v54 }
 0xc5c   :  { %6420 = vrcp.f32 %v1587_v56 }
 0xc66   :  { %v6421_v57 = vpop.eup %6420 }
 0xc67   :  { %v1601_v1 = vsub.f32 1.0, %v6421_v57  ;;  %v1607_v5 = vmul.f32 %v6421_v57, %v1506_v47 }
 0xcbd   :  { %v1592_v58 = vpop.permute.xlu0 %1591 }
 0xcbe   :  { %v1594_v59 = vmul.f32 %v6421_v57, %v1592_v58 }
 0xcc0   :  { %1596 = vrot.lane.b32.xlu1 %v1594_v59, %s6709_s19 }
 0xd32   :  { %v1597_v61 = vpop.permute.xlu1 %1596 }
 0xd33   :  { %v1599_v62 = vadd.f32 %v1597_v61, %v1507_v51 }
 0xd35   :  { %6422 = vtanh.f32 %v1599_v62 }
 0xd3f   :  { %v6423_v63 = vpop.eup %6422 }
 0xd40   :  { %1603 = vrot.lane.b32.xlu0 %v6423_v63, %s6710_s9 }
 0xdb2   :  { %v1604_v4 = vpop.permute.xlu0 %1603 }
 0xdb3   :  { %v1606_v6 = vmul.f32 %v1604_v4, %v1601_v1 }
 0xdb5   :  { %v1608_v7 = vadd.f32 %v1607_v5, %v1606_v6 }
 0xdb7   :  { %1611 = vrot.lane.b32.xlu1 %v1608_v7, %s6710_s9 }
 0xe29   :  { %v1612_v11 = vpop.permute.xlu1 %1611 }
 0xe2a   :  { %5897 = vmatmul.mubr.msk.f32.vlgmr.msra.gmra.mrb[64].mxu0 %vm1101_vm5, %v1612_v11 }
 0xe2b   :  { %6245 = vmatpush3.bf16.msra.mxu0 %v6833_v9  ;;  %5918 = vmatprep.mubr.msk.f32.mxu0 %vm6707_vm0, %v6708_v3 }
 0xe2c   :  { %6246 = vmatprep.subr.bf16.mxu0 %v6706_v0 }
 0xe2f   :  { %6248 = vmatpush3.bf16.msra.mxu0 %v6850_v13 }
 0xe30   :  { %6255 = vmatprep.subr.bf16.mxu0 %v6706_v0 }
 0xefd   :  { %v1681_v12 = vpop.f32.mrb[64].mxu0 }
 0xefe   :  { %v1682_v15 = vadd.f32 %v7214_v10, %v1681_v12  ;;  %v5898_v45 = vpop.f32.mrb[65].mxu0 }
 0xf00   :  { %1693 = vrot.lane.b32.xlu0 %v1682_v15, %s6709_s19  ;;  %v1685_v18 = vadd.f32 %v1682_v15, %v1609_v17 }
 0xf02   :  { %v5274_v20 = vmul.f32 -1.442695, %v1685_v18  ;;  %v1915_v18 = vld [vmem:[#allocation3 + $0x40] sm:$0xff] }
 0xf04   :  { %6424 = vpow2.f32 %v5274_v20 }
 0xf0e   :  { %v6425_v19 = vpop.eup %6424 }
 0xf0f   :  { %v1689_v24 = vadd.f32 1.0, %v6425_v19 }
 0xf11   :  { %6426 = vrcp.f32 %v1689_v24 }
 0xf1b   :  { %v6427_v29 = vpop.eup %6426 }
 0xf1c   :  { %v1703_v60 = vsub.f32 1.0, %v6427_v29  ;;  %v1709_v16 = vmul.f32 %v6427_v29, %v1608_v7 }
 0xf72   :  { %v1694_v34 = vpop.permute.xlu0 %1693 }
 0xf73   :  { %v1696_v39 = vmul.f32 %v6427_v29, %v1694_v34 }
 0xf75   :  { %1698 = vrot.lane.b32.xlu1 %v1696_v39, %s6709_s19 }
 0xfe7   :  { %v1699_v44 = vpop.permute.xlu1 %1698 }
 0xfe8   :  { %v1701_v50 = vadd.f32 %v1699_v44, %v1609_v17 }
 0xfea   :  { %6428 = vtanh.f32 %v1701_v50 }
 0xff4   :  { %v6429_v55 = vpop.eup %6428 }
 0xff5   :  { %1705 = vrot.lane.b32.xlu0 %v6429_v55, %s6710_s9 }
0x1067   :  { %v1706_v8 = vpop.permute.xlu0 %1705 }
0x1068   :  { %v1708_v21 = vmul.f32 %v1706_v8, %v1703_v60 }
0x106a   :  { %v1710_v22 = vadd.f32 %v1709_v16, %v1708_v21 }
0x106c   :  { %1713 = vrot.lane.b32.xlu1 %v1710_v22, %s6710_s9 }
0x10de   :  { %v1714_v23 = vpop.permute.xlu1 %1713 }
0x10df   :  { %5908 = vmatmul.mubr.msk.f32.vlgmr.msra.gmra.mrb[78].mxu1 %vm1101_vm5, %v1714_v23 }
0x10e0   :  { %6251 = vmatpush3.bf16.msra.mxu1 %v6833_v9  ;;  %5929 = vmatprep.mubr.msk.f32.mxu1 %vm6707_vm0, %v6708_v3 }
0x10e1   :  { %6252 = vmatprep.subr.bf16.mxu1 %v6706_v0 }
0x10e4   :  { %6254 = vmatpush3.bf16.msra.mxu1 %v6850_v13 }
0x10e5   :  { %6261 = vmatprep.subr.bf16.mxu1 %v6706_v0 }
0x11b2   :  { %v1783_v25 = vpop.f32.mrb[78].mxu1 }
0x11b3   :  { %v1784_v26 = vadd.f32 %v7214_v10, %v1783_v25  ;;  %v5909_v27 = vpop.f32.mrb[79].mxu1 }
0x11b5   :  { %1795 = vrot.lane.b32.xlu0 %v1784_v26, %s6709_s19  ;;  %v1787_v30 = vadd.f32 %v1784_v26, %v1711_v28  ;;  %v7504_v26 = vld [vmem:[%s8255_s7] ss:$0 sm:$0xff] }
0x11b7   :  { %v5276_v31 = vmul.f32 -1.442695, %v1787_v30  ;;  %v2017_v30 = vld [vmem:[#allocation3 + $0x48] sm:$0xff] }
0x11b9   :  { %6430 = vpow2.f32 %v5276_v31 }
0x11c3   :  { %v6431_v32 = vpop.eup %6430 }
0x11c4   :  { %v1791_v33 = vadd.f32 1.0, %v6431_v32 }
0x11c6   :  { %6432 = vrcp.f32 %v1791_v33 }
0x11d0   :  { %v6433_v35 = vpop.eup %6432 }
0x11d1   :  { %v1805_v42 = vsub.f32 1.0, %v6433_v35  ;;  %v1811_v46 = vmul.f32 %v6433_v35, %v1710_v22 }
0x1227   :  { %v1796_v36 = vpop.permute.xlu0 %1795 }
0x1228   :  { %v1798_v37 = vmul.f32 %v6433_v35, %v1796_v36 }
0x122a   :  { %1800 = vrot.lane.b32.xlu1 %v1798_v37, %s6709_s19 }
0x129c   :  { %v1801_v38 = vpop.permute.xlu1 %1800 }
0x129d   :  { %v1803_v40 = vadd.f32 %v1801_v38, %v1711_v28 }
0x129f   :  { %6434 = vtanh.f32 %v1803_v40 }
0x12a9   :  { %v6435_v41 = vpop.eup %6434 }
0x12aa   :  { %1807 = vrot.lane.b32.xlu0 %v6435_v41, %s6710_s9 }
0x131c   :  { %v1808_v43 = vpop.permute.xlu0 %1807 }
0x131d   :  { %v1810_v47 = vmul.f32 %v1808_v43, %v1805_v42 }
0x131f   :  { %v1812_v2 = vadd.f32 %v1811_v46, %v1810_v47 }
0x1321   :  { %1815 = vrot.lane.b32.xlu1 %v1812_v2, %s6710_s9 }
0x1393   :  { %v1816_v52 = vpop.permute.xlu1 %1815 }
0x1394   :  { %5919 = vmatmul.mubr.msk.f32.vlgmr.msra.gmra.mrb[66].mxu0 %vm1101_vm5, %v1816_v52 }
0x1395   :  { %6257 = vmatpush3.bf16.msra.mxu0 %v6833_v9  ;;  %5940 = vmatprep.mubr.msk.f32.mxu0 %vm6707_vm0, %v6708_v3 }
0x1396   :  { %6258 = vmatprep.subr.bf16.mxu0 %v6706_v0 }
0x1399   :  { %6260 = vmatpush3.bf16.msra.mxu0 %v6850_v13 }
0x139a   :  { %6267 = vmatprep.subr.bf16.mxu0 %v6706_v0 }
0x1467   :  { %v1885_v48 = vpop.f32.mrb[66].mxu0 }
0x1468   :  { %v1886_v49 = vadd.f32 %v7214_v10, %v1885_v48  ;;  %v5920_v51 = vpop.f32.mrb[67].mxu0 }
0x146a   :  { %1897 = vrot.lane.b32.xlu0 %v1886_v49, %s6709_s19  ;;  %v1889_v14 = vadd.f32 %v1886_v49, %v1813_v53 }
0x146c   :  { %v5278_v54 = vmul.f32 -1.442695, %v1889_v14  ;;  %v2119_v14 = vld [vmem:[#allocation3 + $0x50] sm:$0xff] }
0x146e   :  { %6436 = vpow2.f32 %v5278_v54 }
0x1478   :  { %v6437_v56 = vpop.eup %6436 }
0x1479   :  { %v1893_v57 = vadd.f32 1.0, %v6437_v56 }
0x147b   :  { %6438 = vrcp.f32 %v1893_v57 }
0x1485   :  { %v6439_v58 = vpop.eup %6438 }
0x1486   :  { %v1907_v4 = vsub.f32 1.0, %v6439_v58  ;;  %v1913_v6 = vmul.f32 %v6439_v58, %v1812_v2 }
0x14dc   :  { %v1898_v59 = vpop.permute.xlu0 %1897 }
0x14dd   :  { %v1900_v61 = vmul.f32 %v6439_v58, %v1898_v59 }
0x14df   :  { %1902 = vrot.lane.b32.xlu1 %v1900_v61, %s6709_s19 }
0x1551   :  { %v1903_v62 = vpop.permute.xlu1 %1902 }
0x1552   :  { %v1905_v63 = vadd.f32 %v1903_v62, %v1813_v53 }
0x1554   :  { %6440 = vtanh.f32 %v1905_v63 }
0x155e   :  { %v6441_v1 = vpop.eup %6440 }
0x155f   :  { %1909 = vrot.lane.b32.xlu0 %v6441_v1, %s6710_s9 }
0x15d1   :  { %v1910_v5 = vpop.permute.xlu0 %1909 }
0x15d2   :  { %v1912_v7 = vmul.f32 %v1910_v5, %v1907_v4 }
0x15d4   :  { %v1914_v11 = vadd.f32 %v1913_v6, %v1912_v7 }
0x15d6   :  { %1917 = vrot.lane.b32.xlu1 %v1914_v11, %s6710_s9 }
0x1648   :  { %v1918_v12 = vpop.permute.xlu1 %1917 }
0x1649   :  { %5930 = vmatmul.mubr.msk.f32.vlgmr.msra.gmra.mrb[80].mxu1 %vm1101_vm5, %v1918_v12 }
0x164a   :  { %6263 = vmatpush3.bf16.msra.mxu1 %v6833_v9  ;;  %5951 = vmatprep.mubr.msk.f32.mxu1 %vm6707_vm0, %v6708_v3 }
0x164b   :  { %6264 = vmatprep.subr.bf16.mxu1 %v6706_v0 }
0x164e   :  { %6266 = vmatpush3.bf16.msra.mxu1 %v6850_v13 }
0x164f   :  { %6273 = vmatprep.subr.bf16.mxu1 %v6706_v0 }
0x171c   :  { %v1987_v15 = vpop.f32.mrb[80].mxu1 }
0x171d   :  { %v1988_v45 = vadd.f32 %v7214_v10, %v1987_v15  ;;  %v5931_v17 = vpop.f32.mrb[81].mxu1 }
0x171f   :  { %1999 = vrot.lane.b32.xlu0 %v1988_v45, %s6709_s19  ;;  %v1991_v20 = vadd.f32 %v1988_v45, %v1915_v18 }
0x1721   :  { %v5280_v19 = vmul.f32 -1.442695, %v1991_v20  ;;  %v2221_v20 = vld [vmem:[#allocation3 + $0x58] sm:$0xff] }
0x1723   :  { %6442 = vpow2.f32 %v5280_v19 }
0x172d   :  { %v6443_v24 = vpop.eup %6442 }
0x172e   :  { %v1995_v29 = vadd.f32 1.0, %v6443_v24 }
0x1730   :  { %6444 = vrcp.f32 %v1995_v29 }
0x173a   :  { %v6445_v34 = vpop.eup %6444 }
0x173b   :  { %v2009_v10 = vsub.f32 1.0, %v6445_v34  ;;  %v2015_v16 = vmul.f32 %v6445_v34, %v1914_v11 }
0x1791   :  { %v2000_v39 = vpop.permute.xlu0 %1999 }
0x1792   :  { %v2002_v44 = vmul.f32 %v6445_v34, %v2000_v39 }
0x1794   :  { %2004 = vrot.lane.b32.xlu1 %v2002_v44, %s6709_s19 }
0x1806   :  { %v2005_v50 = vpop.permute.xlu1 %2004 }
0x1807   :  { %v2007_v55 = vadd.f32 %v2005_v50, %v1915_v18 }
0x1809   :  { %6446 = vtanh.f32 %v2007_v55 }
0x1813   :  { %v6447_v60 = vpop.eup %6446 }
0x1814   :  { %2011 = vrot.lane.b32.xlu0 %v6447_v60, %s6710_s9 }
0x1886   :  { %v2012_v8 = vpop.permute.xlu0 %2011 }
0x1887   :  { %v2014_v21 = vmul.f32 %v2012_v8, %v2009_v10 }
0x1889   :  { %v2016_v22 = vadd.f32 %v2015_v16, %v2014_v21 }
0x188b   :  { %2019 = vrot.lane.b32.xlu1 %v2016_v22, %s6710_s9 }
0x18fd   :  { %v2020_v23 = vpop.permute.xlu1 %2019 }
0x18fe   :  { %5941 = vmatmul.mubr.msk.f32.vlgmr.msra.gmra.mrb[68].mxu0 %vm1101_vm5, %v2020_v23 }
0x18ff   :  { %6269 = vmatpush3.bf16.msra.mxu0 %v6833_v9  ;;  %5962 = vmatprep.mubr.msk.f32.mxu0 %vm6707_vm0, %v6708_v3 }
0x1900   :  { %6270 = vmatprep.subr.bf16.mxu0 %v6706_v0 }
0x1903   :  { %6272 = vmatpush3.bf16.msra.mxu0 %v6850_v13 }
0x1904   :  { %6279 = vmatprep.subr.bf16.mxu0 %v6706_v0 }
0x19d1   :  { %v2089_v25 = vpop.f32.mrb[68].mxu0 }
0x19d2   :  { %v2090_v27 = vadd.f32 %v7504_v26, %v2089_v25  ;;  %v5942_v28 = vpop.f32.mrb[69].mxu0 }
0x19d4   :  { %2101 = vrot.lane.b32.xlu0 %v2090_v27, %s6709_s19  ;;  %v2093_v31 = vadd.f32 %v2090_v27, %v2017_v30 }
0x19d6   :  { %v5282_v32 = vmul.f32 -1.442695, %v2093_v31  ;;  %v2323_v31 = vld [vmem:[#allocation3 + $0x60] sm:$0xff] }
0x19d8   :  { %6448 = vpow2.f32 %v5282_v32 }
0x19e2   :  { %v6449_v33 = vpop.eup %6448 }
0x19e3   :  { %v2097_v35 = vadd.f32 1.0, %v6449_v33 }
0x19e5   :  { %6450 = vrcp.f32 %v2097_v35 }
0x19ef   :  { %v6451_v36 = vpop.eup %6450 }
0x19f0   :  { %v2111_v43 = vsub.f32 1.0, %v6451_v36  ;;  %v2117_v47 = vmul.f32 %v6451_v36, %v2016_v22 }
0x1a46   :  { %v2102_v37 = vpop.permute.xlu0 %2101 }
0x1a47   :  { %v2104_v38 = vmul.f32 %v6451_v36, %v2102_v37 }
0x1a49   :  { %2106 = vrot.lane.b32.xlu1 %v2104_v38, %s6709_s19 }
0x1abb   :  { %v2107_v40 = vpop.permute.xlu1 %2106 }
0x1abc   :  { %v2109_v41 = vadd.f32 %v2107_v40, %v2017_v30 }
0x1abe   :  { %6452 = vtanh.f32 %v2109_v41 }
0x1ac8   :  { %v6453_v42 = vpop.eup %6452 }
0x1ac9   :  { %2113 = vrot.lane.b32.xlu0 %v6453_v42, %s6710_s9 }
0x1b3b   :  { %v2114_v46 = vpop.permute.xlu0 %2113 }
0x1b3c   :  { %v2116_v2 = vmul.f32 %v2114_v46, %v2111_v43 }
0x1b3e   :  { %v2118_v52 = vadd.f32 %v2117_v47, %v2116_v2 }
0x1b40   :  { %2121 = vrot.lane.b32.xlu1 %v2118_v52, %s6710_s9 }
0x1bb2   :  { %v2122_v48 = vpop.permute.xlu1 %2121 }
0x1bb3   :  { %5952 = vmatmul.mubr.msk.f32.vlgmr.msra.gmra.mrb[82].mxu1 %vm1101_vm5, %v2122_v48 }
0x1bb4   :  { %6275 = vmatpush3.bf16.msra.mxu1 %v6833_v9  ;;  %5973 = vmatprep.mubr.msk.f32.mxu1 %vm6707_vm0, %v6708_v3 }
0x1bb5   :  { %6276 = vmatprep.subr.bf16.mxu1 %v6706_v0 }
0x1bb8   :  { %6278 = vmatpush3.bf16.msra.mxu1 %v6850_v13 }
0x1bb9   :  { %6285 = vmatprep.subr.bf16.mxu1 %v6706_v0 }
0x1c86   :  { %v2191_v49 = vpop.f32.mrb[82].mxu1 }
0x1c87   :  { %v2192_v51 = vadd.f32 %v7504_v26, %v2191_v49  ;;  %v5953_v53 = vpop.f32.mrb[83].mxu1 }
0x1c89   :  { %2203 = vrot.lane.b32.xlu0 %v2192_v51, %s6709_s19  ;;  %v2195_v54 = vadd.f32 %v2192_v51, %v2119_v14 }
0x1c8b   :  { %v5284_v56 = vmul.f32 -1.442695, %v2195_v54  ;;  %v2425_v54 = vld [vmem:[#allocation3 + $0x68] sm:$0xff] }
0x1c8d   :  { %6454 = vpow2.f32 %v5284_v56 }
0x1c97   :  { %v6455_v57 = vpop.eup %6454 }
0x1c98   :  { %v2199_v58 = vadd.f32 1.0, %v6455_v57 }
0x1c9a   :  { %6456 = vrcp.f32 %v2199_v58 }
0x1ca4   :  { %v6457_v59 = vpop.eup %6456 }
0x1ca5   :  { %v2213_v5 = vsub.f32 1.0, %v6457_v59  ;;  %v2219_v7 = vmul.f32 %v6457_v59, %v2118_v52 }
0x1cfb   :  { %v2204_v61 = vpop.permute.xlu0 %2203 }
0x1cfc   :  { %v2206_v62 = vmul.f32 %v6457_v59, %v2204_v61 }
0x1cfe   :  { %2208 = vrot.lane.b32.xlu1 %v2206_v62, %s6709_s19 }
0x1d70   :  { %v2209_v63 = vpop.permute.xlu1 %2208 }
0x1d71   :  { %v2211_v1 = vadd.f32 %v2209_v63, %v2119_v14 }
0x1d73   :  { %6458 = vtanh.f32 %v2211_v1 }
0x1d7d   :  { %v6459_v4 = vpop.eup %6458 }
0x1d7e   :  { %2215 = vrot.lane.b32.xlu0 %v6459_v4, %s6710_s9 }
0x1df0   :  { %v2216_v6 = vpop.permute.xlu0 %2215 }
0x1df1   :  { %v2218_v11 = vmul.f32 %v2216_v6, %v2213_v5 }
0x1df3   :  { %v2220_v12 = vadd.f32 %v2219_v7, %v2218_v11 }
0x1df5   :  { %2223 = vrot.lane.b32.xlu1 %v2220_v12, %s6710_s9 }
0x1e67   :  { %v2224_v15 = vpop.permute.xlu1 %2223 }
0x1e68   :  { %5963 = vmatmul.mubr.msk.f32.vlgmr.msra.gmra.mrb[70].mxu0 %vm1101_vm5, %v2224_v15 }
0x1e69   :  { %6281 = vmatpush3.bf16.msra.mxu0 %v6833_v9  ;;  %5984 = vmatprep.mubr.msk.f32.mxu0 %vm6707_vm0, %v6708_v3 }
0x1e6a   :  { %6282 = vmatprep.subr.bf16.mxu0 %v6706_v0 }
0x1e6d   :  { %6284 = vmatpush3.bf16.msra.mxu0 %v6850_v13 }
0x1e6e   :  { %6291 = vmatprep.subr.bf16.mxu0 %v6706_v0 }
0x1f3b   :  { %v2293_v45 = vpop.f32.mrb[70].mxu0 }
0x1f3c   :  { %v2294_v17 = vadd.f32 %v7504_v26, %v2293_v45  ;;  %v5964_v18 = vpop.f32.mrb[71].mxu0 }
0x1f3e   :  { %2305 = vrot.lane.b32.xlu0 %v2294_v17, %s6709_s19  ;;  %v2297_v19 = vadd.f32 %v2294_v17, %v2221_v20 }
0x1f40   :  { %v5286_v24 = vmul.f32 -1.442695, %v2297_v19  ;;  %v2527_v19 = vld [vmem:[#allocation3 + $0x70] sm:$0xff] }
0x1f42   :  { %6460 = vpow2.f32 %v5286_v24 }
0x1f4c   :  { %v6461_v29 = vpop.eup %6460 }
0x1f4d   :  { %v2301_v34 = vadd.f32 1.0, %v6461_v29 }
0x1f4f   :  { %6462 = vrcp.f32 %v2301_v34 }
0x1f59   :  { %v6463_v39 = vpop.eup %6462 }
0x1f5a   :  { %v2315_v8 = vsub.f32 1.0, %v6463_v39  ;;  %v2321_v21 = vmul.f32 %v6463_v39, %v2220_v12 }
0x1fb0   :  { %v2306_v44 = vpop.permute.xlu0 %2305 }
0x1fb1   :  { %v2308_v50 = vmul.f32 %v6463_v39, %v2306_v44 }
0x1fb3   :  { %2310 = vrot.lane.b32.xlu1 %v2308_v50, %s6709_s19 }
0x2025   :  { %v2311_v55 = vpop.permute.xlu1 %2310 }
0x2026   :  { %v2313_v60 = vadd.f32 %v2311_v55, %v2221_v20 }
0x2028   :  { %6464 = vtanh.f32 %v2313_v60 }
0x2032   :  { %v6465_v10 = vpop.eup %6464 }
0x2033   :  { %2317 = vrot.lane.b32.xlu0 %v6465_v10, %s6710_s9 }
0x20a5   :  { %v2318_v16 = vpop.permute.xlu0 %2317 }
0x20a6   :  { %v2320_v22 = vmul.f32 %v2318_v16, %v2315_v8 }
0x20a8   :  { %v2322_v23 = vadd.f32 %v2321_v21, %v2320_v22 }
0x20aa   :  { %2325 = vrot.lane.b32.xlu1 %v2322_v23, %s6710_s9 }
0x211c   :  { %v2326_v25 = vpop.permute.xlu1 %2325 }
0x211d   :  { %5974 = vmatmul.mubr.msk.f32.vlgmr.msra.gmra.mrb[84].mxu1 %vm1101_vm5, %v2326_v25 }
0x211e   :  { %6287 = vmatpush3.bf16.msra.mxu1 %v6833_v9  ;;  %5995 = vmatprep.mubr.msk.f32.mxu1 %vm6707_vm0, %v6708_v3 }
0x211f   :  { %6288 = vmatprep.subr.bf16.mxu1 %v6706_v0 }
0x2122   :  { %6290 = vmatpush3.bf16.msra.mxu1 %v6850_v13 }
0x2123   :  { %6297 = vmatprep.subr.bf16.mxu1 %v6706_v0 }
0x21f0   :  { %v2395_v27 = vpop.f32.mrb[84].mxu1 }
0x21f1   :  { %v2396_v28 = vadd.f32 %v7504_v26, %v2395_v27  ;;  %v5975_v30 = vpop.f32.mrb[85].mxu1 }
0x21f3   :  { %2407 = vrot.lane.b32.xlu0 %v2396_v28, %s6709_s19  ;;  %v2399_v32 = vadd.f32 %v2396_v28, %v2323_v31 }
0x21f5   :  { %v5288_v33 = vmul.f32 -1.442695, %v2399_v32  ;;  %v2629_v32 = vld [vmem:[#allocation3 + $0x78] sm:$0xff] }
0x21f7   :  { %6466 = vpow2.f32 %v5288_v33 }
0x2201   :  { %v6467_v35 = vpop.eup %6466 }
0x2202   :  { %v2403_v36 = vadd.f32 1.0, %v6467_v35 }
0x2204   :  { %6468 = vrcp.f32 %v2403_v36 }
0x220e   :  { %v6469_v37 = vpop.eup %6468 }
0x220f   :  { %v2417_v46 = vsub.f32 1.0, %v6469_v37  ;;  %v2423_v2 = vmul.f32 %v6469_v37, %v2322_v23 }
0x2265   :  { %v2408_v38 = vpop.permute.xlu0 %2407 }
0x2266   :  { %v2410_v40 = vmul.f32 %v6469_v37, %v2408_v38 }
0x2268   :  { %2412 = vrot.lane.b32.xlu1 %v2410_v40, %s6709_s19 }
0x22da   :  { %v2413_v41 = vpop.permute.xlu1 %2412 }
0x22db   :  { %v2415_v42 = vadd.f32 %v2413_v41, %v2323_v31 }
0x22dd   :  { %6470 = vtanh.f32 %v2415_v42 }
0x22e7   :  { %v6471_v43 = vpop.eup %6470 }
0x22e8   :  { %2419 = vrot.lane.b32.xlu0 %v6471_v43, %s6710_s9 }
0x235a   :  { %v2420_v47 = vpop.permute.xlu0 %2419 }
0x235b   :  { %v2422_v52 = vmul.f32 %v2420_v47, %v2417_v46 }
0x235d   :  { %v2424_v48 = vadd.f32 %v2423_v2, %v2422_v52 }
0x235f   :  { %2427 = vrot.lane.b32.xlu1 %v2424_v48, %s6710_s9 }
0x23d1   :  { %v2428_v49 = vpop.permute.xlu1 %2427 }
0x23d2   :  { %5985 = vmatmul.mubr.msk.f32.vlgmr.msra.gmra.mrb[72].mxu0 %vm1101_vm5, %v2428_v49 }
0x23d3   :  { %6293 = vmatpush3.bf16.msra.mxu0 %v6833_v9  ;;  %6006 = vmatprep.mubr.msk.f32.mxu0 %vm6707_vm0, %v6708_v3 }
0x23d4   :  { %6294 = vmatprep.subr.bf16.mxu0 %v6706_v0 }
0x23d7   :  { %6296 = vmatpush3.bf16.msra.mxu0 %v6850_v13 }
0x23d8   :  { %6303 = vmatprep.subr.bf16.mxu0 %v6706_v0 }
0x24a5   :  { %v2497_v51 = vpop.f32.mrb[72].mxu0 }
0x24a6   :  { %v2498_v53 = vadd.f32 %v7504_v26, %v2497_v51  ;;  %v5986_v14 = vpop.f32.mrb[73].mxu0 }
0x24a8   :  { %2509 = vrot.lane.b32.xlu0 %v2498_v53, %s6709_s19  ;;  %v2501_v56 = vadd.f32 %v2498_v53, %v2425_v54 }
0x24aa   :  { %v5290_v57 = vmul.f32 -1.442695, %v2501_v56  ;;  %v2731_v56 = vld [vmem:[#allocation3 + $0x80] sm:$0xff] }
0x24ac   :  { %6472 = vpow2.f32 %v5290_v57 }
0x24b6   :  { %v6473_v58 = vpop.eup %6472 }
0x24b7   :  { %v2505_v59 = vadd.f32 1.0, %v6473_v58 }
0x24b9   :  { %6474 = vrcp.f32 %v2505_v59 }
0x24c3   :  { %v6475_v61 = vpop.eup %6474 }
0x24c4   :  { %v2519_v6 = vsub.f32 1.0, %v6475_v61  ;;  %v2525_v11 = vmul.f32 %v6475_v61, %v2424_v48 }
0x251a   :  { %v2510_v62 = vpop.permute.xlu0 %2509 }
0x251b   :  { %v2512_v63 = vmul.f32 %v6475_v61, %v2510_v62 }
0x251d   :  { %2514 = vrot.lane.b32.xlu1 %v2512_v63, %s6709_s19 }
0x258f   :  { %v2515_v1 = vpop.permute.xlu1 %2514 }
0x2590   :  { %v2517_v4 = vadd.f32 %v2515_v1, %v2425_v54 }
0x2592   :  { %6476 = vtanh.f32 %v2517_v4 }
0x259c   :  { %v6477_v5 = vpop.eup %6476 }
0x259d   :  { %2521 = vrot.lane.b32.xlu0 %v6477_v5, %s6710_s9 }
0x260f   :  { %v2522_v7 = vpop.permute.xlu0 %2521 }
0x2610   :  { %v2524_v12 = vmul.f32 %v2522_v7, %v2519_v6 }
0x2612   :  { %v2526_v15 = vadd.f32 %v2525_v11, %v2524_v12 }
0x2614   :  { %2529 = vrot.lane.b32.xlu1 %v2526_v15, %s6710_s9 }
0x2686   :  { %v2530_v45 = vpop.permute.xlu1 %2529 }
0x2687   :  { %5996 = vmatmul.mubr.msk.f32.vlgmr.msra.gmra.mrb[86].mxu1 %vm1101_vm5, %v2530_v45 }
0x2688   :  { %6299 = vmatpush3.bf16.msra.mxu1 %v6833_v9  ;;  %6017 = vmatprep.mubr.msk.f32.mxu1 %vm6707_vm0, %v6708_v3 }
0x2689   :  { %6300 = vmatprep.subr.bf16.mxu1 %v6706_v0 }
0x268c   :  { %6302 = vmatpush3.bf16.msra.mxu1 %v6850_v13 }
0x268d   :  { %6309 = vmatprep.subr.bf16.mxu1 %v6706_v0 }
0x275a   :  { %v2599_v17 = vpop.f32.mrb[86].mxu1 }
0x275b   :  { %v2600_v18 = vadd.f32 %v7504_v26, %v2599_v17  ;;  %v5997_v20 = vpop.f32.mrb[87].mxu1 }
0x275d   :  { %2611 = vrot.lane.b32.xlu0 %v2600_v18, %s6709_s19  ;;  %v2603_v24 = vadd.f32 %v2600_v18, %v2527_v19 }
0x275f   :  { %v5292_v29 = vmul.f32 -1.442695, %v2603_v24  ;;  %v2833_v24 = vld [vmem:[#allocation3 + $0x88] sm:$0xff] }
0x2761   :  { %6478 = vpow2.f32 %v5292_v29 }
0x276b   :  { %v6479_v34 = vpop.eup %6478 }
0x276c   :  { %v2607_v39 = vadd.f32 1.0, %v6479_v34 }
0x276e   :  { %6480 = vrcp.f32 %v2607_v39 }
0x2778   :  { %v6481_v44 = vpop.eup %6480 }
0x2779   :  { %v2621_v16 = vsub.f32 1.0, %v6481_v44  ;;  %v2627_v22 = vmul.f32 %v6481_v44, %v2526_v15 }
0x27cf   :  { %v2612_v50 = vpop.permute.xlu0 %2611 }
0x27d0   :  { %v2614_v55 = vmul.f32 %v6481_v44, %v2612_v50 }
0x27d2   :  { %2616 = vrot.lane.b32.xlu1 %v2614_v55, %s6709_s19 }
0x2844   :  { %v2617_v60 = vpop.permute.xlu1 %2616 }
0x2845   :  { %v2619_v10 = vadd.f32 %v2617_v60, %v2527_v19 }
0x2847   :  { %6482 = vtanh.f32 %v2619_v10 }
0x2851   :  { %v6483_v8 = vpop.eup %6482 }
0x2852   :  { %2623 = vrot.lane.b32.xlu0 %v6483_v8, %s6710_s9 }
0x28c4   :  { %v2624_v21 = vpop.permute.xlu0 %2623 }
0x28c5   :  { %v2626_v23 = vmul.f32 %v2624_v21, %v2621_v16 }
0x28c7   :  { %v2628_v25 = vadd.f32 %v2627_v22, %v2626_v23 }
0x28c9   :  { %2631 = vrot.lane.b32.xlu1 %v2628_v25, %s6710_s9 }
0x293b   :  { %v2632_v27 = vpop.permute.xlu1 %2631 }
0x293c   :  { %6007 = vmatmul.mubr.msk.f32.vlgmr.msra.gmra.mrb[74].mxu0 %vm1101_vm5, %v2632_v27 }
0x293d   :  { %6305 = vmatpush3.bf16.msra.mxu0 %v6833_v9  ;;  %6028 = vmatprep.mubr.msk.f32.mxu0 %vm6707_vm0, %v6708_v3 }
0x293e   :  { %6306 = vmatprep.subr.bf16.mxu0 %v6706_v0 }
0x2941   :  { %6308 = vmatpush3.bf16.msra.mxu0 %v6850_v13 }
0x2942   :  { %6315 = vmatprep.subr.bf16.mxu0 %v6706_v0 }
0x2a0f   :  { %v2701_v28 = vpop.f32.mrb[74].mxu0 }
0x2a10   :  { %v2702_v30 = vadd.f32 %v7504_v26, %v2701_v28  ;;  %v6008_v31 = vpop.f32.mrb[75].mxu0 }
0x2a12   :  { %2713 = vrot.lane.b32.xlu0 %v2702_v30, %s6709_s19  ;;  %v2705_v33 = vadd.f32 %v2702_v30, %v2629_v32 }
0x2a14   :  { %v5294_v35 = vmul.f32 -1.442695, %v2705_v33  ;;  %v2935_v33 = vld [vmem:[#allocation3 + $0x90] sm:$0xff] }
0x2a16   :  { %6484 = vpow2.f32 %v5294_v35 }
0x2a20   :  { %v6485_v36 = vpop.eup %6484 }
0x2a21   :  { %v2709_v37 = vadd.f32 1.0, %v6485_v36 }
0x2a23   :  { %6486 = vrcp.f32 %v2709_v37 }
0x2a2d   :  { %v6487_v38 = vpop.eup %6486 }
0x2a2e   :  { %v2723_v47 = vsub.f32 1.0, %v6487_v38  ;;  %v2729_v52 = vmul.f32 %v6487_v38, %v2628_v25 }
0x2a84   :  { %v2714_v40 = vpop.permute.xlu0 %2713 }
0x2a85   :  { %v2716_v41 = vmul.f32 %v6487_v38, %v2714_v40 }
0x2a87   :  { %2718 = vrot.lane.b32.xlu1 %v2716_v41, %s6709_s19 }
0x2af9   :  { %v2719_v42 = vpop.permute.xlu1 %2718 }
0x2afa   :  { %v2721_v43 = vadd.f32 %v2719_v42, %v2629_v32 }
0x2afc   :  { %6488 = vtanh.f32 %v2721_v43 }
0x2b06   :  { %v6489_v46 = vpop.eup %6488 }
0x2b07   :  { %2725 = vrot.lane.b32.xlu0 %v6489_v46, %s6710_s9 }
0x2b79   :  { %v2726_v2 = vpop.permute.xlu0 %2725 }
0x2b7a   :  { %v2728_v48 = vmul.f32 %v2726_v2, %v2723_v47 }
0x2b7c   :  { %v2730_v49 = vadd.f32 %v2729_v52, %v2728_v48 }
0x2b7e   :  { %2733 = vrot.lane.b32.xlu1 %v2730_v49, %s6710_s9 }
0x2bf0   :  { %v2734_v51 = vpop.permute.xlu1 %2733 }
0x2bf1   :  { %6018 = vmatmul.mubr.msk.f32.vlgmr.msra.gmra.mrb[88].mxu1 %vm1101_vm5, %v2734_v51 }
0x2bf2   :  { %6311 = vmatpush3.bf16.msra.mxu1 %v6833_v9  ;;  %6039 = vmatprep.mubr.msk.f32.mxu1 %vm6707_vm0, %v6708_v3 }
0x2bf3   :  { %6312 = vmatprep.subr.bf16.mxu1 %v6706_v0 }
0x2bf6   :  { %6314 = vmatpush3.bf16.msra.mxu1 %v6850_v13 }
0x2bf7   :  { %6321 = vmatprep.subr.bf16.mxu1 %v6706_v0 }
0x2cc4   :  { %v2803_v53 = vpop.f32.mrb[88].mxu1 }
0x2cc5   :  { %v2804_v14 = vadd.f32 %v7504_v26, %v2803_v53  ;;  %v6019_v54 = vpop.f32.mrb[89].mxu1 }
0x2cc7   :  { %2815 = vrot.lane.b32.xlu0 %v2804_v14, %s6709_s19  ;;  %v2807_v57 = vadd.f32 %v2804_v14, %v2731_v56 }
0x2cc9   :  { %v5296_v58 = vmul.f32 -1.442695, %v2807_v57  ;;  %v3037_v57 = vld [vmem:[#allocation3 + $0x98] sm:$0xff] }
0x2ccb   :  { %6490 = vpow2.f32 %v5296_v58 }
0x2cd5   :  { %v6491_v59 = vpop.eup %6490 }
0x2cd6   :  { %v2811_v61 = vadd.f32 1.0, %v6491_v59 }
0x2cd8   :  { %6492 = vrcp.f32 %v2811_v61 }
0x2ce2   :  { %v6493_v62 = vpop.eup %6492 }
0x2ce3   :  { %v2825_v7 = vsub.f32 1.0, %v6493_v62  ;;  %v2831_v12 = vmul.f32 %v6493_v62, %v2730_v49 }
0x2d39   :  { %v2816_v63 = vpop.permute.xlu0 %2815 }
0x2d3a   :  { %v2818_v1 = vmul.f32 %v6493_v62, %v2816_v63 }
0x2d3c   :  { %2820 = vrot.lane.b32.xlu1 %v2818_v1, %s6709_s19 }
0x2dae   :  { %v2821_v4 = vpop.permute.xlu1 %2820 }
0x2daf   :  { %v2823_v5 = vadd.f32 %v2821_v4, %v2731_v56 }
0x2db1   :  { %6494 = vtanh.f32 %v2823_v5 }
0x2dbb   :  { %v6495_v6 = vpop.eup %6494 }
0x2dbc   :  { %2827 = vrot.lane.b32.xlu0 %v6495_v6, %s6710_s9 }
0x2e2e   :  { %v2828_v11 = vpop.permute.xlu0 %2827 }
0x2e2f   :  { %v2830_v15 = vmul.f32 %v2828_v11, %v2825_v7 }
0x2e31   :  { %v2832_v45 = vadd.f32 %v2831_v12, %v2830_v15 }
0x2e33   :  { %2835 = vrot.lane.b32.xlu1 %v2832_v45, %s6710_s9 }
0x2ea5   :  { %v2836_v17 = vpop.permute.xlu1 %2835 }
0x2ea6   :  { %6029 = vmatmul.mubr.msk.f32.vlgmr.msra.gmra.mrb[76].mxu0 %vm1101_vm5, %v2836_v17 }
0x2ea7   :  { %6317 = vmatpush3.bf16.msra.mxu0 %v6833_v9  ;;  %6050 = vmatprep.mubr.msk.f32.mxu0 %vm6707_vm0, %v6708_v3 }
0x2ea8   :  { %6318 = vmatprep.subr.bf16.mxu0 %v6706_v0 }
0x2eab   :  { %6320 = vmatpush3.bf16.msra.mxu0 %v6850_v13 }
0x2eac   :  { %6327 = vmatprep.subr.bf16.mxu0 %v6706_v0 }
0x2f79   :  { %v2905_v18 = vpop.f32.mrb[76].mxu0 }
0x2f7a   :  { %v2906_v20 = vadd.f32 %v7504_v26, %v2905_v18  ;;  %v6030_v19 = vpop.f32.mrb[77].mxu0 }
0x2f7c   :  { %2917 = vrot.lane.b32.xlu0 %v2906_v20, %s6709_s19  ;;  %v2909_v29 = vadd.f32 %v2906_v20, %v2833_v24 }
0x2f7e   :  { %v5298_v34 = vmul.f32 -1.442695, %v2909_v29  ;;  %v3139_v29 = vld [vmem:[#allocation3 + $0xa0] sm:$0xff] }
0x2f80   :  { %6496 = vpow2.f32 %v5298_v34 }
0x2f8a   :  { %v6497_v39 = vpop.eup %6496 }
0x2f8b   :  { %v2913_v44 = vadd.f32 1.0, %v6497_v39 }
0x2f8d   :  { %6498 = vrcp.f32 %v2913_v44 }
0x2f97   :  { %v6499_v50 = vpop.eup %6498 }
0x2f98   :  { %v2927_v21 = vsub.f32 1.0, %v6499_v50  ;;  %v2933_v23 = vmul.f32 %v6499_v50, %v2832_v45 }
0x2fee   :  { %v2918_v55 = vpop.permute.xlu0 %2917 }
0x2fef   :  { %v2920_v60 = vmul.f32 %v6499_v50, %v2918_v55 }
0x2ff1   :  { %2922 = vrot.lane.b32.xlu1 %v2920_v60, %s6709_s19 }
0x3063   :  { %v2923_v10 = vpop.permute.xlu1 %2922 }
0x3064   :  { %v2925_v8 = vadd.f32 %v2923_v10, %v2833_v24 }
0x3066   :  { %6500 = vtanh.f32 %v2925_v8 }
0x3070   :  { %v6501_v16 = vpop.eup %6500 }
0x3071   :  { %2929 = vrot.lane.b32.xlu0 %v6501_v16, %s6710_s9 }
0x30e3   :  { %v2930_v22 = vpop.permute.xlu0 %2929 }
0x30e4   :  { %v2932_v25 = vmul.f32 %v2930_v22, %v2927_v21 }
0x30e6   :  { %v2934_v27 = vadd.f32 %v2933_v23, %v2932_v25 }
0x30e8   :  { %2937 = vrot.lane.b32.xlu1 %v2934_v27, %s6710_s9 }
0x315a   :  { %v2938_v28 = vpop.permute.xlu1 %2937 }
0x315b   :  { %6040 = vmatmul.mubr.msk.f32.vlgmr.msra.gmra.mrb[90].mxu1 %vm1101_vm5, %v2938_v28 }
0x315c   :  { %6323 = vmatpush3.bf16.msra.mxu1 %v6833_v9  ;;  %6061 = vmatprep.mubr.msk.f32.mxu1 %vm6707_vm0, %v6708_v3 }
0x315d   :  { %6324 = vmatprep.subr.bf16.mxu1 %v6706_v0 }
0x3160   :  { %6326 = vmatpush3.bf16.msra.mxu1 %v6850_v13 }
0x3161   :  { %6333 = vmatprep.subr.bf16.mxu1 %v6706_v0 }
0x322e   :  { %v3007_v30 = vpop.f32.mrb[90].mxu1 }
0x322f   :  { %v3008_v31 = vadd.f32 %v7504_v26, %v3007_v30  ;;  %v6041_v32 = vpop.f32.mrb[91].mxu1 }
0x3231   :  { %3019 = vrot.lane.b32.xlu0 %v3008_v31, %s6709_s19  ;;  %v3011_v35 = vadd.f32 %v3008_v31, %v2935_v33 }
0x3233   :  { %v5300_v36 = vmul.f32 -1.442695, %v3011_v35  ;;  %v3241_v35 = vld [vmem:[#allocation3 + $0xa8] sm:$0xff] }
0x3235   :  { %6502 = vpow2.f32 %v5300_v36 }
0x323f   :  { %v6503_v37 = vpop.eup %6502 }
0x3240   :  { %v3015_v38 = vadd.f32 1.0, %v6503_v37 }
0x3242   :  { %6504 = vrcp.f32 %v3015_v38 }
0x324c   :  { %v6505_v40 = vpop.eup %6504 }
0x324d   :  { %v3029_v2 = vsub.f32 1.0, %v6505_v40  ;;  %v3035_v48 = vmul.f32 %v6505_v40, %v2934_v27 }
0x32a3   :  { %v3020_v41 = vpop.permute.xlu0 %3019 }
0x32a4   :  { %v3022_v42 = vmul.f32 %v6505_v40, %v3020_v41 }
0x32a6   :  { %3024 = vrot.lane.b32.xlu1 %v3022_v42, %s6709_s19 }
0x3318   :  { %v3025_v43 = vpop.permute.xlu1 %3024 }
0x3319   :  { %v3027_v46 = vadd.f32 %v3025_v43, %v2935_v33 }
0x331b   :  { %6506 = vtanh.f32 %v3027_v46 }
0x3325   :  { %v6507_v47 = vpop.eup %6506 }
0x3326   :  { %3031 = vrot.lane.b32.xlu0 %v6507_v47, %s6710_s9 }
0x3398   :  { %v3032_v52 = vpop.permute.xlu0 %3031 }
0x3399   :  { %v3034_v49 = vmul.f32 %v3032_v52, %v3029_v2 }
0x339b   :  { %v3036_v51 = vadd.f32 %v3035_v48, %v3034_v49 }
0x339d   :  { %3039 = vrot.lane.b32.xlu1 %v3036_v51, %s6710_s9 }
0x340f   :  { %v3040_v53 = vpop.permute.xlu1 %3039 }
0x3410   :  { %6051 = vmatmul.mubr.msk.f32.vlgmr.msra.gmra.mrb[78].mxu0 %vm1101_vm5, %v3040_v53 }
0x3411   :  { %6329 = vmatpush3.bf16.msra.mxu0 %v6833_v9  ;;  %6072 = vmatprep.mubr.msk.f32.mxu0 %vm6707_vm0, %v6708_v3 }
0x3412   :  { %6330 = vmatprep.subr.bf16.mxu0 %v6706_v0 }
0x3415   :  { %6332 = vmatpush3.bf16.msra.mxu0 %v6850_v13 }
0x3416   :  { %6339 = vmatprep.subr.bf16.mxu0 %v6706_v0 }
0x34e3   :  { %v3109_v14 = vpop.f32.mrb[78].mxu0 }
0x34e4   :  { %v3110_v54 = vadd.f32 %v7504_v26, %v3109_v14  ;;  %v6052_v56 = vpop.f32.mrb[79].mxu0 }
0x34e6   :  { %3121 = vrot.lane.b32.xlu0 %v3110_v54, %s6709_s19  ;;  %v3113_v58 = vadd.f32 %v3110_v54, %v3037_v57 }
0x34e8   :  { %v5302_v59 = vmul.f32 -1.442695, %v3113_v58  ;;  %v3343_v58 = vld [vmem:[#allocation3 + $0xb0] sm:$0xff] }
0x34ea   :  { %6508 = vpow2.f32 %v5302_v59 }
0x34f4   :  { %v6509_v61 = vpop.eup %6508 }
0x34f5   :  { %v3117_v62 = vadd.f32 1.0, %v6509_v61 }
0x34f7   :  { %6510 = vrcp.f32 %v3117_v62 }
0x3501   :  { %v6511_v63 = vpop.eup %6510 }
0x3502   :  { %v3131_v11 = vsub.f32 1.0, %v6511_v63  ;;  %v3137_v15 = vmul.f32 %v6511_v63, %v3036_v51 }
0x3558   :  { %v3122_v1 = vpop.permute.xlu0 %3121 }
0x3559   :  { %v3124_v4 = vmul.f32 %v6511_v63, %v3122_v1 }
0x355b   :  { %3126 = vrot.lane.b32.xlu1 %v3124_v4, %s6709_s19 }
0x35cd   :  { %v3127_v5 = vpop.permute.xlu1 %3126 }
0x35ce   :  { %v3129_v6 = vadd.f32 %v3127_v5, %v3037_v57 }
0x35d0   :  { %6512 = vtanh.f32 %v3129_v6 }
0x35da   :  { %v6513_v7 = vpop.eup %6512 }
0x35db   :  { %3133 = vrot.lane.b32.xlu0 %v6513_v7, %s6710_s9 }
0x364d   :  { %v3134_v12 = vpop.permute.xlu0 %3133 }
0x364e   :  { %v3136_v45 = vmul.f32 %v3134_v12, %v3131_v11 }
0x3650   :  { %v3138_v17 = vadd.f32 %v3137_v15, %v3136_v45 }
0x3652   :  { %3141 = vrot.lane.b32.xlu1 %v3138_v17, %s6710_s9 }
0x36c4   :  { %v3142_v18 = vpop.permute.xlu1 %3141 }
0x36c5   :  { %6062 = vmatmul.mubr.msk.f32.vlgmr.msra.gmra.mrb[92].mxu1 %vm1101_vm5, %v3142_v18 }
0x36c6   :  { %6335 = vmatpush3.bf16.msra.mxu1 %v6833_v9  ;;  %6083 = vmatprep.mubr.msk.f32.mxu1 %vm6707_vm0, %v6708_v3 }
0x36c7   :  { %6336 = vmatprep.subr.bf16.mxu1 %v6706_v0 }
0x36ca   :  { %6338 = vmatpush3.bf16.msra.mxu1 %v6850_v13 }
0x36cb   :  { %6345 = vmatprep.subr.bf16.mxu1 %v6706_v0 }
0x3798   :  { %v3211_v20 = vpop.f32.mrb[92].mxu1 }
0x3799   :  { %v3212_v19 = vadd.f32 %v7504_v26, %v3211_v20  ;;  %v6063_v24 = vpop.f32.mrb[93].mxu1 }
0x379b   :  { %3223 = vrot.lane.b32.xlu0 %v3212_v19, %s6709_s19  ;;  %v3215_v34 = vadd.f32 %v3212_v19, %v3139_v29 }
0x379d   :  { %v5304_v39 = vmul.f32 -1.442695, %v3215_v34  ;;  %v3445_v34 = vld [vmem:[#allocation3 + $0xb8] sm:$0xff] }
0x379f   :  { %6514 = vpow2.f32 %v5304_v39 }
0x37a9   :  { %v6515_v44 = vpop.eup %6514 }
0x37aa   :  { %v3219_v50 = vadd.f32 1.0, %v6515_v44 }
0x37ac   :  { %6516 = vrcp.f32 %v3219_v50 }
0x37b6   :  { %v6517_v55 = vpop.eup %6516 }
0x37b7   :  { %v3233_v22 = vsub.f32 1.0, %v6517_v55  ;;  %v3239_v25 = vmul.f32 %v6517_v55, %v3138_v17 }
0x380d   :  { %v3224_v60 = vpop.permute.xlu0 %3223 }
0x380e   :  { %v3226_v10 = vmul.f32 %v6517_v55, %v3224_v60 }
0x3810   :  { %3228 = vrot.lane.b32.xlu1 %v3226_v10, %s6709_s19 }
0x3882   :  { %v3229_v8 = vpop.permute.xlu1 %3228 }
0x3883   :  { %v3231_v16 = vadd.f32 %v3229_v8, %v3139_v29 }
0x3885   :  { %6518 = vtanh.f32 %v3231_v16 }
0x388f   :  { %v6519_v21 = vpop.eup %6518 }
0x3890   :  { %3235 = vrot.lane.b32.xlu0 %v6519_v21, %s6710_s9 }
0x3902   :  { %v3236_v23 = vpop.permute.xlu0 %3235 }
0x3903   :  { %v3238_v27 = vmul.f32 %v3236_v23, %v3233_v22 }
0x3905   :  { %v3240_v28 = vadd.f32 %v3239_v25, %v3238_v27 }
0x3907   :  { %3243 = vrot.lane.b32.xlu1 %v3240_v28, %s6710_s9 }
0x3979   :  { %v3244_v30 = vpop.permute.xlu1 %3243 }
0x397a   :  { %6073 = vmatmul.mubr.msk.f32.vlgmr.msra.gmra.mrb[80].mxu0 %vm1101_vm5, %v3244_v30 }
0x397b   :  { %6341 = vmatpush3.bf16.msra.mxu0 %v6833_v9  ;;  %6094 = vmatprep.mubr.msk.f32.mxu0 %vm6707_vm0, %v6708_v3 }
0x397c   :  { %6342 = vmatprep.subr.bf16.mxu0 %v6706_v0 }
0x397f   :  { %6344 = vmatpush3.bf16.msra.mxu0 %v6850_v13 }
0x3980   :  { %6351 = vmatprep.subr.bf16.mxu0 %v6706_v0 }
0x3a4d   :  { %v3313_v31 = vpop.f32.mrb[80].mxu0 }
0x3a4e   :  { %v3314_v32 = vadd.f32 %v7504_v26, %v3313_v31  ;;  %v6074_v33 = vpop.f32.mrb[81].mxu0 }
0x3a50   :  { %3325 = vrot.lane.b32.xlu0 %v3314_v32, %s6709_s19  ;;  %v3317_v36 = vadd.f32 %v3314_v32, %v3241_v35 }
0x3a52   :  { %v5306_v37 = vmul.f32 -1.442695, %v3317_v36  ;;  %v3547_v36 = vld [vmem:[#allocation3 + $0xc0] sm:$0xff] }
0x3a54   :  { %6520 = vpow2.f32 %v5306_v37 }
0x3a5e   :  { %v6521_v38 = vpop.eup %6520 }
0x3a5f   :  { %v3321_v40 = vadd.f32 1.0, %v6521_v38 }
0x3a61   :  { %6522 = vrcp.f32 %v3321_v40 }
0x3a6b   :  { %v6523_v41 = vpop.eup %6522 }
0x3a6c   :  { %v3335_v52 = vsub.f32 1.0, %v6523_v41  ;;  %v3341_v49 = vmul.f32 %v6523_v41, %v3240_v28 }
0x3ac2   :  { %v3326_v42 = vpop.permute.xlu0 %3325 }
0x3ac3   :  { %v3328_v43 = vmul.f32 %v6523_v41, %v3326_v42 }
0x3ac5   :  { %3330 = vrot.lane.b32.xlu1 %v3328_v43, %s6709_s19 }
0x3b37   :  { %v3331_v46 = vpop.permute.xlu1 %3330 }
0x3b38   :  { %v3333_v47 = vadd.f32 %v3331_v46, %v3241_v35 }
0x3b3a   :  { %6524 = vtanh.f32 %v3333_v47 }
0x3b44   :  { %v6525_v2 = vpop.eup %6524 }
0x3b45   :  { %3337 = vrot.lane.b32.xlu0 %v6525_v2, %s6710_s9 }
0x3bb7   :  { %v3338_v48 = vpop.permute.xlu0 %3337 }
0x3bb8   :  { %v3340_v51 = vmul.f32 %v3338_v48, %v3335_v52 }
0x3bba   :  { %v3342_v53 = vadd.f32 %v3341_v49, %v3340_v51 }
0x3bbc   :  { %3345 = vrot.lane.b32.xlu1 %v3342_v53, %s6710_s9 }
0x3c2e   :  { %v3346_v14 = vpop.permute.xlu1 %3345 }
0x3c2f   :  { %6084 = vmatmul.mubr.msk.f32.vlgmr.msra.gmra.mrb[94].mxu1 %vm1101_vm5, %v3346_v14 }
0x3c30   :  { %6347 = vmatpush3.bf16.msra.mxu1 %v6833_v9  ;;  %6105 = vmatprep.mubr.msk.f32.mxu1 %vm6707_vm0, %v6708_v3 }
0x3c31   :  { %6348 = vmatprep.subr.bf16.mxu1 %v6706_v0 }
0x3c34   :  { %6350 = vmatpush3.bf16.msra.mxu1 %v6850_v13 }
0x3c35   :  { %6357 = vmatprep.subr.bf16.mxu1 %v6706_v0 }
0x3d02   :  { %v3415_v54 = vpop.f32.mrb[94].mxu1 }
0x3d03   :  { %v3416_v56 = vadd.f32 %v7504_v26, %v3415_v54  ;;  %v6085_v57 = vpop.f32.mrb[95].mxu1  ;;  %v7719_v54 = vld [vmem:[%s8255_s7] ss:$0 sm:$0xff]  ;;  %s6712_s7 = smov 8  }
0x3d05   :  { %3427 = vrot.lane.b32.xlu0 %v3416_v56, %s6709_s19  ;;  %v3419_v59 = vadd.f32 %v3416_v56, %v3343_v58 }
0x3d07   :  { %v5308_v61 = vmul.f32 -1.442695, %v3419_v59 }
0x3d09   :  { %6526 = vpow2.f32 %v5308_v61 }
0x3d13   :  { %v6527_v62 = vpop.eup %6526 }
0x3d14   :  { %v3423_v63 = vadd.f32 1.0, %v6527_v62 }
0x3d16   :  { %6528 = vrcp.f32 %v3423_v63 }
0x3d20   :  { %v6529_v1 = vpop.eup %6528 }
0x3d21   :  { %v3437_v12 = vsub.f32 1.0, %v6529_v1  ;;  %v3443_v45 = vmul.f32 %v6529_v1, %v3342_v53 }
0x3d77   :  { %v3428_v4 = vpop.permute.xlu0 %3427 }
0x3d78   :  { %v3430_v5 = vmul.f32 %v6529_v1, %v3428_v4 }
0x3d7a   :  { %3432 = vrot.lane.b32.xlu1 %v3430_v5, %s6709_s19 }
0x3dec   :  { %v3433_v6 = vpop.permute.xlu1 %3432 }
0x3ded   :  { %v3435_v7 = vadd.f32 %v3433_v6, %v3343_v58  ;;  %v7725_v58 = vld [vmem:[%s8259_s11] ss:$0 sm:$0xff]  ;;  %s6713_s11 = smov 124  }
0x3def   :  { %6530 = vtanh.f32 %v3435_v7 }
0x3df9   :  { %v6531_v11 = vpop.eup %6530 }
0x3dfa   :  { %3439 = vrot.lane.b32.xlu0 %v6531_v11, %s6710_s9 }
0x3e6c   :  { %v3440_v15 = vpop.permute.xlu0 %3439 }
0x3e6d   :  { %v3442_v17 = vmul.f32 %v3440_v15, %v3437_v12 }
0x3e6f   :  { %v3444_v18 = vadd.f32 %v3443_v45, %v3442_v17 }
0x3e71   :  { %3447 = vrot.lane.b32.xlu1 %v3444_v18, %s6710_s9 }
0x3ee3   :  { %v3448_v20 = vpop.permute.xlu1 %3447 }
0x3ee4   :  { %6095 = vmatmul.mubr.msk.f32.vlgmr.msra.gmra.mrb[82].mxu0 %vm1101_vm5, %v3448_v20 }
0x3ee5   :  { %6353 = vmatpush3.bf16.msra.mxu0 %v6833_v9  ;;  %6116 = vmatprep.mubr.msk.f32.mxu0 %vm6707_vm0, %v6708_v3 }
0x3ee6   :  { %6354 = vmatprep.subr.bf16.mxu0 %v6706_v0 }
0x3ee9   :  { %6356 = vmatpush3.bf16.msra.mxu0 %v6850_v13 }
0x3fb7   :  { %v3517_v19 = vpop.f32.mrb[82].mxu0 }
0x3fb8   :  { %v3518_v24 = vadd.f32 %v7504_v26, %v3517_v19  ;;  %v6096_v29 = vpop.f32.mrb[83].mxu0  ;;  %v7744_v19 = vld [vmem:[#allocation3 + $0xc8] sm:$0xff] }
0x3fba   :  { %3529 = vrot.lane.b32.xlu0 %v3518_v24, %s6709_s19  ;;  %v3521_v39 = vadd.f32 %v3518_v24, %v3445_v34 }
0x3fbc   :  { %v5310_v44 = vmul.f32 -1.442695, %v3521_v39 }
0x3fbe   :  { %6532 = vpow2.f32 %v5310_v44  ;;  %v7750_v44 = vld [vmem:[#allocation4] sm:$0xff] }
0x3fc8   :  { %v6533_v50 = vpop.eup %6532 }
0x3fc9   :  { %v3525_v55 = vadd.f32 1.0, %v6533_v50 }
0x3fcb   :  { %6534 = vrcp.f32 %v3525_v55  ;;  %v7753_v55 = vld [vmem:[#allocation4 + $0x18] sm:$0xff] }
0x3fd5   :  { %v6535_v60 = vpop.eup %6534 }
0x3fd6   :  { %v3539_v23 = vsub.f32 1.0, %v6535_v60  ;;  %v3545_v27 = vmul.f32 %v6535_v60, %v3444_v18 }
0x402c   :  { %v3530_v10 = vpop.permute.xlu0 %3529 }
0x402d   :  { %v3532_v8 = vmul.f32 %v6535_v60, %v3530_v10 }
0x402f   :  { %3534 = vrot.lane.b32.xlu1 %v3532_v8, %s6709_s19  ;;  %v7756_v8 = vld [vmem:[#allocation4 + $0x10] sm:$0xff] }
0x40a1   :  { %v3535_v16 = vpop.permute.xlu1 %3534 }
0x40a2   :  { %v3537_v21 = vadd.f32 %v3535_v16, %v3445_v34  ;;  %v7747_v34 = vld [vmem:[#allocation4 + $0x8] sm:$0xff] }
0x40a4   :  { %6536 = vtanh.f32 %v3537_v21 }
0x40ae   :  { %v6537_v22 = vpop.eup %6536 }
0x40af   :  { %3541 = vrot.lane.b32.xlu0 %v6537_v22, %s6710_s9  ;;  %v7759_v22 = vld [vmem:[#allocation4 + $0x28] sm:$0xff] }
0x4121   :  { %v3542_v25 = vpop.permute.xlu0 %3541 }
0x4122   :  { %v3544_v28 = vmul.f32 %v3542_v25, %v3539_v23 }
0x4124   :  { %v3546_v30 = vadd.f32 %v3545_v27, %v3544_v28  ;;  %v7762_v27 = vld [vmem:[#allocation4 + $0x20] sm:$0xff] }
0x4126   :  { %3549 = vrot.lane.b32.xlu1 %v3546_v30, %s6710_s9 }
0x4198   :  { %v3550_v31 = vpop.permute.xlu1 %3549 }
0x4199   :  { %6106 = vmatmul.mubr.msk.f32.vlgmr.msra.gmra.mrb[96].mxu1 %vm1101_vm5, %v3550_v31  ;;  %v7765_v31 = vld [vmem:[#allocation4 + $0x38] sm:$0xff] }
0x419a   :  { %6359 = vmatpush3.bf16.msra.mxu1 %v6833_v9  ;;  %6127 = vmatprep.mubr.msk.f32.mxu1 %vm6707_vm0, %v6708_v3 }
0x419b   :  { %6360 = vmatprep.subr.bf16.mxu1 %v6706_v0 }
0x419e   :  { %6362 = vmatpush3.bf16.msra.mxu1 %v6850_v13 }
0x426c   :  { %v3619_v32 = vpop.f32.mrb[96].mxu1 }
0x426d   :  { %v3620_v33 = vadd.f32 %v7504_v26, %v3619_v32  ;;  %v6107_v35 = vpop.f32.mrb[97].mxu1  ;;  %v7690_v26 = vld [vmem:[%s8258_s10] sm:$0xf] }
0x426e   :  { %6130 = vmatprep.subr.msk.mxu0 %vm3872_vm6, %v7690_v26  ;;  %6144 = vmatprep.subr.msk.mxu1 %vm3872_vm6, %v7690_v26 }
0x426f   :  { %3631 = vrot.lane.b32.xlu0 %v3620_v33, %s6709_s19  ;;  %v3623_v37 = vadd.f32 %v3620_v33, %v3547_v36 }
0x4271   :  { %v5312_v38 = vmul.f32 -1.442695, %v3623_v37 }
0x4273   :  { %6538 = vpow2.f32 %v5312_v38 }
0x427d   :  { %v6539_v40 = vpop.eup %6538 }
0x427e   :  { %v3627_v41 = vadd.f32 1.0, %v6539_v40 }
0x4280   :  { %6540 = vrcp.f32 %v3627_v41 }
0x428a   :  { %v6541_v9 = vpop.eup %6540 }
0x428b   :  { %v3641_v2 = vsub.f32 1.0, %v6541_v9  ;;  %v3647_v48 = vmul.f32 %v6541_v9, %v3546_v30 }
0x42e1   :  { %v3632_v42 = vpop.permute.xlu0 %3631 }
0x42e2   :  { %v3634_v43 = vmul.f32 %v6541_v9, %v3632_v42 }
0x42e4   :  { %3636 = vrot.lane.b32.xlu1 %v3634_v43, %s6709_s19 }
0x4356   :  { %v3637_v46 = vpop.permute.xlu1 %3636 }
0x4357   :  { %v3639_v13 = vadd.f32 %v3637_v46, %v3547_v36  ;;  %v7768_v36 = vld [vmem:[#allocation4 + $0x30] sm:$0xff] }
0x4359   :  { %6542 = vtanh.f32 %v3639_v13 }
0x4363   :  { %v6543_v47 = vpop.eup %6542 }
0x4364   :  { %3643 = vrot.lane.b32.xlu0 %v6543_v47, %s6710_s9 }
0x43d6   :  { %v3644_v52 = vpop.permute.xlu0 %3643 }
0x43d7   :  { %v3646_v49 = vmul.f32 %v3644_v52, %v3641_v2 }
0x43d9   :  { %v7697_v51 = vadd.f32 %v3647_v48, %v3646_v49 }
0x43db   :  { %3651 = vrot.lane.b32.xlu1 %v7697_v51, %s6710_s9 }
0x444d   :  { %v3652_v53 = vpop.permute.xlu1 %3651 }
0x444e   :  { %6117 = vmatmul.mubr.msk.f32.vlgmr.msra.gmra.mrb[84].mxu0 %vm1101_vm5, %v3652_v53 }
0x444f   :  { %6131 = vmatpush3.msk.msra.mxu0 %vm3872_vm6, %v7690_v26  ;;  %6132 = vmatprep.mubr.f32.mxu0 %v6708_v3 }
0x4450   :  { %6158 = vmatprep.subr.msk.mxu0 %vm3872_vm6, %v7690_v26 }
0x4452   :  { %6133 = vmatmul.mubr.f32.vlgmr.msra.gmra.mrb[86].mxu0 %v6708_v3 }
0x4453   :  { %6135 = vmatprep.mubr.f32.mxu0 %v6708_v3  ;;  %6159 = vmatpush3.msk.msra.mxu0 %vm3872_vm6, %v7690_v26 }
0x4456   :  { %6136 = vmatmul.mubr.f32.gmra.mrb[88].mxu0 %v6708_v3 }
0x4457   :  { %6138 = vmatprep.mubr.f32.mxu0 %v6708_v3 }
0x445a   :  { %6139 = vmatmul.mubr.f32.gmra.mrb[90].mxu0 %v6708_v3 }
0x445b   :  { %6141 = vmatprep.mubr.f32.mxu0 %v6708_v3 }
0x445e   :  { %6142 = vmatmul.mubr.f32.gmra.mrb[92].mxu0 %v6708_v3 }
0x4521   :  { %v3721_v14 = vpop.f32.mrb[84].mxu0 }
0x4522   :  { %v3722_v56 = vadd.f32 %v7719_v54, %v3721_v14  ;;  %v6118_v57 = vpop.f32.mrb[85].mxu0 }
0x4524   :  { %3733 = vrot.lane.b32.xlu0 %v3722_v56, %s6709_s19  ;;  %v3725_v24 = vadd.f32 %v3722_v56, %v7744_v19 }
0x4525   :  { %v6134_v59 = vpop.f32.mrb[86].mxu0 }
0x4526   :  { %v3948_v61 = vadd.f32 %v6134_v59, %v7725_v58  ;;  %v3942_v62 = vpop.f32.mrb[87].mxu0  ;;  %v5314_v29 = vmul.f32 -1.442695, %v3725_v24 }
0x4527   :  { %v3943_v63 = vadd.f32 %v7725_v58, %v3942_v62 }
0x4528   :  { %4047 = vrot.lane.b32.xlu0 %v3948_v61, %s6711_s28  ;;  %v3982_v39 = vadd.f32 %v3948_v61, %v7747_v34  ;;  %6544 = vpow2.f32 %v5314_v29 }
0x4529   :  { %v6137_v1 = vpop.f32.mrb[88].mxu0  ;;  %4045 = vrot.lane.b32.xlu1 %v3943_v63, %s6711_s28  ;;  %v3981_v50 = vadd.f32 %v3943_v63, %v7750_v44 }
0x452a   :  { %v3958_v4 = vadd.f32 %v6137_v1, %v7725_v58  ;;  %v3952_v5 = vpop.f32.mrb[89].mxu0  ;;  %v5320_v60 = vmul.f32 -1.442695, %v3982_v39 }
0x452b   :  { %v3953_v6 = vadd.f32 %v7725_v58, %v3952_v5  ;;  %v5319_v16 = vmul.f32 -1.442695, %v3981_v50 }
0x452c   :  { %4051 = vrot.lane.b32.xlu0 %v3958_v4, %s6711_s28  ;;  %v3984_v10 = vadd.f32 %v3958_v4, %v7753_v55  ;;  %6546 = vpow2.f32 %v5320_v60 }
0x452d   :  { %v6140_v7 = vpop.f32.mrb[90].mxu0  ;;  %4049 = vrot.lane.b32.xlu1 %v3953_v6, %s6711_s28  ;;  %v3983_v21 = vadd.f32 %v3953_v6, %v7756_v8  ;;  %6548 = vpow2.f32 %v5319_v16 }
0x452e   :  { %v3968_v11 = vadd.f32 %v6140_v7, %v7725_v58  ;;  %v3962_v12 = vpop.f32.mrb[91].mxu0  ;;  %v5322_v23 = vmul.f32 -1.442695, %v3984_v10 }
0x452f   :  { %v3963_v15 = vadd.f32 %v7725_v58, %v3962_v12  ;;  %v5321_v28 = vmul.f32 -1.442695, %v3983_v21 }
0x4530   :  { %4055 = vrot.lane.b32.xlu0 %v3968_v11, %s6711_s28  ;;  %v3986_v25 = vadd.f32 %v3968_v11, %v7759_v22  ;;  %6550 = vpow2.f32 %v5322_v23 }
0x4531   :  { %v6143_v45 = vpop.f32.mrb[92].mxu0  ;;  %4053 = vrot.lane.b32.xlu1 %v3963_v15, %s6711_s28  ;;  %v3985_v30 = vadd.f32 %v3963_v15, %v7762_v27  ;;  %6552 = vpow2.f32 %v5321_v28 }
0x4532   :  { %v3978_v17 = vadd.f32 %v6143_v45, %v7725_v58  ;;  %v3972_v18 = vpop.f32.mrb[93].mxu0  ;;  %v6545_v32 = vpop.eup %6544  ;;  %v5324_v33 = vmul.f32 -1.442695, %v3986_v25 }
0x4533   :  { %v3973_v20 = vadd.f32 %v7725_v58, %v3972_v18  ;;  %v5323_v37 = vmul.f32 -1.442695, %v3985_v30  ;;  %v3729_v40 = vadd.f32 1.0, %v6545_v32 }
0x4534   :  { %4059 = vrot.lane.b32.xlu0 %v3978_v17, %s6711_s28  ;;  %v3988_v35 = vadd.f32 %v3978_v17, %v7765_v31  ;;  %6554 = vpow2.f32 %v5324_v33 }
0x4535   :  { %4057 = vrot.lane.b32.xlu1 %v3973_v20, %s6711_s28  ;;  %v3987_v38 = vadd.f32 %v3973_v20, %v7768_v36  ;;  %6556 = vpow2.f32 %v5323_v37 }
0x4536   :  { %v5326_v41 = vmul.f32 -1.442695, %v3988_v35  ;;  %v6547_v42 = vpop.eup %6546  ;;  %6558 = vrcp.f32 %v3729_v40 }
0x4537   :  { %v5325_v9 = vmul.f32 -1.442695, %v3987_v38  ;;  %v6549_v43 = vpop.eup %6548  ;;  %v4014_v46 = vadd.f32 1.0, %v6547_v42 }
0x4538   :  { %6560 = vpow2.f32 %v5326_v41  ;;  %v4013_v47 = vadd.f32 1.0, %v6549_v43 }
0x4539   :  { %6562 = vpow2.f32 %v5325_v9 }
0x453a   :  { %v6551_v13 = vpop.eup %6550  ;;  %6564 = vrcp.f32 %v4014_v46 }
0x453b   :  { %v6553_v2 = vpop.eup %6552  ;;  %v4016_v52 = vadd.f32 1.0, %v6551_v13  ;;  %6566 = vrcp.f32 %v4013_v47 }
0x453c   :  { %v4015_v49 = vadd.f32 1.0, %v6553_v2 }
0x453d   :  { %6568 = vrcp.f32 %v4016_v52 }
0x453e   :  { %v6555_v48 = vpop.eup %6554  ;;  %6570 = vrcp.f32 %v4015_v49 }
0x453f   :  { %v6557_v53 = vpop.eup %6556  ;;  %v4018_v56 = vadd.f32 1.0, %v6555_v48 }
0x4540   :  { %v7771_v14 = vpop.eup %6558  ;;  %v4017_v59 = vadd.f32 1.0, %v6557_v53 }
0x4541   :  { %6572 = vrcp.f32 %v4018_v56 }
0x4542   :  { %v6561_v57 = vpop.eup %6560  ;;  %6574 = vrcp.f32 %v4017_v59  ;;  %v3743_v59 = vsub.f32 1.0, %v7771_v14 }
0x4543   :  { %v6563_v61 = vpop.eup %6562  ;;  %v4020_v1 = vadd.f32 1.0, %v6561_v57 }
0x4544   :  { %v4019_v4 = vadd.f32 1.0, %v6563_v61  ;;  %v7775_v5 = vpop.eup %6564 }
0x4545   :  { %v7777_v7 = vpop.eup %6566  ;;  %6576 = vrcp.f32 %v4020_v1 }
0x4546   :  { %6578 = vrcp.f32 %v4019_v4  ;;  %v4126_v4 = vsub.f32 1.0, %v7775_v5 }
0x4547   :  { %v7782_v45 = vpop.eup %6568 }
0x4548   :  { %v7785_v18 = vpop.eup %6570 }
0x454b   :  { %v7790_v39 = vpop.eup %6572 }
0x454c   :  { %v7793_v60 = vpop.eup %6574 }
0x454f   :  { %v7798_v23 = vpop.eup %6576 }
0x4550   :  { %v7801_v28 = vpop.eup %6578 }
0x4596   :  { %v3734_v62 = vpop.permute.xlu0 %3733 }
0x4597   :  { %v3736_v63 = vmul.f32 %v7771_v14, %v3734_v62  ;;  %v3749_v62 = vmul.f32 %v7771_v14, %v7697_v51  ;;  %v4128_v51 = vsub.f32 1.0, %v7782_v45 }
0x4599   :  { %3738 = vrot.lane.b32.xlu1 %v3736_v63, %s6709_s19 }
0x459a   :  { %v4048_v6 = vpop.permute.xlu0 %4047 }
0x459b   :  { %v4070_v11 = vmul.f32 %v7775_v5, %v4048_v6  ;;  %v4046_v12 = vpop.permute.xlu1 %4045 }
0x459c   :  { %v4069_v15 = vmul.f32 %v7777_v7, %v4046_v12  ;;  %v4174_v12 = vmul.f32 0.0, %v7775_v5 }
0x459d   :  { %4087 = vrot.lane.b32.xlu1 %v4070_v11, %s6712_s7  ;;  %v4125_v11 = vsub.f32 1.0, %v7777_v7 }
0x459e   :  { %v4052_v17 = vpop.permute.xlu0 %4051  ;;  %4085 = vrot.lane.b32.xlu0 %v4069_v15, %s6712_s7 }
0x459f   :  { %v4072_v20 = vmul.f32 %v7782_v45, %v4052_v17  ;;  %v4050_v24 = vpop.permute.xlu1 %4049 }
0x45a0   :  { %v4071_v29 = vmul.f32 %v7785_v18, %v4050_v24 }
0x45a1   :  { %4091 = vrot.lane.b32.xlu1 %v4072_v20, %s6712_s7  ;;  %v4173_v20 = vmul.f32 0.0, %v7777_v7 }
0x45a2   :  { %v4056_v50 = vpop.permute.xlu0 %4055  ;;  %4089 = vrot.lane.b32.xlu0 %v4071_v29, %s6712_s7 }
0x45a3   :  { %v4074_v10 = vmul.f32 %v7790_v39, %v4056_v50  ;;  %v4054_v16 = vpop.permute.xlu1 %4053 }
0x45a4   :  { %v4073_v21 = vmul.f32 %v7793_v60, %v4054_v16  ;;  %v4176_v16 = vmul.f32 0.0, %v7782_v45  ;;  %v4129_v45 = vsub.f32 1.0, %v7793_v60 }
0x45a5   :  { %4095 = vrot.lane.b32.xlu1 %v4074_v10, %s6712_s7  ;;  %v4127_v10 = vsub.f32 1.0, %v7785_v18 }
0x45a6   :  { %v4060_v25 = vpop.permute.xlu0 %4059  ;;  %4093 = vrot.lane.b32.xlu0 %v4073_v21, %s6712_s7 }
0x45a7   :  { %v4076_v30 = vmul.f32 %v7798_v23, %v4060_v25  ;;  %v4058_v32 = vpop.permute.xlu1 %4057  ;;  %v4175_v25 = vmul.f32 0.0, %v7785_v18  ;;  %v4177_v18 = vmul.f32 0.0, %v7793_v60  ;;  %v4179_v60 = vmul.f32 0.0, %v7801_v28 }
0x45a8   :  { %v4075_v33 = vmul.f32 %v7801_v28, %v4058_v32  ;;  %v4130_v32 = vsub.f32 1.0, %v7790_v39 }
0x45a9   :  { %4099 = vrot.lane.b32.xlu1 %v4076_v30, %s6712_s7 }
0x45aa   :  { %4097 = vrot.lane.b32.xlu0 %v4075_v33, %s6712_s7 }
0x460b   :  { %v3739_v35 = vpop.permute.xlu1 %3738 }
0x460c   :  { %v3741_v37 = vadd.f32 %v3739_v35, %v7744_v19 }
0x460e   :  { %6580 = vtanh.f32 %v3741_v37  ;;  %v4178_v37 = vmul.f32 0.0, %v7790_v39  ;;  %v4131_v39 = vsub.f32 1.0, %v7801_v28 }
0x460f   :  { %v4088_v38 = vpop.permute.xlu1 %4087 }
0x4610   :  { %v4110_v40 = vadd.f32 %v4088_v38, %v7747_v34  ;;  %v4086_v41 = vpop.permute.xlu0 %4085 }
0x4611   :  { %v4109_v9 = vadd.f32 %v4086_v41, %v7750_v44 }
0x4612   :  { %6582 = vtanh.f32 %v4110_v40 }
0x4613   :  { %6584 = vtanh.f32 %v4109_v9  ;;  %v4092_v42 = vpop.permute.xlu1 %4091 }
0x4614   :  { %v4112_v43 = vadd.f32 %v4092_v42, %v7753_v55  ;;  %v4090_v46 = vpop.permute.xlu0 %4089  ;;  %v4132_v42 = vsub.f32 1.0, %v7798_v23 }
0x4615   :  { %v4111_v13 = vadd.f32 %v4090_v46, %v7756_v8 }
0x4616   :  { %6586 = vtanh.f32 %v4112_v43 }
0x4617   :  { %6588 = vtanh.f32 %v4111_v13  ;;  %v4096_v47 = vpop.permute.xlu1 %4095  ;;  %v4180_v13 = vmul.f32 0.0, %v7798_v23 }
0x4618   :  { %v6581_v2 = vpop.eup %6580  ;;  %v4114_v19 = vadd.f32 %v4096_v47, %v7759_v22  ;;  %v4094_v52 = vpop.permute.xlu0 %4093 }
0x4619   :  { %v4113_v34 = vadd.f32 %v4094_v52, %v7762_v27  ;;  %3745 = vrot.lane.b32.xlu0 %v6581_v2, %s6710_s9 }
0x461a   :  { %6590 = vtanh.f32 %v4114_v19 }
0x461b   :  { %6592 = vtanh.f32 %v4113_v34  ;;  %v4100_v44 = vpop.permute.xlu1 %4099 }
0x461c   :  { %v6583_v48 = vpop.eup %6582  ;;  %v4116_v55 = vadd.f32 %v4100_v44, %v7765_v31  ;;  %v4098_v49 = vpop.permute.xlu0 %4097 }
0x461d   :  { %v6585_v53 = vpop.eup %6584  ;;  %v4115_v8 = vadd.f32 %v4098_v49, %v7768_v36  ;;  %4143 = vrot.lane.b32.xlu0 %v6583_v48, %s6713_s11 }
0x461e   :  { %6594 = vtanh.f32 %v4116_v55  ;;  %4141 = vrot.lane.b32.xlu1 %v6585_v53, %s6713_s11 }
0x461f   :  { %6596 = vtanh.f32 %v4115_v8 }
0x4620   :  { %v6587_v22 = vpop.eup %6586 }
0x4621   :  { %v6589_v27 = vpop.eup %6588  ;;  %4147 = vrot.lane.b32.xlu0 %v6587_v22, %s6713_s11 }
0x4622   :  { %4145 = vrot.lane.b32.xlu1 %v6589_v27, %s6713_s11 }
0x4624   :  { %v6591_v56 = vpop.eup %6590 }
0x4625   :  { %v6593_v57 = vpop.eup %6592  ;;  %4151 = vrot.lane.b32.xlu0 %v6591_v56, %s6713_s11 }
0x4626   :  { %4149 = vrot.lane.b32.xlu1 %v6593_v57, %s6713_s11 }
0x4628   :  { %v6595_v31 = vpop.eup %6594 }
0x4629   :  { %v6597_v36 = vpop.eup %6596  ;;  %4155 = vrot.lane.b32.xlu0 %v6595_v31, %s6713_s11 }
0x462a   :  { %4153 = vrot.lane.b32.xlu1 %v6597_v36, %s6713_s11 }
0x468b   :  { %v3746_v61 = vpop.permute.xlu0 %3745 }
0x468c   :  { %v3748_v63 = vmul.f32 %v3746_v61, %v3743_v59 }
0x468e   :  { %v7828_v1 = vadd.f32 %v3749_v62, %v3748_v63 }
0x468f   :  { %v4144_v6 = vpop.permute.xlu0 %4143 }
0x4690   :  { %v4166_v15 = vmul.f32 %v4144_v6, %v4126_v4  ;;  %v4142_v17 = vpop.permute.xlu1 %4141  ;;  %3753 = vrot.lane.b32.xlu1 %v7828_v1, %s6710_s9 }
0x4691   :  { %v4165_v24 = vmul.f32 %v4142_v17, %v4125_v11 }
0x4692   :  { %v7836_v29 = vadd.f32 %v4174_v12, %v4166_v15 }
0x4693   :  { %v7839_v14 = vadd.f32 %v4173_v20, %v4165_v24  ;;  %v4148_v50 = vpop.permute.xlu0 %4147  ;;  %v7912_v24 = vld [vmem:[#allocation4 + $0x48] sm:$0xff] }
0x4694   :  { %v4168_v5 = vmul.f32 %v4148_v50, %v4128_v51  ;;  %v4146_v21 = vpop.permute.xlu1 %4145  ;;  %4207 = vrot.lane.b32.xlu1 %v7836_v29, %s6713_s11  ;;  %v7915_v50 = vld [vmem:[#allocation4 + $0x40] sm:$0xff] }
0x4695   :  { %v4167_v7 = vmul.f32 %v4146_v21, %v4127_v10  ;;  %4205 = vrot.lane.b32.xlu0 %v7839_v14, %s6713_s11 }
0x4696   :  { %v7848_v30 = vadd.f32 %v4176_v16, %v4168_v5  ;;  %v7918_v16 = vld [vmem:[#allocation4 + $0x58] sm:$0xff] }
0x4697   :  { %v7851_v33 = vadd.f32 %v4175_v25, %v4167_v7  ;;  %v4152_v35 = vpop.permute.xlu0 %4151  ;;  %v7921_v25 = vld [vmem:[#allocation4 + $0x50] sm:$0xff] }
0x4698   :  { %v4170_v38 = vmul.f32 %v4152_v35, %v4130_v32  ;;  %v4150_v40 = vpop.permute.xlu1 %4149  ;;  %4211 = vrot.lane.b32.xlu1 %v7848_v30, %s6713_s11  ;;  %v7924_v35 = vld [vmem:[#allocation4 + $0x68] sm:$0xff] }
0x4699   :  { %v4169_v41 = vmul.f32 %v4150_v40, %v4129_v45  ;;  %4209 = vrot.lane.b32.xlu0 %v7851_v33, %s6713_s11 }
0x469a   :  { %v7860_v9 = vadd.f32 %v4178_v37, %v4170_v38  ;;  %v7927_v38 = vld [vmem:[#allocation4 + $0x60] sm:$0xff] }
0x469b   :  { %v7863_v43 = vadd.f32 %v4177_v18, %v4169_v41  ;;  %v4156_v46 = vpop.permute.xlu0 %4155  ;;  %v7930_v41 = vld [vmem:[#allocation4 + $0x78] sm:$0xff] }
0x469c   :  { %v4172_v47 = vmul.f32 %v4156_v46, %v4132_v42  ;;  %v4154_v2 = vpop.permute.xlu1 %4153  ;;  %4215 = vrot.lane.b32.xlu1 %v7860_v9, %s6713_s11 }
0x469d   :  { %v4171_v19 = vmul.f32 %v4154_v2, %v4131_v39  ;;  %4213 = vrot.lane.b32.xlu0 %v7863_v43, %s6713_s11  ;;  %v7933_v39 = vld [vmem:[#allocation4 + $0x70] sm:$0xff] }
0x469e   :  { %v7872_v52 = vadd.f32 %v4180_v13, %v4172_v47 }
0x469f   :  { %v7874_v34 = vadd.f32 %v4179_v60, %v4171_v19 }
0x46a0   :  { %4219 = vrot.lane.b32.xlu1 %v7872_v52, %s6713_s11 }
0x46a1   :  { %4217 = vrot.lane.b32.xlu0 %v7874_v34, %s6713_s11 }
0x4702   :  { %v3754_v23 = vpop.permute.xlu1 %3753 }
0x4703   :  { %6128 = vmatmul.mubr.msk.f32.vlgmr.msra.gmra.mrb[98].mxu1 %vm1101_vm5, %v3754_v23 }
0x4704   :  { %6145 = vmatpush3.msk.msra.mxu1 %vm3872_vm6, %v7690_v26  ;;  %vm5167_vm6 = vcmask 1047559  }
0x4705   :  { %6363 = vmatprep.subr.bf16.mxu1 %v6706_v0 }
0x4706   :  { %v4208_v28 = vpop.permute.xlu1 %4207 }
0x4707   :  { %v4206_v44 = vpop.permute.xlu0 %4205 }
0x4708   :  { %6146 = vmatprep.mubr.msk.f32.mxu1 %vm3869_vm7, %v4206_v44 }
0x4709   :  { %6147 = vmatmul.mubr.msk.f32.vlgmr.msra.gmra.mrb[100].mxu1 %vm3869_vm7, %v4208_v28 }
0x470a   :  { %v4212_v48 = vpop.permute.xlu1 %4211 }
0x470b   :  { %v4210_v55 = vpop.permute.xlu0 %4209 }
0x470c   :  { %6149 = vmatprep.mubr.msk.f32.mxu1 %vm3869_vm7, %v4210_v55 }
0x470d   :  { %6150 = vmatmul.mubr.msk.f32.gmra.mrb[102].mxu1 %vm3869_vm7, %v4212_v48 }
0x470e   :  { %v4216_v49 = vpop.permute.xlu1 %4215 }
0x470f   :  { %v4214_v53 = vpop.permute.xlu0 %4213 }
0x4710   :  { %6152 = vmatprep.mubr.msk.f32.mxu1 %vm3869_vm7, %v4214_v53 }
0x4711   :  { %6153 = vmatmul.mubr.msk.f32.gmra.mrb[104].mxu1 %vm3869_vm7, %v4216_v49 }
0x4712   :  { %v4220_v8 = vpop.permute.xlu1 %4219 }
0x4713   :  { %v4218_v26 = vpop.permute.xlu0 %4217 }
0x4714   :  { %6155 = vmatprep.mubr.msk.f32.mxu1 %vm3869_vm7, %v4218_v26 }
0x4715   :  { %6156 = vmatmul.mubr.msk.f32.gmra.mrb[106].mxu1 %vm3869_vm7, %v4220_v8 }
0x4716   :  { %6188 = vmatprep.mubr.msk.f32.mxu1 %vm6707_vm0, %v6708_v3  ;;  %vm5155_vm0 = vcmask 1041409  }
0x47d6   :  { %v7894_v22 = vpop.f32.mrb[98].mxu1 }
0x47d7   :  { %v6129_v27 = vpop.f32.mrb[99].mxu1 }
0x47dc   :  { %v6148_v56 = vpop.f32.mrb[100].mxu1 }
0x47dd   :  { %v4309_v57 = vadd.f32 %v6148_v56, %v7725_v58  ;;  %v4303_v31 = vpop.f32.mrb[101].mxu1 }
0x47de   :  { %v4304_v36 = vadd.f32 %v7725_v58, %v4303_v31 }
0x47df   :  { %4408 = vrot.lane.b32.xlu1 %v4309_v57, %s6711_s28  ;;  %v4343_v51 = vadd.f32 %v4309_v57, %v7912_v24 }
0x47e0   :  { %4406 = vrot.lane.b32.xlu0 %v4304_v36, %s6711_s28  ;;  %v6151_v59 = vpop.f32.mrb[102].mxu1  ;;  %v4342_v10 = vadd.f32 %v4304_v36, %v7915_v50 }
0x47e1   :  { %v4319_v61 = vadd.f32 %v6151_v59, %v7725_v58  ;;  %v4313_v62 = vpop.f32.mrb[103].mxu1  ;;  %v5337_v5 = vmul.f32 -1.442695, %v4343_v51 }
0x47e2   :  { %v4314_v63 = vadd.f32 %v7725_v58, %v4313_v62  ;;  %v5336_v7 = vmul.f32 -1.442695, %v4342_v10 }
0x47e3   :  { %4412 = vrot.lane.b32.xlu1 %v4319_v61, %s6711_s28  ;;  %v4345_v21 = vadd.f32 %v4319_v61, %v7918_v16  ;;  %6598 = vpow2.f32 %v5337_v5 }
0x47e4   :  { %4410 = vrot.lane.b32.xlu0 %v4314_v63, %s6711_s28  ;;  %v6154_v3 = vpop.f32.mrb[104].mxu1  ;;  %v4344_v32 = vadd.f32 %v4314_v63, %v7921_v25  ;;  %6600 = vpow2.f32 %v5336_v7 }
0x47e5   :  { %v4329_v4 = vadd.f32 %v6154_v3, %v7725_v58  ;;  %v4323_v6 = vpop.f32.mrb[105].mxu1  ;;  %v5339_v45 = vmul.f32 -1.442695, %v4345_v21 }
0x47e6   :  { %v4324_v11 = vadd.f32 %v7725_v58, %v4323_v6  ;;  %v5338_v40 = vmul.f32 -1.442695, %v4344_v32 }
0x47e7   :  { %4416 = vrot.lane.b32.xlu1 %v4329_v4, %s6711_s28  ;;  %v4347_v37 = vadd.f32 %v4329_v4, %v7924_v35  ;;  %6602 = vpow2.f32 %v5339_v45 }
0x47e8   :  { %4414 = vrot.lane.b32.xlu0 %v4324_v11, %s6711_s28  ;;  %v6157_v12 = vpop.f32.mrb[106].mxu1  ;;  %v4346_v18 = vadd.f32 %v4324_v11, %v7927_v38  ;;  %6604 = vpow2.f32 %v5338_v40 }
0x47e9   :  { %v4339_v15 = vadd.f32 %v6157_v12, %v7725_v58  ;;  %v4333_v17 = vpop.f32.mrb[107].mxu1  ;;  %v5341_v42 = vmul.f32 -1.442695, %v4347_v37 }
0x47ea   :  { %v4334_v20 = vadd.f32 %v7725_v58, %v4333_v17  ;;  %v5340_v13 = vmul.f32 -1.442695, %v4346_v18 }
0x47eb   :  { %4420 = vrot.lane.b32.xlu1 %v4339_v15, %s6711_s28  ;;  %v4349_v46 = vadd.f32 %v4339_v15, %v7930_v41  ;;  %6606 = vpow2.f32 %v5341_v42 }
0x47ec   :  { %4418 = vrot.lane.b32.xlu0 %v4334_v20, %s6711_s28  ;;  %v4348_v47 = vadd.f32 %v4334_v20, %v7933_v39  ;;  %6608 = vpow2.f32 %v5340_v13 }
0x47ed   :  { %v5343_v2 = vmul.f32 -1.442695, %v4349_v46  ;;  %v6599_v19 = vpop.eup %6598 }
0x47ee   :  { %v5342_v60 = vmul.f32 -1.442695, %v4348_v47  ;;  %v6601_v23 = vpop.eup %6600  ;;  %v4375_v28 = vadd.f32 1.0, %v6599_v19 }
0x47ef   :  { %6610 = vpow2.f32 %v5343_v2  ;;  %v4374_v48 = vadd.f32 1.0, %v6601_v23 }
0x47f0   :  { %6612 = vpow2.f32 %v5342_v60 }
0x47f1   :  { %v6603_v44 = vpop.eup %6602  ;;  %6614 = vrcp.f32 %v4375_v28 }
0x47f2   :  { %v6605_v55 = vpop.eup %6604  ;;  %v4377_v49 = vadd.f32 1.0, %v6603_v44  ;;  %6616 = vrcp.f32 %v4374_v48 }
0x47f3   :  { %v4376_v26 = vadd.f32 1.0, %v6605_v55 }
0x47f4   :  { %6618 = vrcp.f32 %v4377_v49 }
0x47f5   :  { %v6607_v53 = vpop.eup %6606  ;;  %6620 = vrcp.f32 %v4376_v26 }
0x47f6   :  { %v6609_v8 = vpop.eup %6608  ;;  %v4379_v27 = vadd.f32 1.0, %v6607_v53 }
0x47f7   :  { %v4378_v57 = vadd.f32 1.0, %v6609_v8 }
0x47f8   :  { %6622 = vrcp.f32 %v4379_v27 }
0x47f9   :  { %v6611_v56 = vpop.eup %6610  ;;  %6624 = vrcp.f32 %v4378_v57 }
0x47fa   :  { %v6613_v31 = vpop.eup %6612  ;;  %v4381_v36 = vadd.f32 1.0, %v6611_v56 }
0x47fb   :  { %v4380_v59 = vadd.f32 1.0, %v6613_v31  ;;  %v7936_v61 = vpop.eup %6614 }
0x47fc   :  { %v7938_v63 = vpop.eup %6616  ;;  %6626 = vrcp.f32 %v4381_v36  ;;  %v4487_v31 = vsub.f32 1.0, %v7936_v61 }
0x47fd   :  { %6628 = vrcp.f32 %v4380_v59  ;;  %v4486_v59 = vsub.f32 1.0, %v7938_v63 }
0x47fe   :  { %v7943_v11 = vpop.eup %6618 }
0x47ff   :  { %v7946_v15 = vpop.eup %6620 }
0x4802   :  { %v7951_v10 = vpop.eup %6622 }
0x4803   :  { %v7954_v21 = vpop.eup %6624 }
0x4806   :  { %v7959_v37 = vpop.eup %6626 }
0x4807   :  { %v7962_v18 = vpop.eup %6628 }
0x4851   :  { %v4409_v62 = vpop.permute.xlu1 %4408 }
0x4852   :  { %v4431_v3 = vmul.f32 %v7936_v61, %v4409_v62  ;;  %v4407_v4 = vpop.permute.xlu0 %4406  ;;  %v4535_v62 = vmul.f32 %v7936_v61, %v7836_v29 }
0x4853   :  { %v4430_v6 = vmul.f32 %v7938_v63, %v4407_v4 }
0x4854   :  { %4448 = vrot.lane.b32.xlu1 %v4431_v3, %s6712_s7 }
0x4855   :  { %v4413_v12 = vpop.permute.xlu1 %4412  ;;  %4446 = vrot.lane.b32.xlu0 %v4430_v6, %s6712_s7  ;;  %v4534_v6 = vmul.f32 %v7938_v63, %v7839_v14  ;;  %v4536_v14 = vmul.f32 %v7946_v15, %v7851_v33 }
0x4856   :  { %v4433_v17 = vmul.f32 %v7943_v11, %v4413_v12  ;;  %v4411_v20 = vpop.permute.xlu0 %4410 }
0x4857   :  { %v4432_v51 = vmul.f32 %v7946_v15, %v4411_v20  ;;  %v4489_v20 = vsub.f32 1.0, %v7943_v11 }
0x4858   :  { %4452 = vrot.lane.b32.xlu1 %v4433_v17, %s6712_s7 }
0x4859   :  { %v4417_v5 = vpop.permute.xlu1 %4416  ;;  %4450 = vrot.lane.b32.xlu0 %v4432_v51, %s6712_s7 }
0x485a   :  { %v4435_v7 = vmul.f32 %v7951_v10, %v4417_v5  ;;  %v4415_v32 = vpop.permute.xlu0 %4414 }
0x485b   :  { %v4434_v45 = vmul.f32 %v7954_v21, %v4415_v32  ;;  %v4537_v32 = vmul.f32 %v7943_v11, %v7848_v30  ;;  %v4490_v30 = vsub.f32 1.0, %v7954_v21  ;;  %v4539_v11 = vmul.f32 %v7951_v10, %v7860_v9 }
0x485c   :  { %4456 = vrot.lane.b32.xlu1 %v4435_v7, %s6712_s7  ;;  %v4488_v7 = vsub.f32 1.0, %v7946_v15  ;;  %v4538_v15 = vmul.f32 %v7954_v21, %v7863_v43  ;;  %v4492_v9 = vsub.f32 1.0, %v7962_v18  ;;  %v4540_v21 = vmul.f32 %v7962_v18, %v7874_v34 }
0x485d   :  { %v4421_v40 = vpop.permute.xlu1 %4420  ;;  %4454 = vrot.lane.b32.xlu0 %v4434_v45, %s6712_s7 }
0x485e   :  { %v4437_v42 = vmul.f32 %v7959_v37, %v4421_v40  ;;  %v4419_v46 = vpop.permute.xlu0 %4418  ;;  %v4491_v40 = vsub.f32 1.0, %v7951_v10  ;;  %v4541_v10 = vmul.f32 %v7959_v37, %v7872_v52  ;;  %v3824_v52 = vadd.f32 %v7719_v54, %v7894_v22 }
0x485f   :  { %v4436_v13 = vmul.f32 %v7962_v18, %v4419_v46 }
0x4860   :  { %4460 = vrot.lane.b32.xlu1 %v4437_v42, %s6712_s7 }
0x4861   :  { %4458 = vrot.lane.b32.xlu0 %v4436_v13, %s6712_s7 }
0x48c6   :  { %v4449_v47 = vpop.permute.xlu1 %4448 }
0x48c7   :  { %v4471_v2 = vadd.f32 %v4449_v47, %v7912_v24  ;;  %v4447_v60 = vpop.permute.xlu0 %4446 }
0x48c8   :  { %v4470_v19 = vadd.f32 %v4447_v60, %v7915_v50  ;;  %v4493_v60 = vsub.f32 1.0, %v7959_v37 }
0x48c9   :  { %6630 = vtanh.f32 %v4471_v2 }
0x48ca   :  { %6632 = vtanh.f32 %v4470_v19  ;;  %v4453_v23 = vpop.permute.xlu1 %4452 }
0x48cb   :  { %v4473_v28 = vadd.f32 %v4453_v23, %v7918_v16  ;;  %v4451_v44 = vpop.permute.xlu0 %4450 }
0x48cc   :  { %v4472_v48 = vadd.f32 %v4451_v44, %v7921_v25 }
0x48cd   :  { %6634 = vtanh.f32 %v4473_v28 }
0x48ce   :  { %6636 = vtanh.f32 %v4472_v48  ;;  %v4457_v55 = vpop.permute.xlu1 %4456 }
0x48cf   :  { %v4475_v49 = vadd.f32 %v4457_v55, %v7924_v35  ;;  %v4455_v53 = vpop.permute.xlu0 %4454 }
0x48d0   :  { %v4474_v26 = vadd.f32 %v4455_v53, %v7927_v38 }
0x48d1   :  { %6638 = vtanh.f32 %v4475_v49 }
0x48d2   :  { %6640 = vtanh.f32 %v4474_v26  ;;  %v4461_v24 = vpop.permute.xlu1 %4460 }
0x48d3   :  { %v6631_v50 = vpop.eup %6630  ;;  %v4477_v8 = vadd.f32 %v4461_v24, %v7930_v41  ;;  %v4459_v27 = vpop.permute.xlu0 %4458  ;;  %v8051_v24 = vld [vmem:[#allocation3 + $0xd0] sm:$0xff] }
0x48d4   :  { %v6633_v56 = vpop.eup %6632  ;;  %v4476_v16 = vadd.f32 %v4459_v27, %v7933_v39  ;;  %4504 = vrot.lane.b32.xlu1 %v6631_v50, %s6713_s11  ;;  %v3827_v50 = vadd.f32 %v3824_v52, %v8051_v24 }
0x48d5   :  { %6642 = vtanh.f32 %v4477_v8  ;;  %4502 = vrot.lane.b32.xlu0 %v6633_v56, %s6713_s11 }
0x48d6   :  { %6644 = vtanh.f32 %v4476_v16  ;;  %v5316_v8 = vmul.f32 -1.442695, %v3827_v50 }
0x48d7   :  { %v6635_v25 = vpop.eup %6634 }
0x48d8   :  { %v6637_v35 = vpop.eup %6636  ;;  %4508 = vrot.lane.b32.xlu1 %v6635_v25, %s6713_s11  ;;  %6646 = vpow2.f32 %v5316_v8 }
0x48d9   :  { %4506 = vrot.lane.b32.xlu0 %v6637_v35, %s6713_s11 }
0x48db   :  { %v6639_v38 = vpop.eup %6638 }
0x48dc   :  { %v6641_v57 = vpop.eup %6640  ;;  %4512 = vrot.lane.b32.xlu1 %v6639_v38, %s6713_s11 }
0x48dd   :  { %4510 = vrot.lane.b32.xlu0 %v6641_v57, %s6713_s11 }
0x48df   :  { %v6643_v41 = vpop.eup %6642 }
0x48e0   :  { %v6645_v39 = vpop.eup %6644  ;;  %4516 = vrot.lane.b32.xlu1 %v6643_v41, %s6713_s11 }
0x48e1   :  { %4514 = vrot.lane.b32.xlu0 %v6645_v39, %s6713_s11 }
0x48e2   :  { %v6647_v27 = vpop.eup %6646 }
0x48e3   :  { %v3831_v38 = vadd.f32 1.0, %v6647_v27 }
0x48e5   :  { %6648 = vrcp.f32 %v3831_v38 }
0x4946   :  { %v4505_v36 = vpop.permute.xlu1 %4504 }
0x4947   :  { %v4527_v3 = vmul.f32 %v4505_v36, %v4487_v31  ;;  %v4503_v4 = vpop.permute.xlu0 %4502 }
0x4948   :  { %v4526_v12 = vmul.f32 %v4503_v4, %v4486_v59 }
0x4949   :  { %v7990_v17 = vadd.f32 %v4535_v62, %v4527_v3 }
0x494a   :  { %v7993_v51 = vadd.f32 %v4534_v6, %v4526_v12  ;;  %v4509_v5 = vpop.permute.xlu1 %4508 }
0x494b   :  { %v4529_v45 = vmul.f32 %v4509_v5, %v4489_v20  ;;  %4568 = vrot.lane.b32.xlu1 %v7990_v17, %s6713_s11  ;;  %v4507_v29 = vpop.permute.xlu0 %4506 }
0x494c   :  { %v4528_v61 = vmul.f32 %v4507_v29, %v4488_v7  ;;  %4566 = vrot.lane.b32.xlu0 %v7993_v51, %s6713_s11  ;;  %v8070_v7 = vpop.eup %6648 }
0x494d   :  { %v8004_v63 = vadd.f32 %v4537_v32, %v4529_v45  ;;  %v8074_v45 = vld [vmem:[#allocation4 + $0x88] sm:$0xff] }
0x494e   :  { %v8007_v42 = vadd.f32 %v4536_v14, %v4528_v61  ;;  %v4513_v46 = vpop.permute.xlu1 %4512  ;;  %v8077_v14 = vld [vmem:[#allocation4 + $0x80] sm:$0xff] }
0x494f   :  { %v4531_v13 = vmul.f32 %v4513_v46, %v4491_v40  ;;  %4572 = vrot.lane.b32.xlu1 %v8004_v63, %s6713_s11  ;;  %v4511_v33 = vpop.permute.xlu0 %4510 }
0x4950   :  { %v4530_v47 = vmul.f32 %v4511_v33, %v4490_v30  ;;  %4570 = vrot.lane.b32.xlu0 %v8007_v42, %s6713_s11  ;;  %v8083_v30 = vld [vmem:[#allocation4 + $0x90] sm:$0xff]  ;;  %v8086_v33 = vld [vmem:[#allocation4 + $0xa8] sm:$0xff] }
0x4951   :  { %v8018_v2 = vadd.f32 %v4539_v11, %v4531_v13 }
0x4952   :  { %v8021_v19 = vadd.f32 %v4538_v15, %v4530_v47  ;;  %v4517_v23 = vpop.permute.xlu1 %4516 }
0x4953   :  { %v4533_v28 = vmul.f32 %v4517_v23, %v4493_v60  ;;  %4576 = vrot.lane.b32.xlu1 %v8018_v2, %s6713_s11  ;;  %v4515_v43 = vpop.permute.xlu0 %4514  ;;  %v8089_v60 = vld [vmem:[#allocation4 + $0xa0] sm:$0xff] }
0x4954   :  { %v4532_v44 = vmul.f32 %v4515_v43, %v4492_v9  ;;  %4574 = vrot.lane.b32.xlu0 %v8021_v19, %s6713_s11 }
0x4955   :  { %v8032_v48 = vadd.f32 %v4541_v10, %v4533_v28  ;;  %v8092_v10 = vld [vmem:[#allocation4 + $0xb8] sm:$0xff] }
0x4956   :  { %v8034_v55 = vadd.f32 %v4540_v21, %v4532_v44  ;;  %v8095_v21 = vld [vmem:[#allocation4 + $0xb0] sm:$0xff] }
0x4957   :  { %4580 = vrot.lane.b32.xlu1 %v8032_v48, %s6713_s11 }
0x4958   :  { %4578 = vrot.lane.b32.xlu0 %v8034_v55, %s6713_s11 }
0x495c   :  { %3835 = vrot.lane.b32.xlu0 %v3824_v52, %s6709_s19 }
0x49bd   :  { %v4569_v34 = vpop.permute.xlu1 %4568 }
0x49be   :  { %v4567_v37 = vpop.permute.xlu0 %4566 }
0x49bf   :  { %6160 = vmatprep.mubr.msk.f32.mxu0 %vm3869_vm7, %v4567_v37 }
0x49c0   :  { %6161 = vmatmul.mubr.msk.f32.vlgmr.msra.gmra.mrb[94].mxu0 %vm3869_vm7, %v4569_v34 }
0x49c1   :  { %v4573_v18 = vpop.permute.xlu1 %4572 }
0x49c2   :  { %v4571_v49 = vpop.permute.xlu0 %4570 }
0x49c3   :  { %6163 = vmatprep.mubr.msk.f32.mxu0 %vm3869_vm7, %v4571_v49 }
0x49c4   :  { %6164 = vmatmul.mubr.msk.f32.gmra.mrb[96].mxu0 %vm3869_vm7, %v4573_v18 }
0x49c5   :  { %v4577_v53 = vpop.permute.xlu1 %4576 }
0x49c6   :  { %v4575_v26 = vpop.permute.xlu0 %4574 }
0x49c7   :  { %6166 = vmatprep.mubr.msk.f32.mxu0 %vm3869_vm7, %v4575_v26 }
0x49c8   :  { %6167 = vmatmul.mubr.msk.f32.gmra.mrb[98].mxu0 %vm3869_vm7, %v4577_v53 }
0x49c9   :  { %v4581_v22 = vpop.permute.xlu1 %4580 }
0x49ca   :  { %v4579_v54 = vpop.permute.xlu0 %4578 }
0x49cb   :  { %6169 = vmatprep.mubr.msk.f32.mxu0 %vm3869_vm7, %v4579_v54 }
0x49cc   :  { %6170 = vmatmul.mubr.msk.f32.gmra.mrb[100].mxu0 %vm3869_vm7, %v4581_v22 }
0x49ce   :  { %v3836_v5 = vpop.permute.xlu0 %3835 }
0x49cf   :  { %v3838_v32 = vmul.f32 %v8070_v7, %v3836_v5 }
0x4a93   :  { %v6162_v56 = vpop.f32.mrb[94].mxu0 }
0x4a94   :  { %v4670_v16 = vadd.f32 %v6162_v56, %v7725_v58  ;;  %v4664_v25 = vpop.f32.mrb[95].mxu0 }
0x4a95   :  { %v4665_v35 = vadd.f32 %v7725_v58, %v4664_v25 }
0x4a96   :  { %4769 = vrot.lane.b32.xlu0 %v4670_v16, %s6711_s28  ;;  %v4704_v29 = vadd.f32 %v4670_v16, %v8074_v45 }
0x4a97   :  { %4767 = vrot.lane.b32.xlu1 %v4665_v35, %s6711_s28  ;;  %v6165_v57 = vpop.f32.mrb[96].mxu0  ;;  %v4703_v61 = vadd.f32 %v4665_v35, %v8077_v14 }
0x4a98   :  { %v4680_v41 = vadd.f32 %v6165_v57, %v7725_v58  ;;  %v4674_v39 = vpop.f32.mrb[97].mxu0  ;;  %v5354_v40 = vmul.f32 -1.442695, %v4704_v29 }
0x4a99   :  { %v4675_v31 = vadd.f32 %v7725_v58, %v4674_v39  ;;  %v5353_v11 = vmul.f32 -1.442695, %v4703_v61 }
0x4a9a   :  { %4773 = vrot.lane.b32.xlu0 %v4680_v41, %s6711_s28  ;;  %6650 = vpow2.f32 %v5354_v40 }
0x4a9b   :  { %4771 = vrot.lane.b32.xlu1 %v4675_v31, %s6711_s28  ;;  %v6168_v36 = vpop.f32.mrb[98].mxu0  ;;  %v4705_v13 = vadd.f32 %v4675_v31, %v8083_v30  ;;  %6652 = vpow2.f32 %v5353_v11 }
0x4a9c   :  { %v4690_v59 = vadd.f32 %v6168_v36, %v7725_v58  ;;  %v4684_v62 = vpop.f32.mrb[99].mxu0 }
0x4a9d   :  { %v4685_v3 = vadd.f32 %v7725_v58, %v4684_v62  ;;  %v5355_v23 = vmul.f32 -1.442695, %v4705_v13 }
0x4a9e   :  { %4777 = vrot.lane.b32.xlu0 %v4690_v59, %s6711_s28  ;;  %v4708_v47 = vadd.f32 %v4690_v59, %v8086_v33 }
0x4a9f   :  { %4775 = vrot.lane.b32.xlu1 %v4685_v3, %s6711_s28  ;;  %v6171_v4 = vpop.f32.mrb[100].mxu0  ;;  %v4707_v9 = vadd.f32 %v4685_v3, %v8089_v60 }
0x4aa0   :  { %v4700_v6 = vadd.f32 %v6171_v4, %v7725_v58  ;;  %v4694_v12 = vpop.f32.mrb[101].mxu0  ;;  %v5358_v28 = vmul.f32 -1.442695, %v4708_v47 }
0x4aa1   :  { %v4695_v20 = vadd.f32 %v7725_v58, %v4694_v12  ;;  %v8080_v58 = vld [vmem:[#allocation4 + $0x98] sm:$0xff]  ;;  %v5357_v44 = vmul.f32 -1.442695, %v4707_v9 }
0x4aa2   :  { %4781 = vrot.lane.b32.xlu0 %v4700_v6, %s6711_s28  ;;  %v4706_v46 = vadd.f32 %v4680_v41, %v8080_v58  ;;  %v4710_v43 = vadd.f32 %v4700_v6, %v8092_v10 }
0x4aa3   :  { %4779 = vrot.lane.b32.xlu1 %v4695_v20, %s6711_s28  ;;  %v4709_v52 = vadd.f32 %v4695_v20, %v8095_v21  ;;  %s6721_s28 = smov 56  }
0x4aa4   :  { %v5356_v15 = vmul.f32 -1.442695, %v4706_v46  ;;  %v5360_v34 = vmul.f32 -1.442695, %v4710_v43  ;;  %v6651_v18 = vpop.eup %6650 }
0x4aa5   :  { %v5359_v37 = vmul.f32 -1.442695, %v4709_v52  ;;  %v6653_v49 = vpop.eup %6652  ;;  %v4736_v53 = vadd.f32 1.0, %v6651_v18 }
0x4aa6   :  { %6654 = vpow2.f32 %v5356_v15  ;;  %v4735_v54 = vadd.f32 1.0, %v6653_v49 }
0x4aa7   :  { %3840 = vrot.lane.b32.xlu1 %v3838_v32, %s6709_s19  ;;  %6656 = vpow2.f32 %v5355_v23 }
0x4aa8   :  { %6658 = vpow2.f32 %v5358_v28 }
0x4aa9   :  { %6660 = vpow2.f32 %v5357_v44 }
0x4aaa   :  { %6662 = vpow2.f32 %v5360_v34 }
0x4aab   :  { %6664 = vpow2.f32 %v5359_v37 }
0x4aac   :  { %6666 = vrcp.f32 %v4736_v53 }
0x4aad   :  { %6668 = vrcp.f32 %v4735_v54 }
0x4ab0   :  { %v6655_v26 = vpop.eup %6654 }
0x4ab1   :  { %v6657_v22 = vpop.eup %6656  ;;  %v4738_v50 = vadd.f32 1.0, %v6655_v26 }
0x4ab2   :  { %v6659_v8 = vpop.eup %6658  ;;  %v4737_v27 = vadd.f32 1.0, %v6657_v22 }
0x4ab3   :  { %v6661_v56 = vpop.eup %6660  ;;  %6670 = vrcp.f32 %v4738_v50  ;;  %v4740_v16 = vadd.f32 1.0, %v6659_v8 }
0x4ab4   :  { %v6663_v25 = vpop.eup %6662  ;;  %6672 = vrcp.f32 %v4737_v27  ;;  %v4739_v35 = vadd.f32 1.0, %v6661_v56 }
0x4ab5   :  { %v6665_v38 = vpop.eup %6664  ;;  %6674 = vrcp.f32 %v4740_v16  ;;  %v4742_v57 = vadd.f32 1.0, %v6663_v25 }
0x4ab6   :  { %6676 = vrcp.f32 %v4739_v35  ;;  %v4741_v41 = vadd.f32 1.0, %v6665_v38  ;;  %v8098_v39 = vpop.eup %6666 }
0x4ab7   :  { %v8100_v36 = vpop.eup %6668  ;;  %6678 = vrcp.f32 %v4742_v57 }
0x4ab8   :  { %6680 = vrcp.f32 %v4741_v41 }
0x4abd   :  { %v8105_v4 = vpop.eup %6670 }
0x4abe   :  { %v8108_v12 = vpop.eup %6672 }
0x4abf   :  { %v8113_v29 = vpop.eup %6674 }
0x4ac0   :  { %v8116_v40 = vpop.eup %6676 }
0x4ac1   :  { %v8121_v15 = vpop.eup %6678 }
0x4ac2   :  { %v8124_v23 = vpop.eup %6680 }
0x4b08   :  { %v4770_v31 = vpop.permute.xlu0 %4769 }
0x4b09   :  { %v4792_v59 = vmul.f32 %v8098_v39, %v4770_v31  ;;  %v4768_v62 = vpop.permute.xlu1 %4767 }
0x4b0a   :  { %v4791_v3 = vmul.f32 %v8100_v36, %v4768_v62 }
0x4b0b   :  { %4809 = vrot.lane.b32.xlu1 %v4792_v59, %s6712_s7  ;;  %v3845_v59 = vsub.f32 1.0, %v8070_v7 }
0x4b0c   :  { %4807 = vrot.lane.b32.xlu0 %v4791_v3, %s6712_s7  ;;  %v4774_v6 = vpop.permute.xlu0 %4773  ;;  %v3851_v3 = vmul.f32 %v8070_v7, %v7828_v1  ;;  %v4966_v1 = vld [vmem:[%s8260_s12 + $0x20] sm:$0xff]  ;;  %v4967_v7 = vld [vmem:[%s8260_s12 + $0x28] sm:$0xff] }
0x4b0d   :  { %v4794_v20 = vmul.f32 %v8105_v4, %v4774_v6  ;;  %v4772_v5 = vpop.permute.xlu1 %4771 }
0x4b0e   :  { %v4793_v32 = vmul.f32 %v8108_v12, %v4772_v5  ;;  %v4964_v5 = vld [vmem:[%s8260_s12 + $0x10] sm:$0xff] }
0x4b0f   :  { %4813 = vrot.lane.b32.xlu1 %v4794_v20, %s6712_s7 }
0x4b10   :  { %4811 = vrot.lane.b32.xlu0 %v4793_v32, %s6712_s7  ;;  %v4778_v61 = vpop.permute.xlu0 %4777  ;;  %v4965_v32 = vld [vmem:[%s8260_s12 + $0x18] sm:$0xff] }
0x4b11   :  { %v4796_v46 = vmul.f32 %v8113_v29, %v4778_v61  ;;  %v4776_v11 = vpop.permute.xlu1 %4775  ;;  %v6367_v61 = vpack.c.bf16 %v4965_v32, %v4964_v5 }
0x4b12   :  { %v4795_v13 = vmul.f32 %v8116_v40, %v4776_v11  ;;  %v4848_v11 = vsub.f32 1.0, %v8098_v39 }
0x4b13   :  { %4817 = vrot.lane.b32.xlu1 %v4796_v46, %s6712_s7  ;;  %v6370_v46 = vpack.c.bf16 %v4967_v7, %v4966_v1 }
0x4b14   :  { %4815 = vrot.lane.b32.xlu0 %v4795_v13, %s6712_s7  ;;  %v4782_v47 = vpop.permute.xlu0 %4781 }
0x4b15   :  { %v4798_v9 = vmul.f32 %v8121_v15, %v4782_v47  ;;  %v4780_v28 = vpop.permute.xlu1 %4779  ;;  %v4847_v47 = vsub.f32 1.0, %v8100_v36 }
0x4b16   :  { %v4797_v43 = vmul.f32 %v8124_v23, %v4780_v28 }
0x4b17   :  { %4821 = vrot.lane.b32.xlu1 %v4798_v9, %s6712_s7  ;;  %v4896_v9 = vmul.f32 %v8098_v39, %v7990_v17  ;;  %v4850_v17 = vsub.f32 1.0, %v8105_v4 }
0x4b18   :  { %4819 = vrot.lane.b32.xlu0 %v4797_v43, %s6712_s7  ;;  %s6722_s7 = smov 52  }
0x4b19   :  { %v3841_v44 = vpop.permute.xlu1 %3840 }
0x4b1a   :  { %v3843_v52 = vadd.f32 %v3841_v44, %v8051_v24  ;;  %v4968_v44 = vld [vmem:[%s8260_s12 + $0x30] sm:$0xff] }
0x4b1c   :  { %6682 = vtanh.f32 %v3843_v52  ;;  %v4969_v52 = vld [vmem:[%s8260_s12 + $0x38] sm:$0xff] }
0x4b26   :  { %v6683_v34 = vpop.eup %6682 }
0x4b27   :  { %3847 = vrot.lane.b32.xlu0 %v6683_v34, %s6710_s9  ;;  %v4895_v34 = vmul.f32 %v8100_v36, %v7993_v51  ;;  %v4897_v51 = vmul.f32 %v8108_v12, %v8007_v42  ;;  %v4900_v42 = vmul.f32 %v8113_v29, %v8018_v2  ;;  %v4902_v2 = vmul.f32 %v8121_v15, %v8032_v48  ;;  %v5059_v48 = vld [vmem:[%s8262_s14] sm:$0xff] }
0x4b7d   :  { %v4810_v37 = vpop.permute.xlu1 %4809 }
0x4b7e   :  { %v4832_v18 = vadd.f32 %v4810_v37, %v8074_v45  ;;  %v4808_v49 = vpop.permute.xlu0 %4807 }
0x4b7f   :  { %v4831_v53 = vadd.f32 %v4808_v49, %v8077_v14 }
0x4b80   :  { %6684 = vtanh.f32 %v4832_v18  ;;  %v6373_v18 = vpack.c.bf16 %v4969_v52, %v4968_v44  ;;  %v5054_v44 = vld [vmem:[%s8263_s0 + $0x18] sm:$0xff] }
0x4b81   :  { %6686 = vtanh.f32 %v4831_v53  ;;  %v4814_v26 = vpop.permute.xlu1 %4813 }
0x4b82   :  { %v4834_v54 = vadd.f32 %v4814_v26, %v8080_v58  ;;  %v4812_v22 = vpop.permute.xlu0 %4811  ;;  %v4898_v26 = vmul.f32 %v8105_v4, %v8004_v63  ;;  %v21_v63 = vstv %s8261_s15  ;;  %s6719_s15 = smov 48  }
0x4b83   :  { %v4833_v50 = vadd.f32 %v4812_v22, %v8083_v30  ;;  %22 = vst [vmem:[#allocation5] sm:$0x1] %v21_v63 }
0x4b84   :  { %6688 = vtanh.f32 %v4834_v54 }
0x4b85   :  { %6690 = vtanh.f32 %v4833_v50  ;;  %v4818_v24 = vpop.permute.xlu1 %4817 }
0x4b86   :  { %v4836_v8 = vadd.f32 %v4818_v24, %v8086_v33  ;;  %v4816_v27 = vpop.permute.xlu0 %4815  ;;  %v4852_v24 = vsub.f32 1.0, %v8113_v29 }
0x4b87   :  { %v4835_v56 = vadd.f32 %v4816_v27, %v8089_v60  ;;  %v4962_v60 = vld [vmem:[%s8260_s12] sm:$0xff] }
0x4b88   :  { %6692 = vtanh.f32 %v4836_v8 }
0x4b89   :  { %6694 = vtanh.f32 %v4835_v56  ;;  %v4822_v45 = vpop.permute.xlu1 %4821  ;;  %v4851_v56 = vsub.f32 1.0, %v8116_v40 }
0x4b8a   :  { %v6685_v14 = vpop.eup %6684  ;;  %v4838_v16 = vadd.f32 %v4822_v45, %v8092_v10  ;;  %v4820_v25 = vpop.permute.xlu0 %4819  ;;  %v4963_v10 = vld [vmem:[%s8260_s12 + $0x8] sm:$0xff]  ;;  %s6715_s12 = smov 28   ;;  %v6716_v45 = vmov 0  }
0x4b8b   :  { %v6687_v35 = vpop.eup %6686  ;;  %v4837_v58 = vadd.f32 %v4820_v25, %v8095_v21  ;;  %4865 = vrot.lane.b32.xlu0 %v6685_v14, %s6713_s11  ;;  %v6364_v38 = vpack.c.bf16 %v4963_v10, %v4962_v60  ;;  %6393 = vset.pattern.permute.xlu1 %v6716_v45  ;;  %v4899_v14 = vmul.f32 %v8116_v40, %v8021_v19 }
0x4b8c   :  { %6696 = vtanh.f32 %v4838_v16  ;;  %4863 = vrot.lane.b32.xlu1 %v6687_v35, %s6713_s11  ;;  %6392 = vset.pattern.permute.xlu0 %v6716_v45  ;;  %v4854_v35 = vsub.f32 1.0, %v8121_v15  ;;  %v4901_v19 = vmul.f32 %v8124_v23, %v8034_v55  ;;  %v5058_v45 = vld [vmem:[%s8263_s0 + $0x38] sm:$0xff] }
0x4b8d   :  { %6698 = vtanh.f32 %v4837_v58  ;;  %6365 = vmatpush3.bf16.msra.mxu1 %v6364_v38  ;;  %v5363_v38 = vld [vmem:[#allocation5] ss:$0 sm:$0xff] }
0x4b8e   :  { %v6689_v30 = vpop.eup %6688  ;;  %6366 = vmatprep.subr.bf16.mxu1 %v6706_v0 }
0x4b8f   :  { %v6691_v33 = vpop.eup %6690  ;;  %4869 = vrot.lane.b32.xlu0 %v6689_v30, %s6713_s11 }
0x4b90   :  { %4867 = vrot.lane.b32.xlu1 %v6691_v33, %s6713_s11  ;;  %v4853_v33 = vsub.f32 1.0, %v8124_v23 }
0x4b91   :  { %6368 = vmatpush3.bf16.msra.mxu1 %v6367_v61 }
0x4b92   :  { %v6693_v21 = vpop.eup %6692  ;;  %6369 = vmatprep.subr.bf16.mxu1 %v6706_v0 }
0x4b93   :  { %v6695_v57 = vpop.eup %6694  ;;  %4873 = vrot.lane.b32.xlu0 %v6693_v21, %s6713_s11 }
0x4b94   :  { %4871 = vrot.lane.b32.xlu1 %v6695_v57, %s6713_s11 }
0x4b95   :  { %6371 = vmatpush3.bf16.msra.mxu1 %v6370_v46 }
0x4b96   :  { %v6697_v41 = vpop.eup %6696  ;;  %6372 = vmatprep.subr.bf16.mxu1 %v6706_v0  ;;  %v4849_v0 = vsub.f32 1.0, %v8108_v12 }
0x4b97   :  { %v6699_v31 = vpop.eup %6698  ;;  %4877 = vrot.lane.b32.xlu0 %v6697_v41, %s6713_s11 }
0x4b98   :  { %4875 = vrot.lane.b32.xlu1 %v6699_v31, %s6713_s11 }
0x4b99   :  { %v3848_v62 = vpop.permute.xlu0 %3847  ;;  %6374 = vmatpush3.bf16.msra.mxu1 %v6373_v18  ;;  %v5055_v18 = vld [vmem:[%s8263_s0 + $0x20] sm:$0xff] }
0x4b9a   :  { %v3850_v6 = vmul.f32 %v3848_v62, %v3845_v59 }
0x4b9c   :  { %v3852_v20 = vadd.f32 %v3851_v3, %v3850_v6 }
0x4b9e   :  { %4912 = vrot.lane.b32.xlu1 %v3852_v20, %s6710_s9 }
0x4bfd   :  { %v4866_v13 = vpop.permute.xlu0 %4865 }
0x4bfe   :  { %v4888_v28 = vmul.f32 %v4866_v13, %v4848_v11  ;;  %v4864_v43 = vpop.permute.xlu1 %4863  ;;  %v5051_v13 = vld [vmem:[%s8263_s0] sm:$0xff] }
0x4bff   :  { %v4887_v37 = vmul.f32 %v4864_v43, %v4847_v47  ;;  %v5052_v47 = vld [vmem:[%s8263_s0 + $0x8] sm:$0xff] }
0x4c00   :  { %v4904_v49 = vadd.f32 %v4896_v9, %v4888_v28  ;;  %v5053_v9 = vld [vmem:[%s8263_s0 + $0x10] sm:$0xff] }
0x4c01   :  { %v4903_v39 = vadd.f32 %v4895_v34, %v4887_v37  ;;  %v4870_v53 = vpop.permute.xlu0 %4869 }
0x4c02   :  { %v4890_v54 = vmul.f32 %v4870_v53, %v4850_v17  ;;  %v4868_v22 = vpop.permute.xlu1 %4867  ;;  %4920 = vrot.lane.b32.xlu1 %v4904_v49, %s6714_s25 }
0x4c03   :  { %v4889_v36 = vmul.f32 %v4868_v22, %v4849_v0  ;;  %4916 = vrot.lane.b32.xlu0 %v4903_v39, %s6715_s12  ;;  %v5056_v0 = vld [vmem:[%s8263_s0 + $0x28] sm:$0xff] }
0x4c04   :  { %v4906_v50 = vadd.f32 %v4898_v26, %v4890_v54 }
0x4c05   :  { %v4905_v8 = vadd.f32 %v4897_v51, %v4889_v36  ;;  %v4874_v27 = vpop.permute.xlu0 %4873 }
0x4c06   :  { %v4892_v4 = vmul.f32 %v4874_v27, %v4852_v24  ;;  %v4872_v12 = vpop.permute.xlu1 %4871  ;;  %4928 = vrot.lane.b32.xlu1 %v4906_v50, %s6717_s6  ;;  %v5057_v50 = vld [vmem:[%s8263_s0 + $0x30] sm:$0xff] }
0x4c07   :  { %v4891_v16 = vmul.f32 %v4872_v12, %v4851_v56  ;;  %4924 = vrot.lane.b32.xlu0 %v4905_v8, %s6718_s27 }
0x4c08   :  { %v4908_v25 = vadd.f32 %v4900_v42, %v4892_v4 }
0x4c09   :  { %v4907_v58 = vadd.f32 %v4899_v14, %v4891_v16  ;;  %v4878_v30 = vpop.permute.xlu0 %4877 }
0x4c0a   :  { %v4894_v29 = vmul.f32 %v4878_v30, %v4854_v35  ;;  %v4876_v60 = vpop.permute.xlu1 %4875  ;;  %4936 = vrot.lane.b32.xlu1 %v4908_v25, %s6719_s15 }
0x4c0b   :  { %v4893_v40 = vmul.f32 %v4876_v60, %v4853_v33  ;;  %4932 = vrot.lane.b32.xlu0 %v4907_v58, %s6720_s4 }
0x4c0c   :  { %v4910_v10 = vadd.f32 %v4902_v2, %v4894_v29 }
0x4c0d   :  { %v4909_v21 = vadd.f32 %v4901_v19, %v4893_v40 }
0x4c0e   :  { %4944 = vrot.lane.b32.xlu1 %v4910_v10, %s6721_s28 }
0x4c0f   :  { %4940 = vrot.lane.b32.xlu0 %v4909_v21, %s6722_s7 }
0x4c10   :  { %v4913_v15 = vpop.permute.xlu1 %4912 }
0x4c12   :  { %5136 = vperm.xlu1 %6393, %v5363_v38  }
0x4c13   :  { %5062 = vperm.xlu0 %6392, %v5059_v48  }
0x4c74   :  { %v4921_v57 = vpop.permute.xlu1 %4920 }
0x4c75   :  { %v4917_v41 = vpop.permute.xlu0 %4916 }
0x4c76   :  { %v4947_v55 = vsel %vm1101_vm5, %v4913_v15, %v4917_v41  ;;  %vm5165_vm5 = vcmask 1046534  }
0x4c77   :  { %v4949_v31 = vsel %vm4948_vm8, %v4947_v55, %v4921_v57 }
0x4c78   :  { %v4929_v23 = vpop.permute.xlu1 %4928 }
0x4c79   :  { %v4925_v59 = vpop.permute.xlu0 %4924 }
0x4c7a   :  { %v4951_v62 = vsel %vm4950_vm9, %v4949_v31, %v4925_v59 }
0x4c7b   :  { %v4953_v6 = vsel %vm4952_vm10, %v4951_v62, %v4929_v23 }
0x4c7c   :  { %v4937_v3 = vpop.permute.xlu1 %4936 }
0x4c7d   :  { %v4933_v20 = vpop.permute.xlu0 %4932 }
0x4c7e   :  { %v4955_v5 = vsel %vm4954_vm11, %v4953_v6, %v4933_v20 }
0x4c7f   :  { %v4957_v32 = vsel %vm4956_vm12, %v4955_v5, %v4937_v3 }
0x4c80   :  { %v4945_v1 = vpop.permute.xlu1 %4944 }
0x4c81   :  { %v4941_v61 = vpop.permute.xlu0 %4940 }
0x4c82   :  { %v4959_v7 = vsel %vm4958_vm13, %v4957_v32, %v4941_v61 }
0x4c83   :  { %v4961_v46 = vsel %vm4960_vm14, %v4959_v7, %v4945_v1 }
0x4c84   :  { %6189 = vmatmul.mubr.msk.f32.vlgmr.msra.gmra.mrb[108].mxu1 %vm4977_vm15, %v4961_v46 }
0x4c91   :  { %v5137_v3 = vpop.permute.xlu1 %5136 }
0x4c92   :  { %v5063_v11 = vpop.permute.xlu0 %5062 }
0x4c93   :  { %v5065_v28 = vmul.f32 %v5063_v11, %v5051_v13  ;;  %v5066_v43 = vmul.f32 %v5063_v11, %v5052_v47  ;;  %v5067_v52 = vmul.f32 %v5063_v11, %v5053_v9  ;;  %v5068_v49 = vmul.f32 %v5063_v11, %v5054_v44 }
0x4c94   :  { %v5069_v26 = vmul.f32 %v5063_v11, %v5055_v18  ;;  %v5070_v24 = vmul.f32 %v5063_v11, %v5056_v0  ;;  %v5071_v63 = vmul.f32 %v5063_v11, %v5057_v50  ;;  %v5072_v25 = vmul.f32 %v5063_v11, %v5058_v45 }
0x4c95   :  { %v5073_v34 = vsel %vm3869_vm7, %v5065_v28, 0.0  ;;  %v5080_v37 = vsel %vm3869_vm7, %v5066_v43, 0.0  ;;  %v5087_v53 = vsel %vm3869_vm7, %v5067_v52, 0.0  ;;  %v5094_v22 = vsel %vm3869_vm7, %v5068_v49, 0.0 }
0x4c96   :  { %v5074_v17 = vrot.slane %v5073_v34, 4  ;;  %v5081_v39 = vrot.slane %v5080_v37, 4  ;;  %v5088_v54 = vrot.slane %v5087_v53, 4  ;;  %v5095_v8 = vrot.slane %v5094_v22, 4 }
0x4c97   :  { %v5101_v27 = vsel %vm3869_vm7, %v5069_v26, 0.0  ;;  %v5108_v14 = vsel %vm3869_vm7, %v5070_v24, 0.0  ;;  %v5115_v2 = vsel %vm3869_vm7, %v5071_v63, 0.0  ;;  %v5122_v10 = vsel %vm3869_vm7, %v5072_v25, 0.0  ;;  %v5361_v24 = vld [vmem:[%s8264_s13] ss:$0 sm:$0xff] }
0x4c98   :  { %v5075_v51 = vadd.f32 %v5074_v17, %v5073_v34  ;;  %v5082_v36 = vadd.f32 %v5081_v39, %v5080_v37  ;;  %v5089_v56 = vadd.f32 %v5088_v54, %v5087_v53  ;;  %v5102_v12 = vrot.slane %v5101_v27, 4 }
0x4c99   :  { %v5096_v16 = vadd.f32 %v5095_v8, %v5094_v22  ;;  %v5109_v58 = vrot.slane %v5108_v14, 4  ;;  %v5116_v40 = vrot.slane %v5115_v2, 4  ;;  %v5123_v41 = vrot.slane %v5122_v10, 4 }
0x4c9a   :  { %v5076_v42 = vrot.slane %v5075_v51, 2  ;;  %v5083_v4 = vrot.slane %v5082_v36, 2  ;;  %v5090_v35 = vrot.slane %v5089_v56, 2  ;;  %v5103_v29 = vadd.f32 %v5102_v12, %v5101_v27 }
0x4c9b   :  { %v5097_v60 = vrot.slane %v5096_v16, 2  ;;  %v5110_v48 = vadd.f32 %v5109_v58, %v5108_v14  ;;  %v5117_v23 = vadd.f32 %v5116_v40, %v5115_v2  ;;  %v5124_v5 = vadd.f32 %v5123_v41, %v5122_v10 }
0x4c9c   :  { %v5077_v30 = vadd.f32 %v5076_v42, %v5075_v51  ;;  %v5084_v33 = vadd.f32 %v5083_v4, %v5082_v36  ;;  %v5091_v19 = vadd.f32 %v5090_v35, %v5089_v56  ;;  %v5104_v15 = vrot.slane %v5103_v29, 2 }
0x4c9d   :  { %v5098_v57 = vadd.f32 %v5097_v60, %v5096_v16  ;;  %v5111_v62 = vrot.slane %v5110_v48, 2  ;;  %v5118_v61 = vrot.slane %v5117_v23, 2  ;;  %v5125_v47 = vrot.slane %v5124_v5, 2 }
0x4c9e   :  { %v5078_v21 = vrot.slane %v5077_v30, 1  ;;  %v5085_v38 = vrot.slane %v5084_v33, 1  ;;  %v5092_v55 = vrot.slane %v5091_v19, 1  ;;  %v5105_v6 = vadd.f32 %v5104_v15, %v5103_v29 }
0x4c9f   :  { %v5099_v20 = vrot.slane %v5098_v57, 1  ;;  %v5112_v46 = vadd.f32 %v5111_v62, %v5110_v48  ;;  %v5119_v28 = vadd.f32 %v5118_v61, %v5117_v23  ;;  %v5126_v37 = vadd.f32 %v5125_v47, %v5124_v5 }
0x4ca0   :  { %v5079_v31 = vadd.f32 %v5078_v21, %v5077_v30  ;;  %v5086_v59 = vadd.f32 %v5085_v38, %v5084_v33  ;;  %v5093_v32 = vadd.f32 %v5092_v55, %v5091_v19  ;;  %v5106_v11 = vrot.slane %v5105_v6, 1 }
0x4ca1   :  { %v5100_v13 = vadd.f32 %v5099_v20, %v5098_v57  ;;  %v5113_v43 = vrot.slane %v5112_v46, 1  ;;  %v5120_v18 = vrot.slane %v5119_v28, 1  ;;  %v5127_v53 = vrot.slane %v5126_v37, 1 }
0x4ca2   :  { %v5139_v1 = vadd.f32 %v5137_v3, %v5079_v31  ;;  %v5140_v7 = vadd.f32 %v5137_v3, %v5086_v59  ;;  %v5141_v9 = vadd.f32 %v5137_v3, %v5093_v32  ;;  %v5107_v52 = vadd.f32 %v5106_v11, %v5105_v6 }
0x4ca3   :  { %v5142_v34 = vadd.f32 %v5137_v3, %v5100_v13  ;;  %v5114_v17 = vadd.f32 %v5113_v43, %v5112_v46  ;;  %v5121_v26 = vadd.f32 %v5120_v18, %v5119_v28  ;;  %v5128_v51 = vadd.f32 %v5127_v53, %v5126_v37 }
0x4ca4   :  { %v5156_v44 = vsel %vm5155_vm0, %v5140_v7, %v5139_v1  ;;  %v5143_v39 = vadd.f32 %v5137_v3, %v5107_v52 }
0x4ca5   :  { %v5158_v49 = vsel %vm5157_vm1, %v5141_v9, %v5156_v44  ;;  %v5144_v54 = vadd.f32 %v5137_v3, %v5114_v17  ;;  %v5145_v36 = vadd.f32 %v5137_v3, %v5121_v26  ;;  %v5146_v8 = vadd.f32 %v5137_v3, %v5128_v51 }
0x4ca6   :  { %v5160_v0 = vsel %vm5159_vm2, %v5142_v34, %v5158_v49 }
0x4ca7   :  { %v5162_v22 = vsel %vm5161_vm3, %v5143_v39, %v5160_v0 }
0x4ca8   :  { %v5164_v50 = vsel %vm5163_vm4, %v5144_v54, %v5162_v22 }
0x4ca9   :  { %v5166_v27 = vsel %vm5165_vm5, %v5145_v36, %v5164_v50 }
0x4caa   :  { %v5168_v42 = vsel %vm5167_vm6, %v5146_v8, %v5166_v27 }
0x4d57   :  { %v5047_v56 = vpop.f32.mrb[108].mxu1 }
0x4d58   :  { %v5048_v45 = vadd.f32 %v5361_v24, %v5047_v56  ;;  %v6190_v63 = vpop.f32.mrb[109].mxu1 }
0x4d5a   :  { %v5170_v4 = vadd.f32 %v5168_v42, %v5048_v45 }
0x4d5c   :  { %v5364_v12 = vmul.f32 -1.442695, %v5170_v4 }
0x4d5e   :  { %6700 = vpow2.f32 %v5364_v12 }
0x4d68   :  { %v6701_v14 = vpop.eup %6700 }
0x4d69   :  { %v5174_v16 = vadd.f32 1.0, %v6701_v14 }
0x4d6b   :  { %6702 = vrcp.f32 %v5174_v16 }
0x4d75   :  { %v6703_v25 = vpop.eup %6702 }
0x4d76   :  { %5177 = vst.msk [vmem:[%s8265_s16] sm:$0xff] %vm3869_vm7, %v6703_v25 }

</bundles_post_ra>
